<compile_context>
chip_gen: v7x
topology: tpu7x:2x2x1
jax: 0.10.0
libtpu: 0.0.40
codegen_flags: <defaults>
</compile_context>

<pallas_src>
import math
import numpy as np
import jax
import jax.numpy as jnp
from jax.experimental import pallas as pl
from jax.experimental.pallas import tpu as pltpu

FEATURE_DIM = 4
LOCAL = 8
GLOBAL = 8
HID = LOCAL + GLOBAL              # 16 = local_info_dim + global_info_dim
OUT_DIM = 1
MID_DIM = FEATURE_DIM + 2 * HID   # 36
MID_AUG = MID_DIM + 1             # 37: extra constant "1" row carries the bias
NUM_LAYERS = 7
PI = float(np.pi)

# Internal channel order: [ego_local(8) | g_ego(8) | opp_local(8) | g_opp(8) | ch(4) | 1]
# Original (PyTorch concat) order:    [ch(4) | ego_local(8) | g_ego(8) | opp_local(8) | g_opp(8)]
# PERM[i] = original channel index stored at internal position i.
PERM = tuple(range(FEATURE_DIM, MID_DIM)) + tuple(range(FEATURE_DIM))


# ---------------------------------------------------------------------------
# Fused Pallas kernel: 7 PI layers + user mean + conv_8 * pi, one batch tile.
# ---------------------------------------------------------------------------
def fused_risnet_kernel(ch_ref, w_ref, w8_ref, o_ref, feat_ref):
    """ch_ref  : (Bt, U*4, A)   raw channel tile (PyTorch NCW layout)
       w_ref   : (7, 32, 37)    fused [ego|opp] weights, transposed; rows 0:16
                                ego / 16:32 opp, column 36 = bias, columns
                                permuted to the internal channel order
       w8_ref  : (37, 1)        conv_8 weight (row 36 = bias), permuted
       o_ref   : (Bt, 1, A)     output tile
       feat_ref: (U, Bt, 37, A) VMEM scratch holding the running features
    """
    Bt, uf, A = ch_ref.shape
    U = uf // FEATURE_DIM
    inv_um1 = 1.0 / float(U - 1)
    inv_u = 1.0 / float(U)

    # ---- initialize the feature scratch (channel + ones rows written once) --
    for u in range(U):
        for b in range(Bt):
            feat_ref[u, b, 0:2 * HID, :] = jnp.zeros((2 * HID, A), jnp.float32)
            feat_ref[u, b, 2 * HID:MID_DIM, :] = \
                ch_ref[b, FEATURE_DIM * u:FEATURE_DIM * (u + 1), :]
            feat_ref[u, b, MID_DIM:MID_AUG, :] = jnp.ones((1, A), jnp.float32)

    # ---- 7 fused PI layers (fully unrolled) ---------------------------------
    for l in range(NUM_LAYERS):
        w = w_ref[l]                                            # (32, 37)
        # fused ego|opp conv + ReLU; all reads happen before any write below
        y = [[jnp.maximum(
                  jnp.dot(w, feat_ref[u, b],
                          preferred_element_type=jnp.float32), 0.0)
              for b in range(Bt)] for u in range(U)]            # each (32, A)

        for b in range(Bt):
            opp = [y[u][b][HID:, :] for u in range(U)]          # (16, A) each
            opp_sum = opp[0]
            for u in range(1, U):
                opp_sum = opp_sum + opp[u]
            for u in range(U):
                ego = y[u][b][:HID, :]                          # (16, A)
                opp_out = (opp_sum - opp[u]) * inv_um1          # leave-one-out mean
                g_ego = jnp.mean(ego[LOCAL:, :], axis=1, keepdims=True)      # (8,1)
                g_opp = jnp.mean(opp_out[LOCAL:, :], axis=1, keepdims=True)  # (8,1)
                # aligned sublane slice-stores (no concatenate temp)
                feat_ref[u, b, 0:LOCAL, :] = ego[:LOCAL, :]
                feat_ref[u, b, LOCAL:2 * LOCAL, :] = \
                    jnp.broadcast_to(g_ego, (GLOBAL, A))
                feat_ref[u, b, 2 * LOCAL:3 * LOCAL, :] = opp_out[:LOCAL, :]
                feat_ref[u, b, 3 * LOCAL:4 * LOCAL, :] = \
                    jnp.broadcast_to(g_opp, (GLOBAL, A))
                # rows 32:37 (channel + ones) are layer-invariant

    # ---- mean over users, conv_8 (bias via ones row), * pi ------------------
    w8 = w8_ref[...]                                            # (37, 1)
    for b in range(Bt):
        acc = feat_ref[0, b]
        for u in range(1, U):
            acc = acc + feat_ref[u, b]
        m = acc * inv_u                                         # (37, A)
        o_ref[b, :, :] = jnp.sum(m * w8, axis=0, keepdims=True) * PI   # (1, A)


# ---------------------------------------------------------------------------
# Weight packing: stack all layers, merge ego|opp, fold bias, permute rows.
# ---------------------------------------------------------------------------
def _pack_weights(params):
    perm = np.array(PERM)
    w_layers = []
    for l in range(NUM_LAYERS):
        we, be = params["ego"][l]            # (Cin, 16), (1, 16)
        wo, bo = params["opp"][l]
        cin = we.shape[0]
        w = jnp.concatenate([we, wo], axis=1)                   # (Cin, 32)
        if cin < MID_DIM:                                       # layer 0: 4 -> 36
            w = jnp.concatenate(
                [w, jnp.zeros((MID_DIM - cin, 2 * HID), jnp.float32)], axis=0)
        w = w[perm, :]                                          # internal row order
        b = jnp.concatenate([be, bo], axis=1)                   # (1, 32)
        w_aug = jnp.concatenate([w, b], axis=0)                 # (37, 32)
        w_layers.append(w_aug.T)                                # (32, 37)
    w_all = jnp.stack(w_layers, axis=0)                         # (7, 32, 37)

    w8, b8 = params["final"]                                    # (36, 1), (1, 1)
    w8_aug = jnp.concatenate([w8[perm, :], b8], axis=0)         # (37, 1)
    return w_all, w8_aug


# ---------------------------------------------------------------------------
# Parameters (deterministic, PyTorch Conv1d-style uniform init)
# ---------------------------------------------------------------------------
def init_params(key, num_users):
    del num_users  # weights are shared over users (permutation invariant net)

    def conv_init(k, cin, cout):
        k1, k2 = jax.random.split(k)
        bound = 1.0 / math.sqrt(cin)        # kernel_size = 1
        w = jax.random.uniform(k1, (cin, cout), jnp.float32, -bound, bound)
        b = jax.random.uniform(k2, (1, cout), jnp.float32, -bound, bound)
        return w, b

    dims_in = [FEATURE_DIM] + [MID_DIM] * 6
    keys = jax.random.split(key, 15)
    params = {"ego": [], "opp": []}
    for i, cin in enumerate(dims_in):
        params["ego"].append(conv_init(keys[i], cin, HID))
        params["opp"].append(conv_init(keys[7 + i], cin, HID))
    params["final"] = conv_init(keys[14], MID_DIM, OUT_DIM)
    return params


# ---------------------------------------------------------------------------
# Forward pass (single pallas_call)
# ---------------------------------------------------------------------------
def risnet_pi_forward(channel, params, num_users, b_tile=1):
    """channel: (B, num_users*4, A) float32 (PyTorch NCW). Returns (B, 1, A)."""
    B, n_features, A = channel.shape
    assert n_features == num_users * FEATURE_DIM
    assert num_users >= 2, "leave-one-out user mean needs num_users >= 2"
    U = num_users
    b_tile = min(b_tile, B)
    assert B % b_tile == 0

    w_all, w8_aug = _pack_weights(params)

    flops = 2 * NUM_LAYERS * U * B * (2 * HID) * MID_AUG * A + 2 * B * MID_AUG * A
    bytes_accessed = 4 * (B * n_features * A + w_all.size + w8_aug.size
                          + B * OUT_DIM * A)

    return pl.pallas_call(
        fused_risnet_kernel,
        out_shape=jax.ShapeDtypeStruct((B, OUT_DIM, A), jnp.float32),
        grid=(B // b_tile,),
        in_specs=[
            pl.BlockSpec((b_tile, U * FEATURE_DIM, A), lambda i: (i, 0, 0)),
            pl.BlockSpec((NUM_LAYERS, 2 * HID, MID_AUG), lambda i: (0, 0, 0)),
            pl.BlockSpec((MID_AUG, OUT_DIM), lambda i: (0, 0)),
        ],
        out_specs=pl.BlockSpec((b_tile, OUT_DIM, A), lambda i: (i, 0, 0)),
        scratch_shapes=[pltpu.VMEM((U, b_tile, MID_AUG, A), jnp.float32)],
        compiler_params=pltpu.CompilerParams(
            dimension_semantics=("parallel",)),
        cost_estimate=pl.CostEstimate(
            flops=int(flops), transcendentals=0,
            bytes_accessed=int(bytes_accessed)),
    )(channel, w_all, w8_aug)


# ---------------------------------------------------------------------------
# Pure-JAX reference (same math as the PyTorch module, original channel order)
# ---------------------------------------------------------------------------
def reference_forward(channel, params, num_users):
    B, n_features, A = channel.shape
    nf = n_features // num_users
    ch = jnp.transpose(channel.reshape(B, num_users, nf, A), (1, 0, 3, 2))
    U = num_users
    feat = ch
    for l in range(NUM_LAYERS):
        we, be = params["ego"][l]
        wo, bo = params["opp"][l]
        ego = jax.nn.relu(jnp.einsum('ubac,co->ubao', feat, we) + be)
        opp = jax.nn.relu(jnp.einsum('ubac,co->ubao', feat, wo) + bo)
        opp_out = (jnp.sum(opp, axis=0, keepdims=True) - opp) / (U - 1)
        g_ego = jnp.broadcast_to(
            jnp.mean(ego[..., LOCAL:], axis=2, keepdims=True), (U, B, A, GLOBAL))
        g_opp = jnp.broadcast_to(
            jnp.mean(opp_out[..., LOCAL:], axis=2, keepdims=True), (U, B, A, GLOBAL))
        feat = jnp.concatenate(
            [ch, ego[..., :LOCAL], g_ego, opp_out[..., :LOCAL], g_opp], axis=-1)
    w8, b8 = params["final"]
    m = jnp.mean(feat, axis=0)
    out = (jnp.einsum('bac,co->bao', m, w8) + b8) * math.pi
    return jnp.transpose(out, (0, 2, 1))


# ---------------------------------------------------------------------------
if __name__ == "__main__":
    num_users = 4
    B, A = 2, 16

    key = jax.random.PRNGKey(0)
    kp, kx = jax.random.split(key)
    params = init_params(kp, num_users)
    channel = jax.random.normal(kx, (B, num_users * FEATURE_DIM, A), jnp.float32)

    fwd = jax.jit(risnet_pi_forward, static_argnums=2)
    out = jax.block_until_ready(fwd(channel, params, num_users))
    assert out.shape == (B, 1, A)

    ref = reference_forward(channel, params, num_users)
    np.testing.assert_allclose(np.asarray(out), np.asarray(ref), rtol=2e-4, atol=2e-4)

    print("KERNEL_OK")
</pallas_src>

<mosaic_0001>
module attributes {stable_mosaic.version = 11 : i64} {
  func.func @fused_risnet_kernel(%arg0: i32, %arg1: memref<1x16x16xf32, #tpu.memory_space<vmem>>, %arg2: memref<7x32x37xf32, #tpu.memory_space<vmem>>, %arg3: memref<37x1xf32, #tpu.memory_space<vmem>>, %arg4: memref<1x1x16xf32, #tpu.memory_space<vmem>>, %arg5: memref<4x1x37x16xf32, #tpu.memory_space<vmem>>) attributes {dimension_semantics = [#tpu.dimension_semantics<parallel>], iteration_bounds = array<i64: 2>, scalar_prefetch = 0 : i64, scratch_operands = 1 : i64, tpu.core_type = #tpu.core_type<tc>, window_params = [{transform_indices = @transform_0, window_bounds = array<i64: 1, 16, 16>}, {pipeline_mode = #tpu.pipeline_mode<synchronous>, transform_indices = @transform_1, window_bounds = array<i64: 7, 32, 37>}, {pipeline_mode = #tpu.pipeline_mode<synchronous>, transform_indices = @transform_2, window_bounds = array<i64: 37, 1>}, {transform_indices = @transform_3, window_bounds = array<i64: 1, 1, 16>}]} {
    %cst = arith.constant 0.000000e+00 : f32
    %0 = vector.broadcast %cst : f32 to vector<32x16xf32>
    %c0 = arith.constant 0 : index
    %c0_0 = arith.constant 0 : index
    %c0_1 = arith.constant 0 : index
    %c0_2 = arith.constant 0 : index
    %1 = vector.load %arg5[%c0, %c0_0, %c0_1, %c0_2] : memref<4x1x37x16xf32, #tpu.memory_space<vmem>>, vector<1x1x32x16xf32>
    %2 = vector.shape_cast %1 : vector<1x1x32x16xf32> to vector<32x16xf32>
    %3 = vector.shape_cast %0 : vector<32x16xf32> to vector<1x1x32x16xf32>
    tpu.vector_store %arg5[%c0, %c0_0, %c0_1, %c0_2], %3 {strides = array<i32>} : memref<4x1x37x16xf32, #tpu.memory_space<vmem>>, vector<1x1x32x16xf32>,
    %c0_3 = arith.constant 0 : index
    %c0_4 = arith.constant 0 : index
    %c0_5 = arith.constant 0 : index
    %4 = vector.load %arg1[%c0_3, %c0_4, %c0_5] : memref<1x16x16xf32, #tpu.memory_space<vmem>>, vector<1x4x16xf32>
    %5 = vector.shape_cast %4 : vector<1x4x16xf32> to vector<4x16xf32>
    %c0_6 = arith.constant 0 : index
    %c0_7 = arith.constant 0 : index
    %c32 = arith.constant 32 : index
    %c0_8 = arith.constant 0 : index
    %6 = vector.load %arg5[%c0_6, %c0_7, %c32, %c0_8] : memref<4x1x37x16xf32, #tpu.memory_space<vmem>>, vector<1x1x4x16xf32>
    %7 = vector.shape_cast %6 : vector<1x1x4x16xf32> to vector<4x16xf32>
    %8 = vector.shape_cast %5 : vector<4x16xf32> to vector<1x1x4x16xf32>
    tpu.vector_store %arg5[%c0_6, %c0_7, %c32, %c0_8], %8 {strides = array<i32>} : memref<4x1x37x16xf32, #tpu.memory_space<vmem>>, vector<1x1x4x16xf32>,
    %cst_9 = arith.constant 1.000000e+00 : f32
    %9 = vector.broadcast %cst_9 : f32 to vector<1x16xf32>
    %c0_10 = arith.constant 0 : index
    %c0_11 = arith.constant 0 : index
    %c36 = arith.constant 36 : index
    %c0_12 = arith.constant 0 : index
    %10 = vector.load %arg5[%c0_10, %c0_11, %c36, %c0_12] : memref<4x1x37x16xf32, #tpu.memory_space<vmem>>, vector<1x1x1x16xf32>
    %11 = vector.shape_cast %10 : vector<1x1x1x16xf32> to vector<1x16xf32>
    %12 = vector.shape_cast %9 : vector<1x16xf32> to vector<1x1x1x16xf32>
    tpu.vector_store %arg5[%c0_10, %c0_11, %c36, %c0_12], %12 {strides = array<i32>} : memref<4x1x37x16xf32, #tpu.memory_space<vmem>>, vector<1x1x1x16xf32>,
    %cst_13 = arith.constant 0.000000e+00 : f32
    %13 = vector.broadcast %cst_13 : f32 to vector<32x16xf32>
    %c1 = arith.constant 1 : index
    %c0_14 = arith.constant 0 : index
    %c0_15 = arith.constant 0 : index
    %c0_16 = arith.constant 0 : index
    %14 = vector.load %arg5[%c1, %c0_14, %c0_15, %c0_16] : memref<4x1x37x16xf32, #tpu.memory_space<vmem>>, vector<1x1x32x16xf32>
    %15 = vector.shape_cast %14 : vector<1x1x32x16xf32> to vector<32x16xf32>
    %16 = vector.shape_cast %13 : vector<32x16xf32> to vector<1x1x32x16xf32>
    tpu.vector_store %arg5[%c1, %c0_14, %c0_15, %c0_16], %16 {strides = array<i32>} : memref<4x1x37x16xf32, #tpu.memory_space<vmem>>, vector<1x1x32x16xf32>,
    %c0_17 = arith.constant 0 : index
    %c4 = arith.constant 4 : index
    %c0_18 = arith.constant 0 : index
    %17 = vector.load %arg1[%c0_17, %c4, %c0_18] : memref<1x16x16xf32, #tpu.memory_space<vmem>>, vector<1x4x16xf32>
    %18 = vector.shape_cast %17 : vector<1x4x16xf32> to vector<4x16xf32>
    %c1_19 = arith.constant 1 : index
    %c0_20 = arith.constant 0 : index
    %c32_21 = arith.constant 32 : index
    %c0_22 = arith.constant 0 : index
    %19 = vector.load %arg5[%c1_19, %c0_20, %c32_21, %c0_22] : memref<4x1x37x16xf32, #tpu.memory_space<vmem>>, vector<1x1x4x16xf32>
    %20 = vector.shape_cast %19 : vector<1x1x4x16xf32> to vector<4x16xf32>
    %21 = vector.shape_cast %18 : vector<4x16xf32> to vector<1x1x4x16xf32>
    tpu.vector_store %arg5[%c1_19, %c0_20, %c32_21, %c0_22], %21 {strides = array<i32>} : memref<4x1x37x16xf32, #tpu.memory_space<vmem>>, vector<1x1x4x16xf32>,
    %cst_23 = arith.constant 1.000000e+00 : f32
    %22 = vector.broadcast %cst_23 : f32 to vector<1x16xf32>
    %c1_24 = arith.constant 1 : index
    %c0_25 = arith.constant 0 : index
    %c36_26 = arith.constant 36 : index
    %c0_27 = arith.constant 0 : index
    %23 = vector.load %arg5[%c1_24, %c0_25, %c36_26, %c0_27] : memref<4x1x37x16xf32, #tpu.memory_space<vmem>>, vector<1x1x1x16xf32>
    %24 = vector.shape_cast %23 : vector<1x1x1x16xf32> to vector<1x16xf32>
    %25 = vector.shape_cast %22 : vector<1x16xf32> to vector<1x1x1x16xf32>
    tpu.vector_store %arg5[%c1_24, %c0_25, %c36_26, %c0_27], %25 {strides = array<i32>} : memref<4x1x37x16xf32, #tpu.memory_space<vmem>>, vector<1x1x1x16xf32>,
    %cst_28 = arith.constant 0.000000e+00 : f32
    %26 = vector.broadcast %cst_28 : f32 to vector<32x16xf32>
    %c2 = arith.constant 2 : index
    %c0_29 = arith.constant 0 : index
    %c0_30 = arith.constant 0 : index
    %c0_31 = arith.constant 0 : index
    %27 = vector.load %arg5[%c2, %c0_29, %c0_30, %c0_31] : memref<4x1x37x16xf32, #tpu.memory_space<vmem>>, vector<1x1x32x16xf32>
    %28 = vector.shape_cast %27 : vector<1x1x32x16xf32> to vector<32x16xf32>
    %29 = vector.shape_cast %26 : vector<32x16xf32> to vector<1x1x32x16xf32>
    tpu.vector_store %arg5[%c2, %c0_29, %c0_30, %c0_31], %29 {strides = array<i32>} : memref<4x1x37x16xf32, #tpu.memory_space<vmem>>, vector<1x1x32x16xf32>,
    %c0_32 = arith.constant 0 : index
    %c8 = arith.constant 8 : index
    %c0_33 = arith.constant 0 : index
    %30 = vector.load %arg1[%c0_32, %c8, %c0_33] : memref<1x16x16xf32, #tpu.memory_space<vmem>>, vector<1x4x16xf32>
    %31 = vector.shape_cast %30 : vector<1x4x16xf32> to vector<4x16xf32>
    %c2_34 = arith.constant 2 : index
    %c0_35 = arith.constant 0 : index
    %c32_36 = arith.constant 32 : index
    %c0_37 = arith.constant 0 : index
    %32 = vector.load %arg5[%c2_34, %c0_35, %c32_36, %c0_37] : memref<4x1x37x16xf32, #tpu.memory_space<vmem>>, vector<1x1x4x16xf32>
    %33 = vector.shape_cast %32 : vector<1x1x4x16xf32> to vector<4x16xf32>
    %34 = vector.shape_cast %31 : vector<4x16xf32> to vector<1x1x4x16xf32>
    tpu.vector_store %arg5[%c2_34, %c0_35, %c32_36, %c0_37], %34 {strides = array<i32>} : memref<4x1x37x16xf32, #tpu.memory_space<vmem>>, vector<1x1x4x16xf32>,
    %cst_38 = arith.constant 1.000000e+00 : f32
    %35 = vector.broadcast %cst_38 : f32 to vector<1x16xf32>
    %c2_39 = arith.constant 2 : index
    %c0_40 = arith.constant 0 : index
    %c36_41 = arith.constant 36 : index
    %c0_42 = arith.constant 0 : index
    %36 = vector.load %arg5[%c2_39, %c0_40, %c36_41, %c0_42] : memref<4x1x37x16xf32, #tpu.memory_space<vmem>>, vector<1x1x1x16xf32>
    %37 = vector.shape_cast %36 : vector<1x1x1x16xf32> to vector<1x16xf32>
    %38 = vector.shape_cast %35 : vector<1x16xf32> to vector<1x1x1x16xf32>
    tpu.vector_store %arg5[%c2_39, %c0_40, %c36_41, %c0_42], %38 {strides = array<i32>} : memref<4x1x37x16xf32, #tpu.memory_space<vmem>>, vector<1x1x1x16xf32>,
    %cst_43 = arith.constant 0.000000e+00 : f32
    %39 = vector.broadcast %cst_43 : f32 to vector<32x16xf32>
    %c3 = arith.constant 3 : index
    %c0_44 = arith.constant 0 : index
    %c0_45 = arith.constant 0 : index
    %c0_46 = arith.constant 0 : index
    %40 = vector.load %arg5[%c3, %c0_44, %c0_45, %c0_46] : memref<4x1x37x16xf32, #tpu.memory_space<vmem>>, vector<1x1x32x16xf32>
    %41 = vector.shape_cast %40 : vector<1x1x32x16xf32> to vector<32x16xf32>
    %42 = vector.shape_cast %39 : vector<32x16xf32> to vector<1x1x32x16xf32>
    tpu.vector_store %arg5[%c3, %c0_44, %c0_45, %c0_46], %42 {strides = array<i32>} : memref<4x1x37x16xf32, #tpu.memory_space<vmem>>, vector<1x1x32x16xf32>,
    %c0_47 = arith.constant 0 : index
    %c12 = arith.constant 12 : index
    %c0_48 = arith.constant 0 : index
    %43 = vector.load %arg1[%c0_47, %c12, %c0_48] : memref<1x16x16xf32, #tpu.memory_space<vmem>>, vector<1x4x16xf32>
    %44 = vector.shape_cast %43 : vector<1x4x16xf32> to vector<4x16xf32>
    %c3_49 = arith.constant 3 : index
    %c0_50 = arith.constant 0 : index
    %c32_51 = arith.constant 32 : index
    %c0_52 = arith.constant 0 : index
    %45 = vector.load %arg5[%c3_49, %c0_50, %c32_51, %c0_52] : memref<4x1x37x16xf32, #tpu.memory_space<vmem>>, vector<1x1x4x16xf32>
    %46 = vector.shape_cast %45 : vector<1x1x4x16xf32> to vector<4x16xf32>
    %47 = vector.shape_cast %44 : vector<4x16xf32> to vector<1x1x4x16xf32>
    tpu.vector_store %arg5[%c3_49, %c0_50, %c32_51, %c0_52], %47 {strides = array<i32>} : memref<4x1x37x16xf32, #tpu.memory_space<vmem>>, vector<1x1x4x16xf32>,
    %cst_53 = arith.constant 1.000000e+00 : f32
    %48 = vector.broadcast %cst_53 : f32 to vector<1x16xf32>
    %c3_54 = arith.constant 3 : index
    %c0_55 = arith.constant 0 : index
    %c36_56 = arith.constant 36 : index
    %c0_57 = arith.constant 0 : index
    %49 = vector.load %arg5[%c3_54, %c0_55, %c36_56, %c0_57] : memref<4x1x37x16xf32, #tpu.memory_space<vmem>>, vector<1x1x1x16xf32>
    %50 = vector.shape_cast %49 : vector<1x1x1x16xf32> to vector<1x16xf32>
    %51 = vector.shape_cast %48 : vector<1x16xf32> to vector<1x1x1x16xf32>
    tpu.vector_store %arg5[%c3_54, %c0_55, %c36_56, %c0_57], %51 {strides = array<i32>} : memref<4x1x37x16xf32, #tpu.memory_space<vmem>>, vector<1x1x1x16xf32>,
    %c0_58 = arith.constant 0 : index
    %c0_59 = arith.constant 0 : index
    %c0_60 = arith.constant 0 : index
    %52 = vector.load %arg2[%c0_58, %c0_59, %c0_60] : memref<7x32x37xf32, #tpu.memory_space<vmem>>, vector<1x32x37xf32>
    %53 = vector.shape_cast %52 : vector<1x32x37xf32> to vector<32x37xf32>
    %c0_61 = arith.constant 0 : index
    %c0_62 = arith.constant 0 : index
    %c0_63 = arith.constant 0 : index
    %c0_64 = arith.constant 0 : index
    %54 = vector.load %arg5[%c0_61, %c0_62, %c0_63, %c0_64] : memref<4x1x37x16xf32, #tpu.memory_space<vmem>>, vector<1x1x37x16xf32>
    %55 = vector.shape_cast %54 : vector<1x1x37x16xf32> to vector<37x16xf32>
    %cst_65 = arith.constant dense<0.000000e+00> : vector<32x16xf32>
    %56 = tpu.matmul %53, %55, %cst_65 {dimension_numbers = #tpu.dot_dimension_numbers<[1], [0], [0], [1], [0, 0, 1, 1], [], []>} : vector<32x37xf32>, vector<37x16xf32>, vector<32x16xf32> -> vector<32x16xf32>
    %cst_66 = arith.constant 0.000000e+00 : f32
    %57 = vector.broadcast %cst_66 : f32 to vector<32x16xf32>
    %58 = arith.maximumf %56, %57 : vector<32x16xf32>
    %c1_67 = arith.constant 1 : index
    %c0_68 = arith.constant 0 : index
    %c0_69 = arith.constant 0 : index
    %c0_70 = arith.constant 0 : index
    %59 = vector.load %arg5[%c1_67, %c0_68, %c0_69, %c0_70] : memref<4x1x37x16xf32, #tpu.memory_space<vmem>>, vector<1x1x37x16xf32>
    %60 = vector.shape_cast %59 : vector<1x1x37x16xf32> to vector<37x16xf32>
    %cst_71 = arith.constant dense<0.000000e+00> : vector<32x16xf32>
    %61 = tpu.matmul %53, %60, %cst_71 {dimension_numbers = #tpu.dot_dimension_numbers<[1], [0], [0], [1], [0, 0, 1, 1], [], []>} : vector<32x37xf32>, vector<37x16xf32>, vector<32x16xf32> -> vector<32x16xf32>
    %cst_72 = arith.constant 0.000000e+00 : f32
    %62 = vector.broadcast %cst_72 : f32 to vector<32x16xf32>
    %63 = arith.maximumf %61, %62 : vector<32x16xf32>
    %c2_73 = arith.constant 2 : index
    %c0_74 = arith.constant 0 : index
    %c0_75 = arith.constant 0 : index
    %c0_76 = arith.constant 0 : index
    %64 = vector.load %arg5[%c2_73, %c0_74, %c0_75, %c0_76] : memref<4x1x37x16xf32, #tpu.memory_space<vmem>>, vector<1x1x37x16xf32>
    %65 = vector.shape_cast %64 : vector<1x1x37x16xf32> to vector<37x16xf32>
    %cst_77 = arith.constant dense<0.000000e+00> : vector<32x16xf32>
    %66 = tpu.matmul %53, %65, %cst_77 {dimension_numbers = #tpu.dot_dimension_numbers<[1], [0], [0], [1], [0, 0, 1, 1], [], []>} : vector<32x37xf32>, vector<37x16xf32>, vector<32x16xf32> -> vector<32x16xf32>
    %cst_78 = arith.constant 0.000000e+00 : f32
    %67 = vector.broadcast %cst_78 : f32 to vector<32x16xf32>
    %68 = arith.maximumf %66, %67 : vector<32x16xf32>
    %c3_79 = arith.constant 3 : index
    %c0_80 = arith.constant 0 : index
    %c0_81 = arith.constant 0 : index
    %c0_82 = arith.constant 0 : index
    %69 = vector.load %arg5[%c3_79, %c0_80, %c0_81, %c0_82] : memref<4x1x37x16xf32, #tpu.memory_space<vmem>>, vector<1x1x37x16xf32>
    %70 = vector.shape_cast %69 : vector<1x1x37x16xf32> to vector<37x16xf32>
    %cst_83 = arith.constant dense<0.000000e+00> : vector<32x16xf32>
    %71 = tpu.matmul %53, %70, %cst_83 {dimension_numbers = #tpu.dot_dimension_numbers<[1], [0], [0], [1], [0, 0, 1, 1], [], []>} : vector<32x37xf32>, vector<37x16xf32>, vector<32x16xf32> -> vector<32x16xf32>
    %cst_84 = arith.constant 0.000000e+00 : f32
    %72 = vector.broadcast %cst_84 : f32 to vector<32x16xf32>
    %73 = arith.maximumf %71, %72 : vector<32x16xf32>
    %74 = vector.extract_strided_slice %58 {offsets = [16, 0], sizes = [16, 16], strides = [1, 1]} : vector<32x16xf32> to vector<16x16xf32>
    %75 = vector.extract_strided_slice %63 {offsets = [16, 0], sizes = [16, 16], strides = [1, 1]} : vector<32x16xf32> to vector<16x16xf32>
    %76 = vector.extract_strided_slice %68 {offsets = [16, 0], sizes = [16, 16], strides = [1, 1]} : vector<32x16xf32> to vector<16x16xf32>
    %77 = vector.extract_strided_slice %73 {offsets = [16, 0], sizes = [16, 16], strides = [1, 1]} : vector<32x16xf32> to vector<16x16xf32>
    %78 = arith.addf %74, %75 : vector<16x16xf32>
    %79 = arith.addf %78, %76 : vector<16x16xf32>
    %80 = arith.addf %79, %77 : vector<16x16xf32>
    %81 = vector.extract_strided_slice %58 {offsets = [0, 0], sizes = [16, 16], strides = [1, 1]} : vector<32x16xf32> to vector<16x16xf32>
    %82 = arith.subf %80, %74 : vector<16x16xf32>
    %cst_85 = arith.constant 0.333333343 : f32
    %83 = vector.broadcast %cst_85 : f32 to vector<16x16xf32>
    %84 = arith.mulf %82, %83 : vector<16x16xf32>
    %85 = vector.extract_strided_slice %81 {offsets = [8, 0], sizes = [8, 16], strides = [1, 1]} : vector<16x16xf32> to vector<8x16xf32>
    %cst_86 = arith.constant dense<0.000000e+00> : vector<8xf32>
    %86 = vector.multi_reduction <add>, %85, %cst_86 [1] : vector<8x16xf32> to vector<8xf32>
    %87 = vector.shape_cast %86 : vector<8xf32> to vector<8x1xf32>
    %cst_87 = arith.constant 1.600000e+01 : f32
    %88 = vector.broadcast %cst_87 : f32 to vector<8x1xf32>
    %89 = arith.divf %87, %88 : vector<8x1xf32>
    %90 = vector.extract_strided_slice %84 {offsets = [8, 0], sizes = [8, 16], strides = [1, 1]} : vector<16x16xf32> to vector<8x16xf32>
    %cst_88 = arith.constant dense<0.000000e+00> : vector<8xf32>
    %91 = vector.multi_reduction <add>, %90, %cst_88 [1] : vector<8x16xf32> to vector<8xf32>
    %92 = vector.shape_cast %91 : vector<8xf32> to vector<8x1xf32>
    %cst_89 = arith.constant 1.600000e+01 : f32
    %93 = vector.broadcast %cst_89 : f32 to vector<8x1xf32>
    %94 = arith.divf %92, %93 : vector<8x1xf32>
    %95 = vector.extract_strided_slice %81 {offsets = [0, 0], sizes = [8, 16], strides = [1, 1]} : vector<16x16xf32> to vector<8x16xf32>
    %c0_90 = arith.constant 0 : index
    %c0_91 = arith.constant 0 : index
    %c0_92 = arith.constant 0 : index
    %c0_93 = arith.constant 0 : index
    %96 = vector.load %arg5[%c0_90, %c0_91, %c0_92, %c0_93] : memref<4x1x37x16xf32, #tpu.memory_space<vmem>>, vector<1x1x8x16xf32>
    %97 = vector.shape_cast %96 : vector<1x1x8x16xf32> to vector<8x16xf32>
    %98 = vector.shape_cast %95 : vector<8x16xf32> to vector<1x1x8x16xf32>
    tpu.vector_store %arg5[%c0_90, %c0_91, %c0_92, %c0_93], %98 {strides = array<i32>} : memref<4x1x37x16xf32, #tpu.memory_space<vmem>>, vector<1x1x8x16xf32>,
    %99 = vector.shape_cast %89 : vector<8x1xf32> to vector<8x1xf32>
    %100 = vector.broadcast %99 : vector<8x1xf32> to vector<8x16xf32>
    %c0_94 = arith.constant 0 : index
    %c0_95 = arith.constant 0 : index
    %c8_96 = arith.constant 8 : index
    %c0_97 = arith.constant 0 : index
    %101 = vector.load %arg5[%c0_94, %c0_95, %c8_96, %c0_97] : memref<4x1x37x16xf32, #tpu.memory_space<vmem>>, vector<1x1x8x16xf32>
    %102 = vector.shape_cast %101 : vector<1x1x8x16xf32> to vector<8x16xf32>
    %103 = vector.shape_cast %100 : vector<8x16xf32> to vector<1x1x8x16xf32>
    tpu.vector_store %arg5[%c0_94, %c0_95, %c8_96, %c0_97], %103 {strides = array<i32>} : memref<4x1x37x16xf32, #tpu.memory_space<vmem>>, vector<1x1x8x16xf32>,
    %104 = vector.extract_strided_slice %84 {offsets = [0, 0], sizes = [8, 16], strides = [1, 1]} : vector<16x16xf32> to vector<8x16xf32>
    %c0_98 = arith.constant 0 : index
    %c0_99 = arith.constant 0 : index
    %c16 = arith.constant 16 : index
    %c0_100 = arith.constant 0 : index
    %105 = vector.load %arg5[%c0_98, %c0_99, %c16, %c0_100] : memref<4x1x37x16xf32, #tpu.memory_space<vmem>>, vector<1x1x8x16xf32>
    %106 = vector.shape_cast %105 : vector<1x1x8x16xf32> to vector<8x16xf32>
    %107 = vector.shape_cast %104 : vector<8x16xf32> to vector<1x1x8x16xf32>
    tpu.vector_store %arg5[%c0_98, %c0_99, %c16, %c0_100], %107 {strides = array<i32>} : memref<4x1x37x16xf32, #tpu.memory_space<vmem>>, vector<1x1x8x16xf32>,
    %108 = vector.shape_cast %94 : vector<8x1xf32> to vector<8x1xf32>
    %109 = vector.broadcast %108 : vector<8x1xf32> to vector<8x16xf32>
    %c0_101 = arith.constant 0 : index
    %c0_102 = arith.constant 0 : index
    %c24 = arith.constant 24 : index
    %c0_103 = arith.constant 0 : index
    %110 = vector.load %arg5[%c0_101, %c0_102, %c24, %c0_103] : memref<4x1x37x16xf32, #tpu.memory_space<vmem>>, vector<1x1x8x16xf32>
    %111 = vector.shape_cast %110 : vector<1x1x8x16xf32> to vector<8x16xf32>
    %112 = vector.shape_cast %109 : vector<8x16xf32> to vector<1x1x8x16xf32>
    tpu.vector_store %arg5[%c0_101, %c0_102, %c24, %c0_103], %112 {strides = array<i32>} : memref<4x1x37x16xf32, #tpu.memory_space<vmem>>, vector<1x1x8x16xf32>,
    %113 = vector.extract_strided_slice %63 {offsets = [0, 0], sizes = [16, 16], strides = [1, 1]} : vector<32x16xf32> to vector<16x16xf32>
    %114 = arith.subf %80, %75 : vector<16x16xf32>
    %cst_104 = arith.constant 0.333333343 : f32
    %115 = vector.broadcast %cst_104 : f32 to vector<16x16xf32>
    %116 = arith.mulf %114, %115 : vector<16x16xf32>
    %117 = vector.extract_strided_slice %113 {offsets = [8, 0], sizes = [8, 16], strides = [1, 1]} : vector<16x16xf32> to vector<8x16xf32>
    %cst_105 = arith.constant dense<0.000000e+00> : vector<8xf32>
    %118 = vector.multi_reduction <add>, %117, %cst_105 [1] : vector<8x16xf32> to vector<8xf32>
    %119 = vector.shape_cast %118 : vector<8xf32> to vector<8x1xf32>
    %cst_106 = arith.constant 1.600000e+01 : f32
    %120 = vector.broadcast %cst_106 : f32 to vector<8x1xf32>
    %121 = arith.divf %119, %120 : vector<8x1xf32>
    %122 = vector.extract_strided_slice %116 {offsets = [8, 0], sizes = [8, 16], strides = [1, 1]} : vector<16x16xf32> to vector<8x16xf32>
    %cst_107 = arith.constant dense<0.000000e+00> : vector<8xf32>
    %123 = vector.multi_reduction <add>, %122, %cst_107 [1] : vector<8x16xf32> to vector<8xf32>
    %124 = vector.shape_cast %123 : vector<8xf32> to vector<8x1xf32>
    %cst_108 = arith.constant 1.600000e+01 : f32
    %125 = vector.broadcast %cst_108 : f32 to vector<8x1xf32>
    %126 = arith.divf %124, %125 : vector<8x1xf32>
    %127 = vector.extract_strided_slice %113 {offsets = [0, 0], sizes = [8, 16], strides = [1, 1]} : vector<16x16xf32> to vector<8x16xf32>
    %c1_109 = arith.constant 1 : index
    %c0_110 = arith.constant 0 : index
    %c0_111 = arith.constant 0 : index
    %c0_112 = arith.constant 0 : index
    %128 = vector.load %arg5[%c1_109, %c0_110, %c0_111, %c0_112] : memref<4x1x37x16xf32, #tpu.memory_space<vmem>>, vector<1x1x8x16xf32>
    %129 = vector.shape_cast %128 : vector<1x1x8x16xf32> to vector<8x16xf32>
    %130 = vector.shape_cast %127 : vector<8x16xf32> to vector<1x1x8x16xf32>
    tpu.vector_store %arg5[%c1_109, %c0_110, %c0_111, %c0_112], %130 {strides = array<i32>} : memref<4x1x37x16xf32, #tpu.memory_space<vmem>>, vector<1x1x8x16xf32>,
    %131 = vector.shape_cast %121 : vector<8x1xf32> to vector<8x1xf32>
    %132 = vector.broadcast %131 : vector<8x1xf32> to vector<8x16xf32>
    %c1_113 = arith.constant 1 : index
    %c0_114 = arith.constant 0 : index
    %c8_115 = arith.constant 8 : index
    %c0_116 = arith.constant 0 : index
    %133 = vector.load %arg5[%c1_113, %c0_114, %c8_115, %c0_116] : memref<4x1x37x16xf32, #tpu.memory_space<vmem>>, vector<1x1x8x16xf32>
    %134 = vector.shape_cast %133 : vector<1x1x8x16xf32> to vector<8x16xf32>
    %135 = vector.shape_cast %132 : vector<8x16xf32> to vector<1x1x8x16xf32>
    tpu.vector_store %arg5[%c1_113, %c0_114, %c8_115, %c0_116], %135 {strides = array<i32>} : memref<4x1x37x16xf32, #tpu.memory_space<vmem>>, vector<1x1x8x16xf32>,
    %136 = vector.extract_strided_slice %116 {offsets = [0, 0], sizes = [8, 16], strides = [1, 1]} : vector<16x16xf32> to vector<8x16xf32>
    %c1_117 = arith.constant 1 : index
    %c0_118 = arith.constant 0 : index
    %c16_119 = arith.constant 16 : index
    %c0_120 = arith.constant 0 : index
    %137 = vector.load %arg5[%c1_117, %c0_118, %c16_119, %c0_120] : memref<4x1x37x16xf32, #tpu.memory_space<vmem>>, vector<1x1x8x16xf32>
    %138 = vector.shape_cast %137 : vector<1x1x8x16xf32> to vector<8x16xf32>
    %139 = vector.shape_cast %136 : vector<8x16xf32> to vector<1x1x8x16xf32>
    tpu.vector_store %arg5[%c1_117, %c0_118, %c16_119, %c0_120], %139 {strides = array<i32>} : memref<4x1x37x16xf32, #tpu.memory_space<vmem>>, vector<1x1x8x16xf32>,
    %140 = vector.shape_cast %126 : vector<8x1xf32> to vector<8x1xf32>
    %141 = vector.broadcast %140 : vector<8x1xf32> to vector<8x16xf32>
    %c1_121 = arith.constant 1 : index
    %c0_122 = arith.constant 0 : index
    %c24_123 = arith.constant 24 : index
    %c0_124 = arith.constant 0 : index
    %142 = vector.load %arg5[%c1_121, %c0_122, %c24_123, %c0_124] : memref<4x1x37x16xf32, #tpu.memory_space<vmem>>, vector<1x1x8x16xf32>
    %143 = vector.shape_cast %142 : vector<1x1x8x16xf32> to vector<8x16xf32>
    %144 = vector.shape_cast %141 : vector<8x16xf32> to vector<1x1x8x16xf32>
    tpu.vector_store %arg5[%c1_121, %c0_122, %c24_123, %c0_124], %144 {strides = array<i32>} : memref<4x1x37x16xf32, #tpu.memory_space<vmem>>, vector<1x1x8x16xf32>,
    %145 = vector.extract_strided_slice %68 {offsets = [0, 0], sizes = [16, 16], strides = [1, 1]} : vector<32x16xf32> to vector<16x16xf32>
    %146 = arith.subf %80, %76 : vector<16x16xf32>
    %cst_125 = arith.constant 0.333333343 : f32
    %147 = vector.broadcast %cst_125 : f32 to vector<16x16xf32>
    %148 = arith.mulf %146, %147 : vector<16x16xf32>
    %149 = vector.extract_strided_slice %145 {offsets = [8, 0], sizes = [8, 16], strides = [1, 1]} : vector<16x16xf32> to vector<8x16xf32>
    %cst_126 = arith.constant dense<0.000000e+00> : vector<8xf32>
    %150 = vector.multi_reduction <add>, %149, %cst_126 [1] : vector<8x16xf32> to vector<8xf32>
    %151 = vector.shape_cast %150 : vector<8xf32> to vector<8x1xf32>
    %cst_127 = arith.constant 1.600000e+01 : f32
    %152 = vector.broadcast %cst_127 : f32 to vector<8x1xf32>
    %153 = arith.divf %151, %152 : vector<8x1xf32>
    %154 = vector.extract_strided_slice %148 {offsets = [8, 0], sizes = [8, 16], strides = [1, 1]} : vector<16x16xf32> to vector<8x16xf32>
    %cst_128 = arith.constant dense<0.000000e+00> : vector<8xf32>
    %155 = vector.multi_reduction <add>, %154, %cst_128 [1] : vector<8x16xf32> to vector<8xf32>
    %156 = vector.shape_cast %155 : vector<8xf32> to vector<8x1xf32>
    %cst_129 = arith.constant 1.600000e+01 : f32
    %157 = vector.broadcast %cst_129 : f32 to vector<8x1xf32>
    %158 = arith.divf %156, %157 : vector<8x1xf32>
    %159 = vector.extract_strided_slice %145 {offsets = [0, 0], sizes = [8, 16], strides = [1, 1]} : vector<16x16xf32> to vector<8x16xf32>
    %c2_130 = arith.constant 2 : index
    %c0_131 = arith.constant 0 : index
    %c0_132 = arith.constant 0 : index
    %c0_133 = arith.constant 0 : index
    %160 = vector.load %arg5[%c2_130, %c0_131, %c0_132, %c0_133] : memref<4x1x37x16xf32, #tpu.memory_space<vmem>>, vector<1x1x8x16xf32>
    %161 = vector.shape_cast %160 : vector<1x1x8x16xf32> to vector<8x16xf32>
    %162 = vector.shape_cast %159 : vector<8x16xf32> to vector<1x1x8x16xf32>
    tpu.vector_store %arg5[%c2_130, %c0_131, %c0_132, %c0_133], %162 {strides = array<i32>} : memref<4x1x37x16xf32, #tpu.memory_space<vmem>>, vector<1x1x8x16xf32>,
    %163 = vector.shape_cast %153 : vector<8x1xf32> to vector<8x1xf32>
    %164 = vector.broadcast %163 : vector<8x1xf32> to vector<8x16xf32>
    %c2_134 = arith.constant 2 : index
    %c0_135 = arith.constant 0 : index
    %c8_136 = arith.constant 8 : index
    %c0_137 = arith.constant 0 : index
    %165 = vector.load %arg5[%c2_134, %c0_135, %c8_136, %c0_137] : memref<4x1x37x16xf32, #tpu.memory_space<vmem>>, vector<1x1x8x16xf32>
    %166 = vector.shape_cast %165 : vector<1x1x8x16xf32> to vector<8x16xf32>
    %167 = vector.shape_cast %164 : vector<8x16xf32> to vector<1x1x8x16xf32>
    tpu.vector_store %arg5[%c2_134, %c0_135, %c8_136, %c0_137], %167 {strides = array<i32>} : memref<4x1x37x16xf32, #tpu.memory_space<vmem>>, vector<1x1x8x16xf32>,
    %168 = vector.extract_strided_slice %148 {offsets = [0, 0], sizes = [8, 16], strides = [1, 1]} : vector<16x16xf32> to vector<8x16xf32>
    %c2_138 = arith.constant 2 : index
    %c0_139 = arith.constant 0 : index
    %c16_140 = arith.constant 16 : index
    %c0_141 = arith.constant 0 : index
    %169 = vector.load %arg5[%c2_138, %c0_139, %c16_140, %c0_141] : memref<4x1x37x16xf32, #tpu.memory_space<vmem>>, vector<1x1x8x16xf32>
    %170 = vector.shape_cast %169 : vector<1x1x8x16xf32> to vector<8x16xf32>
    %171 = vector.shape_cast %168 : vector<8x16xf32> to vector<1x1x8x16xf32>
    tpu.vector_store %arg5[%c2_138, %c0_139, %c16_140, %c0_141], %171 {strides = array<i32>} : memref<4x1x37x16xf32, #tpu.memory_space<vmem>>, vector<1x1x8x16xf32>,
    %172 = vector.shape_cast %158 : vector<8x1xf32> to vector<8x1xf32>
    %173 = vector.broadcast %172 : vector<8x1xf32> to vector<8x16xf32>
    %c2_142 = arith.constant 2 : index
    %c0_143 = arith.constant 0 : index
    %c24_144 = arith.constant 24 : index
    %c0_145 = arith.constant 0 : index
    %174 = vector.load %arg5[%c2_142, %c0_143, %c24_144, %c0_145] : memref<4x1x37x16xf32, #tpu.memory_space<vmem>>, vector<1x1x8x16xf32>
    %175 = vector.shape_cast %174 : vector<1x1x8x16xf32> to vector<8x16xf32>
    %176 = vector.shape_cast %173 : vector<8x16xf32> to vector<1x1x8x16xf32>
    tpu.vector_store %arg5[%c2_142, %c0_143, %c24_144, %c0_145], %176 {strides = array<i32>} : memref<4x1x37x16xf32, #tpu.memory_space<vmem>>, vector<1x1x8x16xf32>,
    %177 = vector.extract_strided_slice %73 {offsets = [0, 0], sizes = [16, 16], strides = [1, 1]} : vector<32x16xf32> to vector<16x16xf32>
    %178 = arith.subf %80, %77 : vector<16x16xf32>
    %cst_146 = arith.constant 0.333333343 : f32
    %179 = vector.broadcast %cst_146 : f32 to vector<16x16xf32>
    %180 = arith.mulf %178, %179 : vector<16x16xf32>
    %181 = vector.extract_strided_slice %177 {offsets = [8, 0], sizes = [8, 16], strides = [1, 1]} : vector<16x16xf32> to vector<8x16xf32>
    %cst_147 = arith.constant dense<0.000000e+00> : vector<8xf32>
    %182 = vector.multi_reduction <add>, %181, %cst_147 [1] : vector<8x16xf32> to vector<8xf32>
    %183 = vector.shape_cast %182 : vector<8xf32> to vector<8x1xf32>
    %cst_148 = arith.constant 1.600000e+01 : f32
    %184 = vector.broadcast %cst_148 : f32 to vector<8x1xf32>
    %185 = arith.divf %183, %184 : vector<8x1xf32>
    %186 = vector.extract_strided_slice %180 {offsets = [8, 0], sizes = [8, 16], strides = [1, 1]} : vector<16x16xf32> to vector<8x16xf32>
    %cst_149 = arith.constant dense<0.000000e+00> : vector<8xf32>
    %187 = vector.multi_reduction <add>, %186, %cst_149 [1] : vector<8x16xf32> to vector<8xf32>
    %188 = vector.shape_cast %187 : vector<8xf32> to vector<8x1xf32>
    %cst_150 = arith.constant 1.600000e+01 : f32
    %189 = vector.broadcast %cst_150 : f32 to vector<8x1xf32>
    %190 = arith.divf %188, %189 : vector<8x1xf32>
    %191 = vector.extract_strided_slice %177 {offsets = [0, 0], sizes = [8, 16], strides = [1, 1]} : vector<16x16xf32> to vector<8x16xf32>
    %c3_151 = arith.constant 3 : index
    %c0_152 = arith.constant 0 : index
    %c0_153 = arith.constant 0 : index
    %c0_154 = arith.constant 0 : index
    %192 = vector.load %arg5[%c3_151, %c0_152, %c0_153, %c0_154] : memref<4x1x37x16xf32, #tpu.memory_space<vmem>>, vector<1x1x8x16xf32>
    %193 = vector.shape_cast %192 : vector<1x1x8x16xf32> to vector<8x16xf32>
    %194 = vector.shape_cast %191 : vector<8x16xf32> to vector<1x1x8x16xf32>
    tpu.vector_store %arg5[%c3_151, %c0_152, %c0_153, %c0_154], %194 {strides = array<i32>} : memref<4x1x37x16xf32, #tpu.memory_space<vmem>>, vector<1x1x8x16xf32>,
    %195 = vector.shape_cast %185 : vector<8x1xf32> to vector<8x1xf32>
    %196 = vector.broadcast %195 : vector<8x1xf32> to vector<8x16xf32>
    %c3_155 = arith.constant 3 : index
    %c0_156 = arith.constant 0 : index
    %c8_157 = arith.constant 8 : index
    %c0_158 = arith.constant 0 : index
    %197 = vector.load %arg5[%c3_155, %c0_156, %c8_157, %c0_158] : memref<4x1x37x16xf32, #tpu.memory_space<vmem>>, vector<1x1x8x16xf32>
    %198 = vector.shape_cast %197 : vector<1x1x8x16xf32> to vector<8x16xf32>
    %199 = vector.shape_cast %196 : vector<8x16xf32> to vector<1x1x8x16xf32>
    tpu.vector_store %arg5[%c3_155, %c0_156, %c8_157, %c0_158], %199 {strides = array<i32>} : memref<4x1x37x16xf32, #tpu.memory_space<vmem>>, vector<1x1x8x16xf32>,
    %200 = vector.extract_strided_slice %180 {offsets = [0, 0], sizes = [8, 16], strides = [1, 1]} : vector<16x16xf32> to vector<8x16xf32>
    %c3_159 = arith.constant 3 : index
    %c0_160 = arith.constant 0 : index
    %c16_161 = arith.constant 16 : index
    %c0_162 = arith.constant 0 : index
    %201 = vector.load %arg5[%c3_159, %c0_160, %c16_161, %c0_162] : memref<4x1x37x16xf32, #tpu.memory_space<vmem>>, vector<1x1x8x16xf32>
    %202 = vector.shape_cast %201 : vector<1x1x8x16xf32> to vector<8x16xf32>
    %203 = vector.shape_cast %200 : vector<8x16xf32> to vector<1x1x8x16xf32>
    tpu.vector_store %arg5[%c3_159, %c0_160, %c16_161, %c0_162], %203 {strides = array<i32>} : memref<4x1x37x16xf32, #tpu.memory_space<vmem>>, vector<1x1x8x16xf32>,
    %204 = vector.shape_cast %190 : vector<8x1xf32> to vector<8x1xf32>
    %205 = vector.broadcast %204 : vector<8x1xf32> to vector<8x16xf32>
    %c3_163 = arith.constant 3 : index
    %c0_164 = arith.constant 0 : index
    %c24_165 = arith.constant 24 : index
    %c0_166 = arith.constant 0 : index
    %206 = vector.load %arg5[%c3_163, %c0_164, %c24_165, %c0_166] : memref<4x1x37x16xf32, #tpu.memory_space<vmem>>, vector<1x1x8x16xf32>
    %207 = vector.shape_cast %206 : vector<1x1x8x16xf32> to vector<8x16xf32>
    %208 = vector.shape_cast %205 : vector<8x16xf32> to vector<1x1x8x16xf32>
    tpu.vector_store %arg5[%c3_163, %c0_164, %c24_165, %c0_166], %208 {strides = array<i32>} : memref<4x1x37x16xf32, #tpu.memory_space<vmem>>, vector<1x1x8x16xf32>,
    %c1_167 = arith.constant 1 : index
    %c0_168 = arith.constant 0 : index
    %c0_169 = arith.constant 0 : index
    %209 = vector.load %arg2[%c1_167, %c0_168, %c0_169] : memref<7x32x37xf32, #tpu.memory_space<vmem>>, vector<1x32x37xf32>
    %210 = vector.shape_cast %209 : vector<1x32x37xf32> to vector<32x37xf32>
    %c0_170 = arith.constant 0 : index
    %c0_171 = arith.constant 0 : index
    %c0_172 = arith.constant 0 : index
    %c0_173 = arith.constant 0 : index
    %211 = vector.load %arg5[%c0_170, %c0_171, %c0_172, %c0_173] : memref<4x1x37x16xf32, #tpu.memory_space<vmem>>, vector<1x1x37x16xf32>
    %212 = vector.shape_cast %211 : vector<1x1x37x16xf32> to vector<37x16xf32>
    %cst_174 = arith.constant dense<0.000000e+00> : vector<32x16xf32>
    %213 = tpu.matmul %210, %212, %cst_174 {dimension_numbers = #tpu.dot_dimension_numbers<[1], [0], [0], [1], [0, 0, 1, 1], [], []>} : vector<32x37xf32>, vector<37x16xf32>, vector<32x16xf32> -> vector<32x16xf32>
    %cst_175 = arith.constant 0.000000e+00 : f32
    %214 = vector.broadcast %cst_175 : f32 to vector<32x16xf32>
    %215 = arith.maximumf %213, %214 : vector<32x16xf32>
    %c1_176 = arith.constant 1 : index
    %c0_177 = arith.constant 0 : index
    %c0_178 = arith.constant 0 : index
    %c0_179 = arith.constant 0 : index
    %216 = vector.load %arg5[%c1_176, %c0_177, %c0_178, %c0_179] : memref<4x1x37x16xf32, #tpu.memory_space<vmem>>, vector<1x1x37x16xf32>
    %217 = vector.shape_cast %216 : vector<1x1x37x16xf32> to vector<37x16xf32>
    %cst_180 = arith.constant dense<0.000000e+00> : vector<32x16xf32>
    %218 = tpu.matmul %210, %217, %cst_180 {dimension_numbers = #tpu.dot_dimension_numbers<[1], [0], [0], [1], [0, 0, 1, 1], [], []>} : vector<32x37xf32>, vector<37x16xf32>, vector<32x16xf32> -> vector<32x16xf32>
    %cst_181 = arith.constant 0.000000e+00 : f32
    %219 = vector.broadcast %cst_181 : f32 to vector<32x16xf32>
    %220 = arith.maximumf %218, %219 : vector<32x16xf32>
    %c2_182 = arith.constant 2 : index
    %c0_183 = arith.constant 0 : index
    %c0_184 = arith.constant 0 : index
    %c0_185 = arith.constant 0 : index
    %221 = vector.load %arg5[%c2_182, %c0_183, %c0_184, %c0_185] : memref<4x1x37x16xf32, #tpu.memory_space<vmem>>, vector<1x1x37x16xf32>
    %222 = vector.shape_cast %221 : vector<1x1x37x16xf32> to vector<37x16xf32>
    %cst_186 = arith.constant dense<0.000000e+00> : vector<32x16xf32>
    %223 = tpu.matmul %210, %222, %cst_186 {dimension_numbers = #tpu.dot_dimension_numbers<[1], [0], [0], [1], [0, 0, 1, 1], [], []>} : vector<32x37xf32>, vector<37x16xf32>, vector<32x16xf32> -> vector<32x16xf32>
    %cst_187 = arith.constant 0.000000e+00 : f32
    %224 = vector.broadcast %cst_187 : f32 to vector<32x16xf32>
    %225 = arith.maximumf %223, %224 : vector<32x16xf32>
    %c3_188 = arith.constant 3 : index
    %c0_189 = arith.constant 0 : index
    %c0_190 = arith.constant 0 : index
    %c0_191 = arith.constant 0 : index
    %226 = vector.load %arg5[%c3_188, %c0_189, %c0_190, %c0_191] : memref<4x1x37x16xf32, #tpu.memory_space<vmem>>, vector<1x1x37x16xf32>
    %227 = vector.shape_cast %226 : vector<1x1x37x16xf32> to vector<37x16xf32>
    %cst_192 = arith.constant dense<0.000000e+00> : vector<32x16xf32>
    %228 = tpu.matmul %210, %227, %cst_192 {dimension_numbers = #tpu.dot_dimension_numbers<[1], [0], [0], [1], [0, 0, 1, 1], [], []>} : vector<32x37xf32>, vector<37x16xf32>, vector<32x16xf32> -> vector<32x16xf32>
    %cst_193 = arith.constant 0.000000e+00 : f32
    %229 = vector.broadcast %cst_193 : f32 to vector<32x16xf32>
    %230 = arith.maximumf %228, %229 : vector<32x16xf32>
    %231 = vector.extract_strided_slice %215 {offsets = [16, 0], sizes = [16, 16], strides = [1, 1]} : vector<32x16xf32> to vector<16x16xf32>
    %232 = vector.extract_strided_slice %220 {offsets = [16, 0], sizes = [16, 16], strides = [1, 1]} : vector<32x16xf32> to vector<16x16xf32>
    %233 = vector.extract_strided_slice %225 {offsets = [16, 0], sizes = [16, 16], strides = [1, 1]} : vector<32x16xf32> to vector<16x16xf32>
    %234 = vector.extract_strided_slice %230 {offsets = [16, 0], sizes = [16, 16], strides = [1, 1]} : vector<32x16xf32> to vector<16x16xf32>
    %235 = arith.addf %231, %232 : vector<16x16xf32>
    %236 = arith.addf %235, %233 : vector<16x16xf32>
    %237 = arith.addf %236, %234 : vector<16x16xf32>
    %238 = vector.extract_strided_slice %215 {offsets = [0, 0], sizes = [16, 16], strides = [1, 1]} : vector<32x16xf32> to vector<16x16xf32>
    %239 = arith.subf %237, %231 : vector<16x16xf32>
    %cst_194 = arith.constant 0.333333343 : f32
    %240 = vector.broadcast %cst_194 : f32 to vector<16x16xf32>
    %241 = arith.mulf %239, %240 : vector<16x16xf32>
    %242 = vector.extract_strided_slice %238 {offsets = [8, 0], sizes = [8, 16], strides = [1, 1]} : vector<16x16xf32> to vector<8x16xf32>
    %cst_195 = arith.constant dense<0.000000e+00> : vector<8xf32>
    %243 = vector.multi_reduction <add>, %242, %cst_195 [1] : vector<8x16xf32> to vector<8xf32>
    %244 = vector.shape_cast %243 : vector<8xf32> to vector<8x1xf32>
    %cst_196 = arith.constant 1.600000e+01 : f32
    %245 = vector.broadcast %cst_196 : f32 to vector<8x1xf32>
    %246 = arith.divf %244, %245 : vector<8x1xf32>
    %247 = vector.extract_strided_slice %241 {offsets = [8, 0], sizes = [8, 16], strides = [1, 1]} : vector<16x16xf32> to vector<8x16xf32>
    %cst_197 = arith.constant dense<0.000000e+00> : vector<8xf32>
    %248 = vector.multi_reduction <add>, %247, %cst_197 [1] : vector<8x16xf32> to vector<8xf32>
    %249 = vector.shape_cast %248 : vector<8xf32> to vector<8x1xf32>
    %cst_198 = arith.constant 1.600000e+01 : f32
    %250 = vector.broadcast %cst_198 : f32 to vector<8x1xf32>
    %251 = arith.divf %249, %250 : vector<8x1xf32>
    %252 = vector.extract_strided_slice %238 {offsets = [0, 0], sizes = [8, 16], strides = [1, 1]} : vector<16x16xf32> to vector<8x16xf32>
    %c0_199 = arith.constant 0 : index
    %c0_200 = arith.constant 0 : index
    %c0_201 = arith.constant 0 : index
    %c0_202 = arith.constant 0 : index
    %253 = vector.load %arg5[%c0_199, %c0_200, %c0_201, %c0_202] : memref<4x1x37x16xf32, #tpu.memory_space<vmem>>, vector<1x1x8x16xf32>
    %254 = vector.shape_cast %253 : vector<1x1x8x16xf32> to vector<8x16xf32>
    %255 = vector.shape_cast %252 : vector<8x16xf32> to vector<1x1x8x16xf32>
    tpu.vector_store %arg5[%c0_199, %c0_200, %c0_201, %c0_202], %255 {strides = array<i32>} : memref<4x1x37x16xf32, #tpu.memory_space<vmem>>, vector<1x1x8x16xf32>,
    %256 = vector.shape_cast %246 : vector<8x1xf32> to vector<8x1xf32>
    %257 = vector.broadcast %256 : vector<8x1xf32> to vector<8x16xf32>
    %c0_203 = arith.constant 0 : index
    %c0_204 = arith.constant 0 : index
    %c8_205 = arith.constant 8 : index
    %c0_206 = arith.constant 0 : index
    %258 = vector.load %arg5[%c0_203, %c0_204, %c8_205, %c0_206] : memref<4x1x37x16xf32, #tpu.memory_space<vmem>>, vector<1x1x8x16xf32>
    %259 = vector.shape_cast %258 : vector<1x1x8x16xf32> to vector<8x16xf32>
    %260 = vector.shape_cast %257 : vector<8x16xf32> to vector<1x1x8x16xf32>
    tpu.vector_store %arg5[%c0_203, %c0_204, %c8_205, %c0_206], %260 {strides = array<i32>} : memref<4x1x37x16xf32, #tpu.memory_space<vmem>>, vector<1x1x8x16xf32>,
    %261 = vector.extract_strided_slice %241 {offsets = [0, 0], sizes = [8, 16], strides = [1, 1]} : vector<16x16xf32> to vector<8x16xf32>
    %c0_207 = arith.constant 0 : index
    %c0_208 = arith.constant 0 : index
    %c16_209 = arith.constant 16 : index
    %c0_210 = arith.constant 0 : index
    %262 = vector.load %arg5[%c0_207, %c0_208, %c16_209, %c0_210] : memref<4x1x37x16xf32, #tpu.memory_space<vmem>>, vector<1x1x8x16xf32>
    %263 = vector.shape_cast %262 : vector<1x1x8x16xf32> to vector<8x16xf32>
    %264 = vector.shape_cast %261 : vector<8x16xf32> to vector<1x1x8x16xf32>
    tpu.vector_store %arg5[%c0_207, %c0_208, %c16_209, %c0_210], %264 {strides = array<i32>} : memref<4x1x37x16xf32, #tpu.memory_space<vmem>>, vector<1x1x8x16xf32>,
    %265 = vector.shape_cast %251 : vector<8x1xf32> to vector<8x1xf32>
    %266 = vector.broadcast %265 : vector<8x1xf32> to vector<8x16xf32>
    %c0_211 = arith.constant 0 : index
    %c0_212 = arith.constant 0 : index
    %c24_213 = arith.constant 24 : index
    %c0_214 = arith.constant 0 : index
    %267 = vector.load %arg5[%c0_211, %c0_212, %c24_213, %c0_214] : memref<4x1x37x16xf32, #tpu.memory_space<vmem>>, vector<1x1x8x16xf32>
    %268 = vector.shape_cast %267 : vector<1x1x8x16xf32> to vector<8x16xf32>
    %269 = vector.shape_cast %266 : vector<8x16xf32> to vector<1x1x8x16xf32>
    tpu.vector_store %arg5[%c0_211, %c0_212, %c24_213, %c0_214], %269 {strides = array<i32>} : memref<4x1x37x16xf32, #tpu.memory_space<vmem>>, vector<1x1x8x16xf32>,
    %270 = vector.extract_strided_slice %220 {offsets = [0, 0], sizes = [16, 16], strides = [1, 1]} : vector<32x16xf32> to vector<16x16xf32>
    %271 = arith.subf %237, %232 : vector<16x16xf32>
    %cst_215 = arith.constant 0.333333343 : f32
    %272 = vector.broadcast %cst_215 : f32 to vector<16x16xf32>
    %273 = arith.mulf %271, %272 : vector<16x16xf32>
    %274 = vector.extract_strided_slice %270 {offsets = [8, 0], sizes = [8, 16], strides = [1, 1]} : vector<16x16xf32> to vector<8x16xf32>
    %cst_216 = arith.constant dense<0.000000e+00> : vector<8xf32>
    %275 = vector.multi_reduction <add>, %274, %cst_216 [1] : vector<8x16xf32> to vector<8xf32>
    %276 = vector.shape_cast %275 : vector<8xf32> to vector<8x1xf32>
    %cst_217 = arith.constant 1.600000e+01 : f32
    %277 = vector.broadcast %cst_217 : f32 to vector<8x1xf32>
    %278 = arith.divf %276, %277 : vector<8x1xf32>
    %279 = vector.extract_strided_slice %273 {offsets = [8, 0], sizes = [8, 16], strides = [1, 1]} : vector<16x16xf32> to vector<8x16xf32>
    %cst_218 = arith.constant dense<0.000000e+00> : vector<8xf32>
    %280 = vector.multi_reduction <add>, %279, %cst_218 [1] : vector<8x16xf32> to vector<8xf32>
    %281 = vector.shape_cast %280 : vector<8xf32> to vector<8x1xf32>
    %cst_219 = arith.constant 1.600000e+01 : f32
    %282 = vector.broadcast %cst_219 : f32 to vector<8x1xf32>
    %283 = arith.divf %281, %282 : vector<8x1xf32>
    %284 = vector.extract_strided_slice %270 {offsets = [0, 0], sizes = [8, 16], strides = [1, 1]} : vector<16x16xf32> to vector<8x16xf32>
    %c1_220 = arith.constant 1 : index
    %c0_221 = arith.constant 0 : index
    %c0_222 = arith.constant 0 : index
    %c0_223 = arith.constant 0 : index
    %285 = vector.load %arg5[%c1_220, %c0_221, %c0_222, %c0_223] : memref<4x1x37x16xf32, #tpu.memory_space<vmem>>, vector<1x1x8x16xf32>
    %286 = vector.shape_cast %285 : vector<1x1x8x16xf32> to vector<8x16xf32>
    %287 = vector.shape_cast %284 : vector<8x16xf32> to vector<1x1x8x16xf32>
    tpu.vector_store %arg5[%c1_220, %c0_221, %c0_222, %c0_223], %287 {strides = array<i32>} : memref<4x1x37x16xf32, #tpu.memory_space<vmem>>, vector<1x1x8x16xf32>,
    %288 = vector.shape_cast %278 : vector<8x1xf32> to vector<8x1xf32>
    %289 = vector.broadcast %288 : vector<8x1xf32> to vector<8x16xf32>
    %c1_224 = arith.constant 1 : index
    %c0_225 = arith.constant 0 : index
    %c8_226 = arith.constant 8 : index
    %c0_227 = arith.constant 0 : index
    %290 = vector.load %arg5[%c1_224, %c0_225, %c8_226, %c0_227] : memref<4x1x37x16xf32, #tpu.memory_space<vmem>>, vector<1x1x8x16xf32>
    %291 = vector.shape_cast %290 : vector<1x1x8x16xf32> to vector<8x16xf32>
    %292 = vector.shape_cast %289 : vector<8x16xf32> to vector<1x1x8x16xf32>
    tpu.vector_store %arg5[%c1_224, %c0_225, %c8_226, %c0_227], %292 {strides = array<i32>} : memref<4x1x37x16xf32, #tpu.memory_space<vmem>>, vector<1x1x8x16xf32>,
    %293 = vector.extract_strided_slice %273 {offsets = [0, 0], sizes = [8, 16], strides = [1, 1]} : vector<16x16xf32> to vector<8x16xf32>
    %c1_228 = arith.constant 1 : index
    %c0_229 = arith.constant 0 : index
    %c16_230 = arith.constant 16 : index
    %c0_231 = arith.constant 0 : index
    %294 = vector.load %arg5[%c1_228, %c0_229, %c16_230, %c0_231] : memref<4x1x37x16xf32, #tpu.memory_space<vmem>>, vector<1x1x8x16xf32>
    %295 = vector.shape_cast %294 : vector<1x1x8x16xf32> to vector<8x16xf32>
    %296 = vector.shape_cast %293 : vector<8x16xf32> to vector<1x1x8x16xf32>
    tpu.vector_store %arg5[%c1_228, %c0_229, %c16_230, %c0_231], %296 {strides = array<i32>} : memref<4x1x37x16xf32, #tpu.memory_space<vmem>>, vector<1x1x8x16xf32>,
    %297 = vector.shape_cast %283 : vector<8x1xf32> to vector<8x1xf32>
    %298 = vector.broadcast %297 : vector<8x1xf32> to vector<8x16xf32>
    %c1_232 = arith.constant 1 : index
    %c0_233 = arith.constant 0 : index
    %c24_234 = arith.constant 24 : index
    %c0_235 = arith.constant 0 : index
    %299 = vector.load %arg5[%c1_232, %c0_233, %c24_234, %c0_235] : memref<4x1x37x16xf32, #tpu.memory_space<vmem>>, vector<1x1x8x16xf32>
    %300 = vector.shape_cast %299 : vector<1x1x8x16xf32> to vector<8x16xf32>
    %301 = vector.shape_cast %298 : vector<8x16xf32> to vector<1x1x8x16xf32>
    tpu.vector_store %arg5[%c1_232, %c0_233, %c24_234, %c0_235], %301 {strides = array<i32>} : memref<4x1x37x16xf32, #tpu.memory_space<vmem>>, vector<1x1x8x16xf32>,
    %302 = vector.extract_strided_slice %225 {offsets = [0, 0], sizes = [16, 16], strides = [1, 1]} : vector<32x16xf32> to vector<16x16xf32>
    %303 = arith.subf %237, %233 : vector<16x16xf32>
    %cst_236 = arith.constant 0.333333343 : f32
    %304 = vector.broadcast %cst_236 : f32 to vector<16x16xf32>
    %305 = arith.mulf %303, %304 : vector<16x16xf32>
    %306 = vector.extract_strided_slice %302 {offsets = [8, 0], sizes = [8, 16], strides = [1, 1]} : vector<16x16xf32> to vector<8x16xf32>
    %cst_237 = arith.constant dense<0.000000e+00> : vector<8xf32>
    %307 = vector.multi_reduction <add>, %306, %cst_237 [1] : vector<8x16xf32> to vector<8xf32>
    %308 = vector.shape_cast %307 : vector<8xf32> to vector<8x1xf32>
    %cst_238 = arith.constant 1.600000e+01 : f32
    %309 = vector.broadcast %cst_238 : f32 to vector<8x1xf32>
    %310 = arith.divf %308, %309 : vector<8x1xf32>
    %311 = vector.extract_strided_slice %305 {offsets = [8, 0], sizes = [8, 16], strides = [1, 1]} : vector<16x16xf32> to vector<8x16xf32>
    %cst_239 = arith.constant dense<0.000000e+00> : vector<8xf32>
    %312 = vector.multi_reduction <add>, %311, %cst_239 [1] : vector<8x16xf32> to vector<8xf32>
    %313 = vector.shape_cast %312 : vector<8xf32> to vector<8x1xf32>
    %cst_240 = arith.constant 1.600000e+01 : f32
    %314 = vector.broadcast %cst_240 : f32 to vector<8x1xf32>
    %315 = arith.divf %313, %314 : vector<8x1xf32>
    %316 = vector.extract_strided_slice %302 {offsets = [0, 0], sizes = [8, 16], strides = [1, 1]} : vector<16x16xf32> to vector<8x16xf32>
    %c2_241 = arith.constant 2 : index
    %c0_242 = arith.constant 0 : index
    %c0_243 = arith.constant 0 : index
    %c0_244 = arith.constant 0 : index
    %317 = vector.load %arg5[%c2_241, %c0_242, %c0_243, %c0_244] : memref<4x1x37x16xf32, #tpu.memory_space<vmem>>, vector<1x1x8x16xf32>
    %318 = vector.shape_cast %317 : vector<1x1x8x16xf32> to vector<8x16xf32>
    %319 = vector.shape_cast %316 : vector<8x16xf32> to vector<1x1x8x16xf32>
    tpu.vector_store %arg5[%c2_241, %c0_242, %c0_243, %c0_244], %319 {strides = array<i32>} : memref<4x1x37x16xf32, #tpu.memory_space<vmem>>, vector<1x1x8x16xf32>,
    %320 = vector.shape_cast %310 : vector<8x1xf32> to vector<8x1xf32>
    %321 = vector.broadcast %320 : vector<8x1xf32> to vector<8x16xf32>
    %c2_245 = arith.constant 2 : index
    %c0_246 = arith.constant 0 : index
    %c8_247 = arith.constant 8 : index
    %c0_248 = arith.constant 0 : index
    %322 = vector.load %arg5[%c2_245, %c0_246, %c8_247, %c0_248] : memref<4x1x37x16xf32, #tpu.memory_space<vmem>>, vector<1x1x8x16xf32>
    %323 = vector.shape_cast %322 : vector<1x1x8x16xf32> to vector<8x16xf32>
    %324 = vector.shape_cast %321 : vector<8x16xf32> to vector<1x1x8x16xf32>
    tpu.vector_store %arg5[%c2_245, %c0_246, %c8_247, %c0_248], %324 {strides = array<i32>} : memref<4x1x37x16xf32, #tpu.memory_space<vmem>>, vector<1x1x8x16xf32>,
    %325 = vector.extract_strided_slice %305 {offsets = [0, 0], sizes = [8, 16], strides = [1, 1]} : vector<16x16xf32> to vector<8x16xf32>
    %c2_249 = arith.constant 2 : index
    %c0_250 = arith.constant 0 : index
    %c16_251 = arith.constant 16 : index
    %c0_252 = arith.constant 0 : index
    %326 = vector.load %arg5[%c2_249, %c0_250, %c16_251, %c0_252] : memref<4x1x37x16xf32, #tpu.memory_space<vmem>>, vector<1x1x8x16xf32>
    %327 = vector.shape_cast %326 : vector<1x1x8x16xf32> to vector<8x16xf32>
    %328 = vector.shape_cast %325 : vector<8x16xf32> to vector<1x1x8x16xf32>
    tpu.vector_store %arg5[%c2_249, %c0_250, %c16_251, %c0_252], %328 {strides = array<i32>} : memref<4x1x37x16xf32, #tpu.memory_space<vmem>>, vector<1x1x8x16xf32>,
    %329 = vector.shape_cast %315 : vector<8x1xf32> to vector<8x1xf32>
    %330 = vector.broadcast %329 : vector<8x1xf32> to vector<8x16xf32>
    %c2_253 = arith.constant 2 : index
    %c0_254 = arith.constant 0 : index
    %c24_255 = arith.constant 24 : index
    %c0_256 = arith.constant 0 : index
    %331 = vector.load %arg5[%c2_253, %c0_254, %c24_255, %c0_256] : memref<4x1x37x16xf32, #tpu.memory_space<vmem>>, vector<1x1x8x16xf32>
    %332 = vector.shape_cast %331 : vector<1x1x8x16xf32> to vector<8x16xf32>
    %333 = vector.shape_cast %330 : vector<8x16xf32> to vector<1x1x8x16xf32>
    tpu.vector_store %arg5[%c2_253, %c0_254, %c24_255, %c0_256], %333 {strides = array<i32>} : memref<4x1x37x16xf32, #tpu.memory_space<vmem>>, vector<1x1x8x16xf32>,
    %334 = vector.extract_strided_slice %230 {offsets = [0, 0], sizes = [16, 16], strides = [1, 1]} : vector<32x16xf32> to vector<16x16xf32>
    %335 = arith.subf %237, %234 : vector<16x16xf32>
    %cst_257 = arith.constant 0.333333343 : f32
    %336 = vector.broadcast %cst_257 : f32 to vector<16x16xf32>
    %337 = arith.mulf %335, %336 : vector<16x16xf32>
    %338 = vector.extract_strided_slice %334 {offsets = [8, 0], sizes = [8, 16], strides = [1, 1]} : vector<16x16xf32> to vector<8x16xf32>
    %cst_258 = arith.constant dense<0.000000e+00> : vector<8xf32>
    %339 = vector.multi_reduction <add>, %338, %cst_258 [1] : vector<8x16xf32> to vector<8xf32>
    %340 = vector.shape_cast %339 : vector<8xf32> to vector<8x1xf32>
    %cst_259 = arith.constant 1.600000e+01 : f32
    %341 = vector.broadcast %cst_259 : f32 to vector<8x1xf32>
    %342 = arith.divf %340, %341 : vector<8x1xf32>
    %343 = vector.extract_strided_slice %337 {offsets = [8, 0], sizes = [8, 16], strides = [1, 1]} : vector<16x16xf32> to vector<8x16xf32>
    %cst_260 = arith.constant dense<0.000000e+00> : vector<8xf32>
    %344 = vector.multi_reduction <add>, %343, %cst_260 [1] : vector<8x16xf32> to vector<8xf32>
    %345 = vector.shape_cast %344 : vector<8xf32> to vector<8x1xf32>
    %cst_261 = arith.constant 1.600000e+01 : f32
    %346 = vector.broadcast %cst_261 : f32 to vector<8x1xf32>
    %347 = arith.divf %345, %346 : vector<8x1xf32>
    %348 = vector.extract_strided_slice %334 {offsets = [0, 0], sizes = [8, 16], strides = [1, 1]} : vector<16x16xf32> to vector<8x16xf32>
    %c3_262 = arith.constant 3 : index
    %c0_263 = arith.constant 0 : index
    %c0_264 = arith.constant 0 : index
    %c0_265 = arith.constant 0 : index
    %349 = vector.load %arg5[%c3_262, %c0_263, %c0_264, %c0_265] : memref<4x1x37x16xf32, #tpu.memory_space<vmem>>, vector<1x1x8x16xf32>
    %350 = vector.shape_cast %349 : vector<1x1x8x16xf32> to vector<8x16xf32>
    %351 = vector.shape_cast %348 : vector<8x16xf32> to vector<1x1x8x16xf32>
    tpu.vector_store %arg5[%c3_262, %c0_263, %c0_264, %c0_265], %351 {strides = array<i32>} : memref<4x1x37x16xf32, #tpu.memory_space<vmem>>, vector<1x1x8x16xf32>,
    %352 = vector.shape_cast %342 : vector<8x1xf32> to vector<8x1xf32>
    %353 = vector.broadcast %352 : vector<8x1xf32> to vector<8x16xf32>
    %c3_266 = arith.constant 3 : index
    %c0_267 = arith.constant 0 : index
    %c8_268 = arith.constant 8 : index
    %c0_269 = arith.constant 0 : index
    %354 = vector.load %arg5[%c3_266, %c0_267, %c8_268, %c0_269] : memref<4x1x37x16xf32, #tpu.memory_space<vmem>>, vector<1x1x8x16xf32>
    %355 = vector.shape_cast %354 : vector<1x1x8x16xf32> to vector<8x16xf32>
    %356 = vector.shape_cast %353 : vector<8x16xf32> to vector<1x1x8x16xf32>
    tpu.vector_store %arg5[%c3_266, %c0_267, %c8_268, %c0_269], %356 {strides = array<i32>} : memref<4x1x37x16xf32, #tpu.memory_space<vmem>>, vector<1x1x8x16xf32>,
    %357 = vector.extract_strided_slice %337 {offsets = [0, 0], sizes = [8, 16], strides = [1, 1]} : vector<16x16xf32> to vector<8x16xf32>
    %c3_270 = arith.constant 3 : index
    %c0_271 = arith.constant 0 : index
    %c16_272 = arith.constant 16 : index
    %c0_273 = arith.constant 0 : index
    %358 = vector.load %arg5[%c3_270, %c0_271, %c16_272, %c0_273] : memref<4x1x37x16xf32, #tpu.memory_space<vmem>>, vector<1x1x8x16xf32>
    %359 = vector.shape_cast %358 : vector<1x1x8x16xf32> to vector<8x16xf32>
    %360 = vector.shape_cast %357 : vector<8x16xf32> to vector<1x1x8x16xf32>
    tpu.vector_store %arg5[%c3_270, %c0_271, %c16_272, %c0_273], %360 {strides = array<i32>} : memref<4x1x37x16xf32, #tpu.memory_space<vmem>>, vector<1x1x8x16xf32>,
    %361 = vector.shape_cast %347 : vector<8x1xf32> to vector<8x1xf32>
    %362 = vector.broadcast %361 : vector<8x1xf32> to vector<8x16xf32>
    %c3_274 = arith.constant 3 : index
    %c0_275 = arith.constant 0 : index
    %c24_276 = arith.constant 24 : index
    %c0_277 = arith.constant 0 : index
    %363 = vector.load %arg5[%c3_274, %c0_275, %c24_276, %c0_277] : memref<4x1x37x16xf32, #tpu.memory_space<vmem>>, vector<1x1x8x16xf32>
    %364 = vector.shape_cast %363 : vector<1x1x8x16xf32> to vector<8x16xf32>
    %365 = vector.shape_cast %362 : vector<8x16xf32> to vector<1x1x8x16xf32>
    tpu.vector_store %arg5[%c3_274, %c0_275, %c24_276, %c0_277], %365 {strides = array<i32>} : memref<4x1x37x16xf32, #tpu.memory_space<vmem>>, vector<1x1x8x16xf32>,
    %c2_278 = arith.constant 2 : index
    %c0_279 = arith.constant 0 : index
    %c0_280 = arith.constant 0 : index
    %366 = vector.load %arg2[%c2_278, %c0_279, %c0_280] : memref<7x32x37xf32, #tpu.memory_space<vmem>>, vector<1x32x37xf32>
    %367 = vector.shape_cast %366 : vector<1x32x37xf32> to vector<32x37xf32>
    %c0_281 = arith.constant 0 : index
    %c0_282 = arith.constant 0 : index
    %c0_283 = arith.constant 0 : index
    %c0_284 = arith.constant 0 : index
    %368 = vector.load %arg5[%c0_281, %c0_282, %c0_283, %c0_284] : memref<4x1x37x16xf32, #tpu.memory_space<vmem>>, vector<1x1x37x16xf32>
    %369 = vector.shape_cast %368 : vector<1x1x37x16xf32> to vector<37x16xf32>
    %cst_285 = arith.constant dense<0.000000e+00> : vector<32x16xf32>
    %370 = tpu.matmul %367, %369, %cst_285 {dimension_numbers = #tpu.dot_dimension_numbers<[1], [0], [0], [1], [0, 0, 1, 1], [], []>} : vector<32x37xf32>, vector<37x16xf32>, vector<32x16xf32> -> vector<32x16xf32>
    %cst_286 = arith.constant 0.000000e+00 : f32
    %371 = vector.broadcast %cst_286 : f32 to vector<32x16xf32>
    %372 = arith.maximumf %370, %371 : vector<32x16xf32>
    %c1_287 = arith.constant 1 : index
    %c0_288 = arith.constant 0 : index
    %c0_289 = arith.constant 0 : index
    %c0_290 = arith.constant 0 : index
    %373 = vector.load %arg5[%c1_287, %c0_288, %c0_289, %c0_290] : memref<4x1x37x16xf32, #tpu.memory_space<vmem>>, vector<1x1x37x16xf32>
    %374 = vector.shape_cast %373 : vector<1x1x37x16xf32> to vector<37x16xf32>
    %cst_291 = arith.constant dense<0.000000e+00> : vector<32x16xf32>
    %375 = tpu.matmul %367, %374, %cst_291 {dimension_numbers = #tpu.dot_dimension_numbers<[1], [0], [0], [1], [0, 0, 1, 1], [], []>} : vector<32x37xf32>, vector<37x16xf32>, vector<32x16xf32> -> vector<32x16xf32>
    %cst_292 = arith.constant 0.000000e+00 : f32
    %376 = vector.broadcast %cst_292 : f32 to vector<32x16xf32>
    %377 = arith.maximumf %375, %376 : vector<32x16xf32>
    %c2_293 = arith.constant 2 : index
    %c0_294 = arith.constant 0 : index
    %c0_295 = arith.constant 0 : index
    %c0_296 = arith.constant 0 : index
    %378 = vector.load %arg5[%c2_293, %c0_294, %c0_295, %c0_296] : memref<4x1x37x16xf32, #tpu.memory_space<vmem>>, vector<1x1x37x16xf32>
    %379 = vector.shape_cast %378 : vector<1x1x37x16xf32> to vector<37x16xf32>
    %cst_297 = arith.constant dense<0.000000e+00> : vector<32x16xf32>
    %380 = tpu.matmul %367, %379, %cst_297 {dimension_numbers = #tpu.dot_dimension_numbers<[1], [0], [0], [1], [0, 0, 1, 1], [], []>} : vector<32x37xf32>, vector<37x16xf32>, vector<32x16xf32> -> vector<32x16xf32>
    %cst_298 = arith.constant 0.000000e+00 : f32
    %381 = vector.broadcast %cst_298 : f32 to vector<32x16xf32>
    %382 = arith.maximumf %380, %381 : vector<32x16xf32>
    %c3_299 = arith.constant 3 : index
    %c0_300 = arith.constant 0 : index
    %c0_301 = arith.constant 0 : index
    %c0_302 = arith.constant 0 : index
    %383 = vector.load %arg5[%c3_299, %c0_300, %c0_301, %c0_302] : memref<4x1x37x16xf32, #tpu.memory_space<vmem>>, vector<1x1x37x16xf32>
    %384 = vector.shape_cast %383 : vector<1x1x37x16xf32> to vector<37x16xf32>
    %cst_303 = arith.constant dense<0.000000e+00> : vector<32x16xf32>
    %385 = tpu.matmul %367, %384, %cst_303 {dimension_numbers = #tpu.dot_dimension_numbers<[1], [0], [0], [1], [0, 0, 1, 1], [], []>} : vector<32x37xf32>, vector<37x16xf32>, vector<32x16xf32> -> vector<32x16xf32>
    %cst_304 = arith.constant 0.000000e+00 : f32
    %386 = vector.broadcast %cst_304 : f32 to vector<32x16xf32>
    %387 = arith.maximumf %385, %386 : vector<32x16xf32>
    %388 = vector.extract_strided_slice %372 {offsets = [16, 0], sizes = [16, 16], strides = [1, 1]} : vector<32x16xf32> to vector<16x16xf32>
    %389 = vector.extract_strided_slice %377 {offsets = [16, 0], sizes = [16, 16], strides = [1, 1]} : vector<32x16xf32> to vector<16x16xf32>
    %390 = vector.extract_strided_slice %382 {offsets = [16, 0], sizes = [16, 16], strides = [1, 1]} : vector<32x16xf32> to vector<16x16xf32>
    %391 = vector.extract_strided_slice %387 {offsets = [16, 0], sizes = [16, 16], strides = [1, 1]} : vector<32x16xf32> to vector<16x16xf32>
    %392 = arith.addf %388, %389 : vector<16x16xf32>
    %393 = arith.addf %392, %390 : vector<16x16xf32>
    %394 = arith.addf %393, %391 : vector<16x16xf32>
    %395 = vector.extract_strided_slice %372 {offsets = [0, 0], sizes = [16, 16], strides = [1, 1]} : vector<32x16xf32> to vector<16x16xf32>
    %396 = arith.subf %394, %388 : vector<16x16xf32>
    %cst_305 = arith.constant 0.333333343 : f32
    %397 = vector.broadcast %cst_305 : f32 to vector<16x16xf32>
    %398 = arith.mulf %396, %397 : vector<16x16xf32>
    %399 = vector.extract_strided_slice %395 {offsets = [8, 0], sizes = [8, 16], strides = [1, 1]} : vector<16x16xf32> to vector<8x16xf32>
    %cst_306 = arith.constant dense<0.000000e+00> : vector<8xf32>
    %400 = vector.multi_reduction <add>, %399, %cst_306 [1] : vector<8x16xf32> to vector<8xf32>
    %401 = vector.shape_cast %400 : vector<8xf32> to vector<8x1xf32>
    %cst_307 = arith.constant 1.600000e+01 : f32
    %402 = vector.broadcast %cst_307 : f32 to vector<8x1xf32>
    %403 = arith.divf %401, %402 : vector<8x1xf32>
    %404 = vector.extract_strided_slice %398 {offsets = [8, 0], sizes = [8, 16], strides = [1, 1]} : vector<16x16xf32> to vector<8x16xf32>
    %cst_308 = arith.constant dense<0.000000e+00> : vector<8xf32>
    %405 = vector.multi_reduction <add>, %404, %cst_308 [1] : vector<8x16xf32> to vector<8xf32>
    %406 = vector.shape_cast %405 : vector<8xf32> to vector<8x1xf32>
    %cst_309 = arith.constant 1.600000e+01 : f32
    %407 = vector.broadcast %cst_309 : f32 to vector<8x1xf32>
    %408 = arith.divf %406, %407 : vector<8x1xf32>
    %409 = vector.extract_strided_slice %395 {offsets = [0, 0], sizes = [8, 16], strides = [1, 1]} : vector<16x16xf32> to vector<8x16xf32>
    %c0_310 = arith.constant 0 : index
    %c0_311 = arith.constant 0 : index
    %c0_312 = arith.constant 0 : index
    %c0_313 = arith.constant 0 : index
    %410 = vector.load %arg5[%c0_310, %c0_311, %c0_312, %c0_313] : memref<4x1x37x16xf32, #tpu.memory_space<vmem>>, vector<1x1x8x16xf32>
    %411 = vector.shape_cast %410 : vector<1x1x8x16xf32> to vector<8x16xf32>
    %412 = vector.shape_cast %409 : vector<8x16xf32> to vector<1x1x8x16xf32>
    tpu.vector_store %arg5[%c0_310, %c0_311, %c0_312, %c0_313], %412 {strides = array<i32>} : memref<4x1x37x16xf32, #tpu.memory_space<vmem>>, vector<1x1x8x16xf32>,
    %413 = vector.shape_cast %403 : vector<8x1xf32> to vector<8x1xf32>
    %414 = vector.broadcast %413 : vector<8x1xf32> to vector<8x16xf32>
    %c0_314 = arith.constant 0 : index
    %c0_315 = arith.constant 0 : index
    %c8_316 = arith.constant 8 : index
    %c0_317 = arith.constant 0 : index
    %415 = vector.load %arg5[%c0_314, %c0_315, %c8_316, %c0_317] : memref<4x1x37x16xf32, #tpu.memory_space<vmem>>, vector<1x1x8x16xf32>
    %416 = vector.shape_cast %415 : vector<1x1x8x16xf32> to vector<8x16xf32>
    %417 = vector.shape_cast %414 : vector<8x16xf32> to vector<1x1x8x16xf32>
    tpu.vector_store %arg5[%c0_314, %c0_315, %c8_316, %c0_317], %417 {strides = array<i32>} : memref<4x1x37x16xf32, #tpu.memory_space<vmem>>, vector<1x1x8x16xf32>,
    %418 = vector.extract_strided_slice %398 {offsets = [0, 0], sizes = [8, 16], strides = [1, 1]} : vector<16x16xf32> to vector<8x16xf32>
    %c0_318 = arith.constant 0 : index
    %c0_319 = arith.constant 0 : index
    %c16_320 = arith.constant 16 : index
    %c0_321 = arith.constant 0 : index
    %419 = vector.load %arg5[%c0_318, %c0_319, %c16_320, %c0_321] : memref<4x1x37x16xf32, #tpu.memory_space<vmem>>, vector<1x1x8x16xf32>
    %420 = vector.shape_cast %419 : vector<1x1x8x16xf32> to vector<8x16xf32>
    %421 = vector.shape_cast %418 : vector<8x16xf32> to vector<1x1x8x16xf32>
    tpu.vector_store %arg5[%c0_318, %c0_319, %c16_320, %c0_321], %421 {strides = array<i32>} : memref<4x1x37x16xf32, #tpu.memory_space<vmem>>, vector<1x1x8x16xf32>,
    %422 = vector.shape_cast %408 : vector<8x1xf32> to vector<8x1xf32>
    %423 = vector.broadcast %422 : vector<8x1xf32> to vector<8x16xf32>
    %c0_322 = arith.constant 0 : index
    %c0_323 = arith.constant 0 : index
    %c24_324 = arith.constant 24 : index
    %c0_325 = arith.constant 0 : index
    %424 = vector.load %arg5[%c0_322, %c0_323, %c24_324, %c0_325] : memref<4x1x37x16xf32, #tpu.memory_space<vmem>>, vector<1x1x8x16xf32>
    %425 = vector.shape_cast %424 : vector<1x1x8x16xf32> to vector<8x16xf32>
    %426 = vector.shape_cast %423 : vector<8x16xf32> to vector<1x1x8x16xf32>
    tpu.vector_store %arg5[%c0_322, %c0_323, %c24_324, %c0_325], %426 {strides = array<i32>} : memref<4x1x37x16xf32, #tpu.memory_space<vmem>>, vector<1x1x8x16xf32>,
    %427 = vector.extract_strided_slice %377 {offsets = [0, 0], sizes = [16, 16], strides = [1, 1]} : vector<32x16xf32> to vector<16x16xf32>
    %428 = arith.subf %394, %389 : vector<16x16xf32>
    %cst_326 = arith.constant 0.333333343 : f32
    %429 = vector.broadcast %cst_326 : f32 to vector<16x16xf32>
    %430 = arith.mulf %428, %429 : vector<16x16xf32>
    %431 = vector.extract_strided_slice %427 {offsets = [8, 0], sizes = [8, 16], strides = [1, 1]} : vector<16x16xf32> to vector<8x16xf32>
    %cst_327 = arith.constant dense<0.000000e+00> : vector<8xf32>
    %432 = vector.multi_reduction <add>, %431, %cst_327 [1] : vector<8x16xf32> to vector<8xf32>
    %433 = vector.shape_cast %432 : vector<8xf32> to vector<8x1xf32>
    %cst_328 = arith.constant 1.600000e+01 : f32
    %434 = vector.broadcast %cst_328 : f32 to vector<8x1xf32>
    %435 = arith.divf %433, %434 : vector<8x1xf32>
    %436 = vector.extract_strided_slice %430 {offsets = [8, 0], sizes = [8, 16], strides = [1, 1]} : vector<16x16xf32> to vector<8x16xf32>
    %cst_329 = arith.constant dense<0.000000e+00> : vector<8xf32>
    %437 = vector.multi_reduction <add>, %436, %cst_329 [1] : vector<8x16xf32> to vector<8xf32>
    %438 = vector.shape_cast %437 : vector<8xf32> to vector<8x1xf32>
    %cst_330 = arith.constant 1.600000e+01 : f32
    %439 = vector.broadcast %cst_330 : f32 to vector<8x1xf32>
    %440 = arith.divf %438, %439 : vector<8x1xf32>
    %441 = vector.extract_strided_slice %427 {offsets = [0, 0], sizes = [8, 16], strides = [1, 1]} : vector<16x16xf32> to vector<8x16xf32>
    %c1_331 = arith.constant 1 : index
    %c0_332 = arith.constant 0 : index
    %c0_333 = arith.constant 0 : index
    %c0_334 = arith.constant 0 : index
    %442 = vector.load %arg5[%c1_331, %c0_332, %c0_333, %c0_334] : memref<4x1x37x16xf32, #tpu.memory_space<vmem>>, vector<1x1x8x16xf32>
    %443 = vector.shape_cast %442 : vector<1x1x8x16xf32> to vector<8x16xf32>
    %444 = vector.shape_cast %441 : vector<8x16xf32> to vector<1x1x8x16xf32>
    tpu.vector_store %arg5[%c1_331, %c0_332, %c0_333, %c0_334], %444 {strides = array<i32>} : memref<4x1x37x16xf32, #tpu.memory_space<vmem>>, vector<1x1x8x16xf32>,
    %445 = vector.shape_cast %435 : vector<8x1xf32> to vector<8x1xf32>
    %446 = vector.broadcast %445 : vector<8x1xf32> to vector<8x16xf32>
    %c1_335 = arith.constant 1 : index
    %c0_336 = arith.constant 0 : index
    %c8_337 = arith.constant 8 : index
    %c0_338 = arith.constant 0 : index
    %447 = vector.load %arg5[%c1_335, %c0_336, %c8_337, %c0_338] : memref<4x1x37x16xf32, #tpu.memory_space<vmem>>, vector<1x1x8x16xf32>
    %448 = vector.shape_cast %447 : vector<1x1x8x16xf32> to vector<8x16xf32>
    %449 = vector.shape_cast %446 : vector<8x16xf32> to vector<1x1x8x16xf32>
    tpu.vector_store %arg5[%c1_335, %c0_336, %c8_337, %c0_338], %449 {strides = array<i32>} : memref<4x1x37x16xf32, #tpu.memory_space<vmem>>, vector<1x1x8x16xf32>,
    %450 = vector.extract_strided_slice %430 {offsets = [0, 0], sizes = [8, 16], strides = [1, 1]} : vector<16x16xf32> to vector<8x16xf32>
    %c1_339 = arith.constant 1 : index
    %c0_340 = arith.constant 0 : index
    %c16_341 = arith.constant 16 : index
    %c0_342 = arith.constant 0 : index
    %451 = vector.load %arg5[%c1_339, %c0_340, %c16_341, %c0_342] : memref<4x1x37x16xf32, #tpu.memory_space<vmem>>, vector<1x1x8x16xf32>
    %452 = vector.shape_cast %451 : vector<1x1x8x16xf32> to vector<8x16xf32>
    %453 = vector.shape_cast %450 : vector<8x16xf32> to vector<1x1x8x16xf32>
    tpu.vector_store %arg5[%c1_339, %c0_340, %c16_341, %c0_342], %453 {strides = array<i32>} : memref<4x1x37x16xf32, #tpu.memory_space<vmem>>, vector<1x1x8x16xf32>,
    %454 = vector.shape_cast %440 : vector<8x1xf32> to vector<8x1xf32>
    %455 = vector.broadcast %454 : vector<8x1xf32> to vector<8x16xf32>
    %c1_343 = arith.constant 1 : index
    %c0_344 = arith.constant 0 : index
    %c24_345 = arith.constant 24 : index
    %c0_346 = arith.constant 0 : index
    %456 = vector.load %arg5[%c1_343, %c0_344, %c24_345, %c0_346] : memref<4x1x37x16xf32, #tpu.memory_space<vmem>>, vector<1x1x8x16xf32>
    %457 = vector.shape_cast %456 : vector<1x1x8x16xf32> to vector<8x16xf32>
    %458 = vector.shape_cast %455 : vector<8x16xf32> to vector<1x1x8x16xf32>
    tpu.vector_store %arg5[%c1_343, %c0_344, %c24_345, %c0_346], %458 {strides = array<i32>} : memref<4x1x37x16xf32, #tpu.memory_space<vmem>>, vector<1x1x8x16xf32>,
    %459 = vector.extract_strided_slice %382 {offsets = [0, 0], sizes = [16, 16], strides = [1, 1]} : vector<32x16xf32> to vector<16x16xf32>
    %460 = arith.subf %394, %390 : vector<16x16xf32>
    %cst_347 = arith.constant 0.333333343 : f32
    %461 = vector.broadcast %cst_347 : f32 to vector<16x16xf32>
    %462 = arith.mulf %460, %461 : vector<16x16xf32>
    %463 = vector.extract_strided_slice %459 {offsets = [8, 0], sizes = [8, 16], strides = [1, 1]} : vector<16x16xf32> to vector<8x16xf32>
    %cst_348 = arith.constant dense<0.000000e+00> : vector<8xf32>
    %464 = vector.multi_reduction <add>, %463, %cst_348 [1] : vector<8x16xf32> to vector<8xf32>
    %465 = vector.shape_cast %464 : vector<8xf32> to vector<8x1xf32>
    %cst_349 = arith.constant 1.600000e+01 : f32
    %466 = vector.broadcast %cst_349 : f32 to vector<8x1xf32>
    %467 = arith.divf %465, %466 : vector<8x1xf32>
    %468 = vector.extract_strided_slice %462 {offsets = [8, 0], sizes = [8, 16], strides = [1, 1]} : vector<16x16xf32> to vector<8x16xf32>
    %cst_350 = arith.constant dense<0.000000e+00> : vector<8xf32>
    %469 = vector.multi_reduction <add>, %468, %cst_350 [1] : vector<8x16xf32> to vector<8xf32>
    %470 = vector.shape_cast %469 : vector<8xf32> to vector<8x1xf32>
    %cst_351 = arith.constant 1.600000e+01 : f32
    %471 = vector.broadcast %cst_351 : f32 to vector<8x1xf32>
    %472 = arith.divf %470, %471 : vector<8x1xf32>
    %473 = vector.extract_strided_slice %459 {offsets = [0, 0], sizes = [8, 16], strides = [1, 1]} : vector<16x16xf32> to vector<8x16xf32>
    %c2_352 = arith.constant 2 : index
    %c0_353 = arith.constant 0 : index
    %c0_354 = arith.constant 0 : index
    %c0_355 = arith.constant 0 : index
    %474 = vector.load %arg5[%c2_352, %c0_353, %c0_354, %c0_355] : memref<4x1x37x16xf32, #tpu.memory_space<vmem>>, vector<1x1x8x16xf32>
    %475 = vector.shape_cast %474 : vector<1x1x8x16xf32> to vector<8x16xf32>
    %476 = vector.shape_cast %473 : vector<8x16xf32> to vector<1x1x8x16xf32>
    tpu.vector_store %arg5[%c2_352, %c0_353, %c0_354, %c0_355], %476 {strides = array<i32>} : memref<4x1x37x16xf32, #tpu.memory_space<vmem>>, vector<1x1x8x16xf32>,
    %477 = vector.shape_cast %467 : vector<8x1xf32> to vector<8x1xf32>
    %478 = vector.broadcast %477 : vector<8x1xf32> to vector<8x16xf32>
    %c2_356 = arith.constant 2 : index
    %c0_357 = arith.constant 0 : index
    %c8_358 = arith.constant 8 : index
    %c0_359 = arith.constant 0 : index
    %479 = vector.load %arg5[%c2_356, %c0_357, %c8_358, %c0_359] : memref<4x1x37x16xf32, #tpu.memory_space<vmem>>, vector<1x1x8x16xf32>
    %480 = vector.shape_cast %479 : vector<1x1x8x16xf32> to vector<8x16xf32>
    %481 = vector.shape_cast %478 : vector<8x16xf32> to vector<1x1x8x16xf32>
    tpu.vector_store %arg5[%c2_356, %c0_357, %c8_358, %c0_359], %481 {strides = array<i32>} : memref<4x1x37x16xf32, #tpu.memory_space<vmem>>, vector<1x1x8x16xf32>,
    %482 = vector.extract_strided_slice %462 {offsets = [0, 0], sizes = [8, 16], strides = [1, 1]} : vector<16x16xf32> to vector<8x16xf32>
    %c2_360 = arith.constant 2 : index
    %c0_361 = arith.constant 0 : index
    %c16_362 = arith.constant 16 : index
    %c0_363 = arith.constant 0 : index
    %483 = vector.load %arg5[%c2_360, %c0_361, %c16_362, %c0_363] : memref<4x1x37x16xf32, #tpu.memory_space<vmem>>, vector<1x1x8x16xf32>
    %484 = vector.shape_cast %483 : vector<1x1x8x16xf32> to vector<8x16xf32>
    %485 = vector.shape_cast %482 : vector<8x16xf32> to vector<1x1x8x16xf32>
    tpu.vector_store %arg5[%c2_360, %c0_361, %c16_362, %c0_363], %485 {strides = array<i32>} : memref<4x1x37x16xf32, #tpu.memory_space<vmem>>, vector<1x1x8x16xf32>,
    %486 = vector.shape_cast %472 : vector<8x1xf32> to vector<8x1xf32>
    %487 = vector.broadcast %486 : vector<8x1xf32> to vector<8x16xf32>
    %c2_364 = arith.constant 2 : index
    %c0_365 = arith.constant 0 : index
    %c24_366 = arith.constant 24 : index
    %c0_367 = arith.constant 0 : index
    %488 = vector.load %arg5[%c2_364, %c0_365, %c24_366, %c0_367] : memref<4x1x37x16xf32, #tpu.memory_space<vmem>>, vector<1x1x8x16xf32>
    %489 = vector.shape_cast %488 : vector<1x1x8x16xf32> to vector<8x16xf32>
    %490 = vector.shape_cast %487 : vector<8x16xf32> to vector<1x1x8x16xf32>
    tpu.vector_store %arg5[%c2_364, %c0_365, %c24_366, %c0_367], %490 {strides = array<i32>} : memref<4x1x37x16xf32, #tpu.memory_space<vmem>>, vector<1x1x8x16xf32>,
    %491 = vector.extract_strided_slice %387 {offsets = [0, 0], sizes = [16, 16], strides = [1, 1]} : vector<32x16xf32> to vector<16x16xf32>
    %492 = arith.subf %394, %391 : vector<16x16xf32>
    %cst_368 = arith.constant 0.333333343 : f32
    %493 = vector.broadcast %cst_368 : f32 to vector<16x16xf32>
    %494 = arith.mulf %492, %493 : vector<16x16xf32>
    %495 = vector.extract_strided_slice %491 {offsets = [8, 0], sizes = [8, 16], strides = [1, 1]} : vector<16x16xf32> to vector<8x16xf32>
    %cst_369 = arith.constant dense<0.000000e+00> : vector<8xf32>
    %496 = vector.multi_reduction <add>, %495, %cst_369 [1] : vector<8x16xf32> to vector<8xf32>
    %497 = vector.shape_cast %496 : vector<8xf32> to vector<8x1xf32>
    %cst_370 = arith.constant 1.600000e+01 : f32
    %498 = vector.broadcast %cst_370 : f32 to vector<8x1xf32>
    %499 = arith.divf %497, %498 : vector<8x1xf32>
    %500 = vector.extract_strided_slice %494 {offsets = [8, 0], sizes = [8, 16], strides = [1, 1]} : vector<16x16xf32> to vector<8x16xf32>
    %cst_371 = arith.constant dense<0.000000e+00> : vector<8xf32>
    %501 = vector.multi_reduction <add>, %500, %cst_371 [1] : vector<8x16xf32> to vector<8xf32>
    %502 = vector.shape_cast %501 : vector<8xf32> to vector<8x1xf32>
    %cst_372 = arith.constant 1.600000e+01 : f32
    %503 = vector.broadcast %cst_372 : f32 to vector<8x1xf32>
    %504 = arith.divf %502, %503 : vector<8x1xf32>
    %505 = vector.extract_strided_slice %491 {offsets = [0, 0], sizes = [8, 16], strides = [1, 1]} : vector<16x16xf32> to vector<8x16xf32>
    %c3_373 = arith.constant 3 : index
    %c0_374 = arith.constant 0 : index
    %c0_375 = arith.constant 0 : index
    %c0_376 = arith.constant 0 : index
    %506 = vector.load %arg5[%c3_373, %c0_374, %c0_375, %c0_376] : memref<4x1x37x16xf32, #tpu.memory_space<vmem>>, vector<1x1x8x16xf32>
    %507 = vector.shape_cast %506 : vector<1x1x8x16xf32> to vector<8x16xf32>
    %508 = vector.shape_cast %505 : vector<8x16xf32> to vector<1x1x8x16xf32>
    tpu.vector_store %arg5[%c3_373, %c0_374, %c0_375, %c0_376], %508 {strides = array<i32>} : memref<4x1x37x16xf32, #tpu.memory_space<vmem>>, vector<1x1x8x16xf32>,
    %509 = vector.shape_cast %499 : vector<8x1xf32> to vector<8x1xf32>
    %510 = vector.broadcast %509 : vector<8x1xf32> to vector<8x16xf32>
    %c3_377 = arith.constant 3 : index
    %c0_378 = arith.constant 0 : index
    %c8_379 = arith.constant 8 : index
    %c0_380 = arith.constant 0 : index
    %511 = vector.load %arg5[%c3_377, %c0_378, %c8_379, %c0_380] : memref<4x1x37x16xf32, #tpu.memory_space<vmem>>, vector<1x1x8x16xf32>
    %512 = vector.shape_cast %511 : vector<1x1x8x16xf32> to vector<8x16xf32>
    %513 = vector.shape_cast %510 : vector<8x16xf32> to vector<1x1x8x16xf32>
    tpu.vector_store %arg5[%c3_377, %c0_378, %c8_379, %c0_380], %513 {strides = array<i32>} : memref<4x1x37x16xf32, #tpu.memory_space<vmem>>, vector<1x1x8x16xf32>,
    %514 = vector.extract_strided_slice %494 {offsets = [0, 0], sizes = [8, 16], strides = [1, 1]} : vector<16x16xf32> to vector<8x16xf32>
    %c3_381 = arith.constant 3 : index
    %c0_382 = arith.constant 0 : index
    %c16_383 = arith.constant 16 : index
    %c0_384 = arith.constant 0 : index
    %515 = vector.load %arg5[%c3_381, %c0_382, %c16_383, %c0_384] : memref<4x1x37x16xf32, #tpu.memory_space<vmem>>, vector<1x1x8x16xf32>
    %516 = vector.shape_cast %515 : vector<1x1x8x16xf32> to vector<8x16xf32>
    %517 = vector.shape_cast %514 : vector<8x16xf32> to vector<1x1x8x16xf32>
    tpu.vector_store %arg5[%c3_381, %c0_382, %c16_383, %c0_384], %517 {strides = array<i32>} : memref<4x1x37x16xf32, #tpu.memory_space<vmem>>, vector<1x1x8x16xf32>,
    %518 = vector.shape_cast %504 : vector<8x1xf32> to vector<8x1xf32>
    %519 = vector.broadcast %518 : vector<8x1xf32> to vector<8x16xf32>
    %c3_385 = arith.constant 3 : index
    %c0_386 = arith.constant 0 : index
    %c24_387 = arith.constant 24 : index
    %c0_388 = arith.constant 0 : index
    %520 = vector.load %arg5[%c3_385, %c0_386, %c24_387, %c0_388] : memref<4x1x37x16xf32, #tpu.memory_space<vmem>>, vector<1x1x8x16xf32>
    %521 = vector.shape_cast %520 : vector<1x1x8x16xf32> to vector<8x16xf32>
    %522 = vector.shape_cast %519 : vector<8x16xf32> to vector<1x1x8x16xf32>
    tpu.vector_store %arg5[%c3_385, %c0_386, %c24_387, %c0_388], %522 {strides = array<i32>} : memref<4x1x37x16xf32, #tpu.memory_space<vmem>>, vector<1x1x8x16xf32>,
    %c3_389 = arith.constant 3 : index
    %c0_390 = arith.constant 0 : index
    %c0_391 = arith.constant 0 : index
    %523 = vector.load %arg2[%c3_389, %c0_390, %c0_391] : memref<7x32x37xf32, #tpu.memory_space<vmem>>, vector<1x32x37xf32>
    %524 = vector.shape_cast %523 : vector<1x32x37xf32> to vector<32x37xf32>
    %c0_392 = arith.constant 0 : index
    %c0_393 = arith.constant 0 : index
    %c0_394 = arith.constant 0 : index
    %c0_395 = arith.constant 0 : index
    %525 = vector.load %arg5[%c0_392, %c0_393, %c0_394, %c0_395] : memref<4x1x37x16xf32, #tpu.memory_space<vmem>>, vector<1x1x37x16xf32>
    %526 = vector.shape_cast %525 : vector<1x1x37x16xf32> to vector<37x16xf32>
    %cst_396 = arith.constant dense<0.000000e+00> : vector<32x16xf32>
    %527 = tpu.matmul %524, %526, %cst_396 {dimension_numbers = #tpu.dot_dimension_numbers<[1], [0], [0], [1], [0, 0, 1, 1], [], []>} : vector<32x37xf32>, vector<37x16xf32>, vector<32x16xf32> -> vector<32x16xf32>
    %cst_397 = arith.constant 0.000000e+00 : f32
    %528 = vector.broadcast %cst_397 : f32 to vector<32x16xf32>
    %529 = arith.maximumf %527, %528 : vector<32x16xf32>
    %c1_398 = arith.constant 1 : index
    %c0_399 = arith.constant 0 : index
    %c0_400 = arith.constant 0 : index
    %c0_401 = arith.constant 0 : index
    %530 = vector.load %arg5[%c1_398, %c0_399, %c0_400, %c0_401] : memref<4x1x37x16xf32, #tpu.memory_space<vmem>>, vector<1x1x37x16xf32>
    %531 = vector.shape_cast %530 : vector<1x1x37x16xf32> to vector<37x16xf32>
    %cst_402 = arith.constant dense<0.000000e+00> : vector<32x16xf32>
    %532 = tpu.matmul %524, %531, %cst_402 {dimension_numbers = #tpu.dot_dimension_numbers<[1], [0], [0], [1], [0, 0, 1, 1], [], []>} : vector<32x37xf32>, vector<37x16xf32>, vector<32x16xf32> -> vector<32x16xf32>
    %cst_403 = arith.constant 0.000000e+00 : f32
    %533 = vector.broadcast %cst_403 : f32 to vector<32x16xf32>
    %534 = arith.maximumf %532, %533 : vector<32x16xf32>
    %c2_404 = arith.constant 2 : index
    %c0_405 = arith.constant 0 : index
    %c0_406 = arith.constant 0 : index
    %c0_407 = arith.constant 0 : index
    %535 = vector.load %arg5[%c2_404, %c0_405, %c0_406, %c0_407] : memref<4x1x37x16xf32, #tpu.memory_space<vmem>>, vector<1x1x37x16xf32>
    %536 = vector.shape_cast %535 : vector<1x1x37x16xf32> to vector<37x16xf32>
    %cst_408 = arith.constant dense<0.000000e+00> : vector<32x16xf32>
    %537 = tpu.matmul %524, %536, %cst_408 {dimension_numbers = #tpu.dot_dimension_numbers<[1], [0], [0], [1], [0, 0, 1, 1], [], []>} : vector<32x37xf32>, vector<37x16xf32>, vector<32x16xf32> -> vector<32x16xf32>
    %cst_409 = arith.constant 0.000000e+00 : f32
    %538 = vector.broadcast %cst_409 : f32 to vector<32x16xf32>
    %539 = arith.maximumf %537, %538 : vector<32x16xf32>
    %c3_410 = arith.constant 3 : index
    %c0_411 = arith.constant 0 : index
    %c0_412 = arith.constant 0 : index
    %c0_413 = arith.constant 0 : index
    %540 = vector.load %arg5[%c3_410, %c0_411, %c0_412, %c0_413] : memref<4x1x37x16xf32, #tpu.memory_space<vmem>>, vector<1x1x37x16xf32>
    %541 = vector.shape_cast %540 : vector<1x1x37x16xf32> to vector<37x16xf32>
    %cst_414 = arith.constant dense<0.000000e+00> : vector<32x16xf32>
    %542 = tpu.matmul %524, %541, %cst_414 {dimension_numbers = #tpu.dot_dimension_numbers<[1], [0], [0], [1], [0, 0, 1, 1], [], []>} : vector<32x37xf32>, vector<37x16xf32>, vector<32x16xf32> -> vector<32x16xf32>
    %cst_415 = arith.constant 0.000000e+00 : f32
    %543 = vector.broadcast %cst_415 : f32 to vector<32x16xf32>
    %544 = arith.maximumf %542, %543 : vector<32x16xf32>
    %545 = vector.extract_strided_slice %529 {offsets = [16, 0], sizes = [16, 16], strides = [1, 1]} : vector<32x16xf32> to vector<16x16xf32>
    %546 = vector.extract_strided_slice %534 {offsets = [16, 0], sizes = [16, 16], strides = [1, 1]} : vector<32x16xf32> to vector<16x16xf32>
    %547 = vector.extract_strided_slice %539 {offsets = [16, 0], sizes = [16, 16], strides = [1, 1]} : vector<32x16xf32> to vector<16x16xf32>
    %548 = vector.extract_strided_slice %544 {offsets = [16, 0], sizes = [16, 16], strides = [1, 1]} : vector<32x16xf32> to vector<16x16xf32>
    %549 = arith.addf %545, %546 : vector<16x16xf32>
    %550 = arith.addf %549, %547 : vector<16x16xf32>
    %551 = arith.addf %550, %548 : vector<16x16xf32>
    %552 = vector.extract_strided_slice %529 {offsets = [0, 0], sizes = [16, 16], strides = [1, 1]} : vector<32x16xf32> to vector<16x16xf32>
    %553 = arith.subf %551, %545 : vector<16x16xf32>
    %cst_416 = arith.constant 0.333333343 : f32
    %554 = vector.broadcast %cst_416 : f32 to vector<16x16xf32>
    %555 = arith.mulf %553, %554 : vector<16x16xf32>
    %556 = vector.extract_strided_slice %552 {offsets = [8, 0], sizes = [8, 16], strides = [1, 1]} : vector<16x16xf32> to vector<8x16xf32>
    %cst_417 = arith.constant dense<0.000000e+00> : vector<8xf32>
    %557 = vector.multi_reduction <add>, %556, %cst_417 [1] : vector<8x16xf32> to vector<8xf32>
    %558 = vector.shape_cast %557 : vector<8xf32> to vector<8x1xf32>
    %cst_418 = arith.constant 1.600000e+01 : f32
    %559 = vector.broadcast %cst_418 : f32 to vector<8x1xf32>
    %560 = arith.divf %558, %559 : vector<8x1xf32>
    %561 = vector.extract_strided_slice %555 {offsets = [8, 0], sizes = [8, 16], strides = [1, 1]} : vector<16x16xf32> to vector<8x16xf32>
    %cst_419 = arith.constant dense<0.000000e+00> : vector<8xf32>
    %562 = vector.multi_reduction <add>, %561, %cst_419 [1] : vector<8x16xf32> to vector<8xf32>
    %563 = vector.shape_cast %562 : vector<8xf32> to vector<8x1xf32>
    %cst_420 = arith.constant 1.600000e+01 : f32
    %564 = vector.broadcast %cst_420 : f32 to vector<8x1xf32>
    %565 = arith.divf %563, %564 : vector<8x1xf32>
    %566 = vector.extract_strided_slice %552 {offsets = [0, 0], sizes = [8, 16], strides = [1, 1]} : vector<16x16xf32> to vector<8x16xf32>
    %c0_421 = arith.constant 0 : index
    %c0_422 = arith.constant 0 : index
    %c0_423 = arith.constant 0 : index
    %c0_424 = arith.constant 0 : index
    %567 = vector.load %arg5[%c0_421, %c0_422, %c0_423, %c0_424] : memref<4x1x37x16xf32, #tpu.memory_space<vmem>>, vector<1x1x8x16xf32>
    %568 = vector.shape_cast %567 : vector<1x1x8x16xf32> to vector<8x16xf32>
    %569 = vector.shape_cast %566 : vector<8x16xf32> to vector<1x1x8x16xf32>
    tpu.vector_store %arg5[%c0_421, %c0_422, %c0_423, %c0_424], %569 {strides = array<i32>} : memref<4x1x37x16xf32, #tpu.memory_space<vmem>>, vector<1x1x8x16xf32>,
    %570 = vector.shape_cast %560 : vector<8x1xf32> to vector<8x1xf32>
    %571 = vector.broadcast %570 : vector<8x1xf32> to vector<8x16xf32>
    %c0_425 = arith.constant 0 : index
    %c0_426 = arith.constant 0 : index
    %c8_427 = arith.constant 8 : index
    %c0_428 = arith.constant 0 : index
    %572 = vector.load %arg5[%c0_425, %c0_426, %c8_427, %c0_428] : memref<4x1x37x16xf32, #tpu.memory_space<vmem>>, vector<1x1x8x16xf32>
    %573 = vector.shape_cast %572 : vector<1x1x8x16xf32> to vector<8x16xf32>
    %574 = vector.shape_cast %571 : vector<8x16xf32> to vector<1x1x8x16xf32>
    tpu.vector_store %arg5[%c0_425, %c0_426, %c8_427, %c0_428], %574 {strides = array<i32>} : memref<4x1x37x16xf32, #tpu.memory_space<vmem>>, vector<1x1x8x16xf32>,
    %575 = vector.extract_strided_slice %555 {offsets = [0, 0], sizes = [8, 16], strides = [1, 1]} : vector<16x16xf32> to vector<8x16xf32>
    %c0_429 = arith.constant 0 : index
    %c0_430 = arith.constant 0 : index
    %c16_431 = arith.constant 16 : index
    %c0_432 = arith.constant 0 : index
    %576 = vector.load %arg5[%c0_429, %c0_430, %c16_431, %c0_432] : memref<4x1x37x16xf32, #tpu.memory_space<vmem>>, vector<1x1x8x16xf32>
    %577 = vector.shape_cast %576 : vector<1x1x8x16xf32> to vector<8x16xf32>
    %578 = vector.shape_cast %575 : vector<8x16xf32> to vector<1x1x8x16xf32>
    tpu.vector_store %arg5[%c0_429, %c0_430, %c16_431, %c0_432], %578 {strides = array<i32>} : memref<4x1x37x16xf32, #tpu.memory_space<vmem>>, vector<1x1x8x16xf32>,
    %579 = vector.shape_cast %565 : vector<8x1xf32> to vector<8x1xf32>
    %580 = vector.broadcast %579 : vector<8x1xf32> to vector<8x16xf32>
    %c0_433 = arith.constant 0 : index
    %c0_434 = arith.constant 0 : index
    %c24_435 = arith.constant 24 : index
    %c0_436 = arith.constant 0 : index
    %581 = vector.load %arg5[%c0_433, %c0_434, %c24_435, %c0_436] : memref<4x1x37x16xf32, #tpu.memory_space<vmem>>, vector<1x1x8x16xf32>
    %582 = vector.shape_cast %581 : vector<1x1x8x16xf32> to vector<8x16xf32>
    %583 = vector.shape_cast %580 : vector<8x16xf32> to vector<1x1x8x16xf32>
    tpu.vector_store %arg5[%c0_433, %c0_434, %c24_435, %c0_436], %583 {strides = array<i32>} : memref<4x1x37x16xf32, #tpu.memory_space<vmem>>, vector<1x1x8x16xf32>,
    %584 = vector.extract_strided_slice %534 {offsets = [0, 0], sizes = [16, 16], strides = [1, 1]} : vector<32x16xf32> to vector<16x16xf32>
    %585 = arith.subf %551, %546 : vector<16x16xf32>
    %cst_437 = arith.constant 0.333333343 : f32
    %586 = vector.broadcast %cst_437 : f32 to vector<16x16xf32>
    %587 = arith.mulf %585, %586 : vector<16x16xf32>
    %588 = vector.extract_strided_slice %584 {offsets = [8, 0], sizes = [8, 16], strides = [1, 1]} : vector<16x16xf32> to vector<8x16xf32>
    %cst_438 = arith.constant dense<0.000000e+00> : vector<8xf32>
    %589 = vector.multi_reduction <add>, %588, %cst_438 [1] : vector<8x16xf32> to vector<8xf32>
    %590 = vector.shape_cast %589 : vector<8xf32> to vector<8x1xf32>
    %cst_439 = arith.constant 1.600000e+01 : f32
    %591 = vector.broadcast %cst_439 : f32 to vector<8x1xf32>
    %592 = arith.divf %590, %591 : vector<8x1xf32>
    %593 = vector.extract_strided_slice %587 {offsets = [8, 0], sizes = [8, 16], strides = [1, 1]} : vector<16x16xf32> to vector<8x16xf32>
    %cst_440 = arith.constant dense<0.000000e+00> : vector<8xf32>
    %594 = vector.multi_reduction <add>, %593, %cst_440 [1] : vector<8x16xf32> to vector<8xf32>
    %595 = vector.shape_cast %594 : vector<8xf32> to vector<8x1xf32>
    %cst_441 = arith.constant 1.600000e+01 : f32
    %596 = vector.broadcast %cst_441 : f32 to vector<8x1xf32>
    %597 = arith.divf %595, %596 : vector<8x1xf32>
    %598 = vector.extract_strided_slice %584 {offsets = [0, 0], sizes = [8, 16], strides = [1, 1]} : vector<16x16xf32> to vector<8x16xf32>
    %c1_442 = arith.constant 1 : index
    %c0_443 = arith.constant 0 : index
    %c0_444 = arith.constant 0 : index
    %c0_445 = arith.constant 0 : index
    %599 = vector.load %arg5[%c1_442, %c0_443, %c0_444, %c0_445] : memref<4x1x37x16xf32, #tpu.memory_space<vmem>>, vector<1x1x8x16xf32>
    %600 = vector.shape_cast %599 : vector<1x1x8x16xf32> to vector<8x16xf32>
    %601 = vector.shape_cast %598 : vector<8x16xf32> to vector<1x1x8x16xf32>
    tpu.vector_store %arg5[%c1_442, %c0_443, %c0_444, %c0_445], %601 {strides = array<i32>} : memref<4x1x37x16xf32, #tpu.memory_space<vmem>>, vector<1x1x8x16xf32>,
    %602 = vector.shape_cast %592 : vector<8x1xf32> to vector<8x1xf32>
    %603 = vector.broadcast %602 : vector<8x1xf32> to vector<8x16xf32>
    %c1_446 = arith.constant 1 : index
    %c0_447 = arith.constant 0 : index
    %c8_448 = arith.constant 8 : index
    %c0_449 = arith.constant 0 : index
    %604 = vector.load %arg5[%c1_446, %c0_447, %c8_448, %c0_449] : memref<4x1x37x16xf32, #tpu.memory_space<vmem>>, vector<1x1x8x16xf32>
    %605 = vector.shape_cast %604 : vector<1x1x8x16xf32> to vector<8x16xf32>
    %606 = vector.shape_cast %603 : vector<8x16xf32> to vector<1x1x8x16xf32>
    tpu.vector_store %arg5[%c1_446, %c0_447, %c8_448, %c0_449], %606 {strides = array<i32>} : memref<4x1x37x16xf32, #tpu.memory_space<vmem>>, vector<1x1x8x16xf32>,
    %607 = vector.extract_strided_slice %587 {offsets = [0, 0], sizes = [8, 16], strides = [1, 1]} : vector<16x16xf32> to vector<8x16xf32>
    %c1_450 = arith.constant 1 : index
    %c0_451 = arith.constant 0 : index
    %c16_452 = arith.constant 16 : index
    %c0_453 = arith.constant 0 : index
    %608 = vector.load %arg5[%c1_450, %c0_451, %c16_452, %c0_453] : memref<4x1x37x16xf32, #tpu.memory_space<vmem>>, vector<1x1x8x16xf32>
    %609 = vector.shape_cast %608 : vector<1x1x8x16xf32> to vector<8x16xf32>
    %610 = vector.shape_cast %607 : vector<8x16xf32> to vector<1x1x8x16xf32>
    tpu.vector_store %arg5[%c1_450, %c0_451, %c16_452, %c0_453], %610 {strides = array<i32>} : memref<4x1x37x16xf32, #tpu.memory_space<vmem>>, vector<1x1x8x16xf32>,
    %611 = vector.shape_cast %597 : vector<8x1xf32> to vector<8x1xf32>
    %612 = vector.broadcast %611 : vector<8x1xf32> to vector<8x16xf32>
    %c1_454 = arith.constant 1 : index
    %c0_455 = arith.constant 0 : index
    %c24_456 = arith.constant 24 : index
    %c0_457 = arith.constant 0 : index
    %613 = vector.load %arg5[%c1_454, %c0_455, %c24_456, %c0_457] : memref<4x1x37x16xf32, #tpu.memory_space<vmem>>, vector<1x1x8x16xf32>
    %614 = vector.shape_cast %613 : vector<1x1x8x16xf32> to vector<8x16xf32>
    %615 = vector.shape_cast %612 : vector<8x16xf32> to vector<1x1x8x16xf32>
    tpu.vector_store %arg5[%c1_454, %c0_455, %c24_456, %c0_457], %615 {strides = array<i32>} : memref<4x1x37x16xf32, #tpu.memory_space<vmem>>, vector<1x1x8x16xf32>,
    %616 = vector.extract_strided_slice %539 {offsets = [0, 0], sizes = [16, 16], strides = [1, 1]} : vector<32x16xf32> to vector<16x16xf32>
    %617 = arith.subf %551, %547 : vector<16x16xf32>
    %cst_458 = arith.constant 0.333333343 : f32
    %618 = vector.broadcast %cst_458 : f32 to vector<16x16xf32>
    %619 = arith.mulf %617, %618 : vector<16x16xf32>
    %620 = vector.extract_strided_slice %616 {offsets = [8, 0], sizes = [8, 16], strides = [1, 1]} : vector<16x16xf32> to vector<8x16xf32>
    %cst_459 = arith.constant dense<0.000000e+00> : vector<8xf32>
    %621 = vector.multi_reduction <add>, %620, %cst_459 [1] : vector<8x16xf32> to vector<8xf32>
    %622 = vector.shape_cast %621 : vector<8xf32> to vector<8x1xf32>
    %cst_460 = arith.constant 1.600000e+01 : f32
    %623 = vector.broadcast %cst_460 : f32 to vector<8x1xf32>
    %624 = arith.divf %622, %623 : vector<8x1xf32>
    %625 = vector.extract_strided_slice %619 {offsets = [8, 0], sizes = [8, 16], strides = [1, 1]} : vector<16x16xf32> to vector<8x16xf32>
    %cst_461 = arith.constant dense<0.000000e+00> : vector<8xf32>
    %626 = vector.multi_reduction <add>, %625, %cst_461 [1] : vector<8x16xf32> to vector<8xf32>
    %627 = vector.shape_cast %626 : vector<8xf32> to vector<8x1xf32>
    %cst_462 = arith.constant 1.600000e+01 : f32
    %628 = vector.broadcast %cst_462 : f32 to vector<8x1xf32>
    %629 = arith.divf %627, %628 : vector<8x1xf32>
    %630 = vector.extract_strided_slice %616 {offsets = [0, 0], sizes = [8, 16], strides = [1, 1]} : vector<16x16xf32> to vector<8x16xf32>
    %c2_463 = arith.constant 2 : index
    %c0_464 = arith.constant 0 : index
    %c0_465 = arith.constant 0 : index
    %c0_466 = arith.constant 0 : index
    %631 = vector.load %arg5[%c2_463, %c0_464, %c0_465, %c0_466] : memref<4x1x37x16xf32, #tpu.memory_space<vmem>>, vector<1x1x8x16xf32>
    %632 = vector.shape_cast %631 : vector<1x1x8x16xf32> to vector<8x16xf32>
    %633 = vector.shape_cast %630 : vector<8x16xf32> to vector<1x1x8x16xf32>
    tpu.vector_store %arg5[%c2_463, %c0_464, %c0_465, %c0_466], %633 {strides = array<i32>} : memref<4x1x37x16xf32, #tpu.memory_space<vmem>>, vector<1x1x8x16xf32>,
    %634 = vector.shape_cast %624 : vector<8x1xf32> to vector<8x1xf32>
    %635 = vector.broadcast %634 : vector<8x1xf32> to vector<8x16xf32>
    %c2_467 = arith.constant 2 : index
    %c0_468 = arith.constant 0 : index
    %c8_469 = arith.constant 8 : index
    %c0_470 = arith.constant 0 : index
    %636 = vector.load %arg5[%c2_467, %c0_468, %c8_469, %c0_470] : memref<4x1x37x16xf32, #tpu.memory_space<vmem>>, vector<1x1x8x16xf32>
    %637 = vector.shape_cast %636 : vector<1x1x8x16xf32> to vector<8x16xf32>
    %638 = vector.shape_cast %635 : vector<8x16xf32> to vector<1x1x8x16xf32>
    tpu.vector_store %arg5[%c2_467, %c0_468, %c8_469, %c0_470], %638 {strides = array<i32>} : memref<4x1x37x16xf32, #tpu.memory_space<vmem>>, vector<1x1x8x16xf32>,
    %639 = vector.extract_strided_slice %619 {offsets = [0, 0], sizes = [8, 16], strides = [1, 1]} : vector<16x16xf32> to vector<8x16xf32>
    %c2_471 = arith.constant 2 : index
    %c0_472 = arith.constant 0 : index
    %c16_473 = arith.constant 16 : index
    %c0_474 = arith.constant 0 : index
    %640 = vector.load %arg5[%c2_471, %c0_472, %c16_473, %c0_474] : memref<4x1x37x16xf32, #tpu.memory_space<vmem>>, vector<1x1x8x16xf32>
    %641 = vector.shape_cast %640 : vector<1x1x8x16xf32> to vector<8x16xf32>
    %642 = vector.shape_cast %639 : vector<8x16xf32> to vector<1x1x8x16xf32>
    tpu.vector_store %arg5[%c2_471, %c0_472, %c16_473, %c0_474], %642 {strides = array<i32>} : memref<4x1x37x16xf32, #tpu.memory_space<vmem>>, vector<1x1x8x16xf32>,
    %643 = vector.shape_cast %629 : vector<8x1xf32> to vector<8x1xf32>
    %644 = vector.broadcast %643 : vector<8x1xf32> to vector<8x16xf32>
    %c2_475 = arith.constant 2 : index
    %c0_476 = arith.constant 0 : index
    %c24_477 = arith.constant 24 : index
    %c0_478 = arith.constant 0 : index
    %645 = vector.load %arg5[%c2_475, %c0_476, %c24_477, %c0_478] : memref<4x1x37x16xf32, #tpu.memory_space<vmem>>, vector<1x1x8x16xf32>
    %646 = vector.shape_cast %645 : vector<1x1x8x16xf32> to vector<8x16xf32>
    %647 = vector.shape_cast %644 : vector<8x16xf32> to vector<1x1x8x16xf32>
    tpu.vector_store %arg5[%c2_475, %c0_476, %c24_477, %c0_478], %647 {strides = array<i32>} : memref<4x1x37x16xf32, #tpu.memory_space<vmem>>, vector<1x1x8x16xf32>,
    %648 = vector.extract_strided_slice %544 {offsets = [0, 0], sizes = [16, 16], strides = [1, 1]} : vector<32x16xf32> to vector<16x16xf32>
    %649 = arith.subf %551, %548 : vector<16x16xf32>
    %cst_479 = arith.constant 0.333333343 : f32
    %650 = vector.broadcast %cst_479 : f32 to vector<16x16xf32>
    %651 = arith.mulf %649, %650 : vector<16x16xf32>
    %652 = vector.extract_strided_slice %648 {offsets = [8, 0], sizes = [8, 16], strides = [1, 1]} : vector<16x16xf32> to vector<8x16xf32>
    %cst_480 = arith.constant dense<0.000000e+00> : vector<8xf32>
    %653 = vector.multi_reduction <add>, %652, %cst_480 [1] : vector<8x16xf32> to vector<8xf32>
    %654 = vector.shape_cast %653 : vector<8xf32> to vector<8x1xf32>
    %cst_481 = arith.constant 1.600000e+01 : f32
    %655 = vector.broadcast %cst_481 : f32 to vector<8x1xf32>
    %656 = arith.divf %654, %655 : vector<8x1xf32>
    %657 = vector.extract_strided_slice %651 {offsets = [8, 0], sizes = [8, 16], strides = [1, 1]} : vector<16x16xf32> to vector<8x16xf32>
    %cst_482 = arith.constant dense<0.000000e+00> : vector<8xf32>
    %658 = vector.multi_reduction <add>, %657, %cst_482 [1] : vector<8x16xf32> to vector<8xf32>
    %659 = vector.shape_cast %658 : vector<8xf32> to vector<8x1xf32>
    %cst_483 = arith.constant 1.600000e+01 : f32
    %660 = vector.broadcast %cst_483 : f32 to vector<8x1xf32>
    %661 = arith.divf %659, %660 : vector<8x1xf32>
    %662 = vector.extract_strided_slice %648 {offsets = [0, 0], sizes = [8, 16], strides = [1, 1]} : vector<16x16xf32> to vector<8x16xf32>
    %c3_484 = arith.constant 3 : index
    %c0_485 = arith.constant 0 : index
    %c0_486 = arith.constant 0 : index
    %c0_487 = arith.constant 0 : index
    %663 = vector.load %arg5[%c3_484, %c0_485, %c0_486, %c0_487] : memref<4x1x37x16xf32, #tpu.memory_space<vmem>>, vector<1x1x8x16xf32>
    %664 = vector.shape_cast %663 : vector<1x1x8x16xf32> to vector<8x16xf32>
    %665 = vector.shape_cast %662 : vector<8x16xf32> to vector<1x1x8x16xf32>
    tpu.vector_store %arg5[%c3_484, %c0_485, %c0_486, %c0_487], %665 {strides = array<i32>} : memref<4x1x37x16xf32, #tpu.memory_space<vmem>>, vector<1x1x8x16xf32>,
    %666 = vector.shape_cast %656 : vector<8x1xf32> to vector<8x1xf32>
    %667 = vector.broadcast %666 : vector<8x1xf32> to vector<8x16xf32>
    %c3_488 = arith.constant 3 : index
    %c0_489 = arith.constant 0 : index
    %c8_490 = arith.constant 8 : index
    %c0_491 = arith.constant 0 : index
    %668 = vector.load %arg5[%c3_488, %c0_489, %c8_490, %c0_491] : memref<4x1x37x16xf32, #tpu.memory_space<vmem>>, vector<1x1x8x16xf32>
    %669 = vector.shape_cast %668 : vector<1x1x8x16xf32> to vector<8x16xf32>
    %670 = vector.shape_cast %667 : vector<8x16xf32> to vector<1x1x8x16xf32>
    tpu.vector_store %arg5[%c3_488, %c0_489, %c8_490, %c0_491], %670 {strides = array<i32>} : memref<4x1x37x16xf32, #tpu.memory_space<vmem>>, vector<1x1x8x16xf32>,
    %671 = vector.extract_strided_slice %651 {offsets = [0, 0], sizes = [8, 16], strides = [1, 1]} : vector<16x16xf32> to vector<8x16xf32>
    %c3_492 = arith.constant 3 : index
    %c0_493 = arith.constant 0 : index
    %c16_494 = arith.constant 16 : index
    %c0_495 = arith.constant 0 : index
    %672 = vector.load %arg5[%c3_492, %c0_493, %c16_494, %c0_495] : memref<4x1x37x16xf32, #tpu.memory_space<vmem>>, vector<1x1x8x16xf32>
    %673 = vector.shape_cast %672 : vector<1x1x8x16xf32> to vector<8x16xf32>
    %674 = vector.shape_cast %671 : vector<8x16xf32> to vector<1x1x8x16xf32>
    tpu.vector_store %arg5[%c3_492, %c0_493, %c16_494, %c0_495], %674 {strides = array<i32>} : memref<4x1x37x16xf32, #tpu.memory_space<vmem>>, vector<1x1x8x16xf32>,
    %675 = vector.shape_cast %661 : vector<8x1xf32> to vector<8x1xf32>
    %676 = vector.broadcast %675 : vector<8x1xf32> to vector<8x16xf32>
    %c3_496 = arith.constant 3 : index
    %c0_497 = arith.constant 0 : index
    %c24_498 = arith.constant 24 : index
    %c0_499 = arith.constant 0 : index
    %677 = vector.load %arg5[%c3_496, %c0_497, %c24_498, %c0_499] : memref<4x1x37x16xf32, #tpu.memory_space<vmem>>, vector<1x1x8x16xf32>
    %678 = vector.shape_cast %677 : vector<1x1x8x16xf32> to vector<8x16xf32>
    %679 = vector.shape_cast %676 : vector<8x16xf32> to vector<1x1x8x16xf32>
    tpu.vector_store %arg5[%c3_496, %c0_497, %c24_498, %c0_499], %679 {strides = array<i32>} : memref<4x1x37x16xf32, #tpu.memory_space<vmem>>, vector<1x1x8x16xf32>,
    %c4_500 = arith.constant 4 : index
    %c0_501 = arith.constant 0 : index
    %c0_502 = arith.constant 0 : index
    %680 = vector.load %arg2[%c4_500, %c0_501, %c0_502] : memref<7x32x37xf32, #tpu.memory_space<vmem>>, vector<1x32x37xf32>
    %681 = vector.shape_cast %680 : vector<1x32x37xf32> to vector<32x37xf32>
    %c0_503 = arith.constant 0 : index
    %c0_504 = arith.constant 0 : index
    %c0_505 = arith.constant 0 : index
    %c0_506 = arith.constant 0 : index
    %682 = vector.load %arg5[%c0_503, %c0_504, %c0_505, %c0_506] : memref<4x1x37x16xf32, #tpu.memory_space<vmem>>, vector<1x1x37x16xf32>
    %683 = vector.shape_cast %682 : vector<1x1x37x16xf32> to vector<37x16xf32>
    %cst_507 = arith.constant dense<0.000000e+00> : vector<32x16xf32>
    %684 = tpu.matmul %681, %683, %cst_507 {dimension_numbers = #tpu.dot_dimension_numbers<[1], [0], [0], [1], [0, 0, 1, 1], [], []>} : vector<32x37xf32>, vector<37x16xf32>, vector<32x16xf32> -> vector<32x16xf32>
    %cst_508 = arith.constant 0.000000e+00 : f32
    %685 = vector.broadcast %cst_508 : f32 to vector<32x16xf32>
    %686 = arith.maximumf %684, %685 : vector<32x16xf32>
    %c1_509 = arith.constant 1 : index
    %c0_510 = arith.constant 0 : index
    %c0_511 = arith.constant 0 : index
    %c0_512 = arith.constant 0 : index
    %687 = vector.load %arg5[%c1_509, %c0_510, %c0_511, %c0_512] : memref<4x1x37x16xf32, #tpu.memory_space<vmem>>, vector<1x1x37x16xf32>
    %688 = vector.shape_cast %687 : vector<1x1x37x16xf32> to vector<37x16xf32>
    %cst_513 = arith.constant dense<0.000000e+00> : vector<32x16xf32>
    %689 = tpu.matmul %681, %688, %cst_513 {dimension_numbers = #tpu.dot_dimension_numbers<[1], [0], [0], [1], [0, 0, 1, 1], [], []>} : vector<32x37xf32>, vector<37x16xf32>, vector<32x16xf32> -> vector<32x16xf32>
    %cst_514 = arith.constant 0.000000e+00 : f32
    %690 = vector.broadcast %cst_514 : f32 to vector<32x16xf32>
    %691 = arith.maximumf %689, %690 : vector<32x16xf32>
    %c2_515 = arith.constant 2 : index
    %c0_516 = arith.constant 0 : index
    %c0_517 = arith.constant 0 : index
    %c0_518 = arith.constant 0 : index
    %692 = vector.load %arg5[%c2_515, %c0_516, %c0_517, %c0_518] : memref<4x1x37x16xf32, #tpu.memory_space<vmem>>, vector<1x1x37x16xf32>
    %693 = vector.shape_cast %692 : vector<1x1x37x16xf32> to vector<37x16xf32>
    %cst_519 = arith.constant dense<0.000000e+00> : vector<32x16xf32>
    %694 = tpu.matmul %681, %693, %cst_519 {dimension_numbers = #tpu.dot_dimension_numbers<[1], [0], [0], [1], [0, 0, 1, 1], [], []>} : vector<32x37xf32>, vector<37x16xf32>, vector<32x16xf32> -> vector<32x16xf32>
    %cst_520 = arith.constant 0.000000e+00 : f32
    %695 = vector.broadcast %cst_520 : f32 to vector<32x16xf32>
    %696 = arith.maximumf %694, %695 : vector<32x16xf32>
    %c3_521 = arith.constant 3 : index
    %c0_522 = arith.constant 0 : index
    %c0_523 = arith.constant 0 : index
    %c0_524 = arith.constant 0 : index
    %697 = vector.load %arg5[%c3_521, %c0_522, %c0_523, %c0_524] : memref<4x1x37x16xf32, #tpu.memory_space<vmem>>, vector<1x1x37x16xf32>
    %698 = vector.shape_cast %697 : vector<1x1x37x16xf32> to vector<37x16xf32>
    %cst_525 = arith.constant dense<0.000000e+00> : vector<32x16xf32>
    %699 = tpu.matmul %681, %698, %cst_525 {dimension_numbers = #tpu.dot_dimension_numbers<[1], [0], [0], [1], [0, 0, 1, 1], [], []>} : vector<32x37xf32>, vector<37x16xf32>, vector<32x16xf32> -> vector<32x16xf32>
    %cst_526 = arith.constant 0.000000e+00 : f32
    %700 = vector.broadcast %cst_526 : f32 to vector<32x16xf32>
    %701 = arith.maximumf %699, %700 : vector<32x16xf32>
    %702 = vector.extract_strided_slice %686 {offsets = [16, 0], sizes = [16, 16], strides = [1, 1]} : vector<32x16xf32> to vector<16x16xf32>
    %703 = vector.extract_strided_slice %691 {offsets = [16, 0], sizes = [16, 16], strides = [1, 1]} : vector<32x16xf32> to vector<16x16xf32>
    %704 = vector.extract_strided_slice %696 {offsets = [16, 0], sizes = [16, 16], strides = [1, 1]} : vector<32x16xf32> to vector<16x16xf32>
    %705 = vector.extract_strided_slice %701 {offsets = [16, 0], sizes = [16, 16], strides = [1, 1]} : vector<32x16xf32> to vector<16x16xf32>
    %706 = arith.addf %702, %703 : vector<16x16xf32>
    %707 = arith.addf %706, %704 : vector<16x16xf32>
    %708 = arith.addf %707, %705 : vector<16x16xf32>
    %709 = vector.extract_strided_slice %686 {offsets = [0, 0], sizes = [16, 16], strides = [1, 1]} : vector<32x16xf32> to vector<16x16xf32>
    %710 = arith.subf %708, %702 : vector<16x16xf32>
    %cst_527 = arith.constant 0.333333343 : f32
    %711 = vector.broadcast %cst_527 : f32 to vector<16x16xf32>
    %712 = arith.mulf %710, %711 : vector<16x16xf32>
    %713 = vector.extract_strided_slice %709 {offsets = [8, 0], sizes = [8, 16], strides = [1, 1]} : vector<16x16xf32> to vector<8x16xf32>
    %cst_528 = arith.constant dense<0.000000e+00> : vector<8xf32>
    %714 = vector.multi_reduction <add>, %713, %cst_528 [1] : vector<8x16xf32> to vector<8xf32>
    %715 = vector.shape_cast %714 : vector<8xf32> to vector<8x1xf32>
    %cst_529 = arith.constant 1.600000e+01 : f32
    %716 = vector.broadcast %cst_529 : f32 to vector<8x1xf32>
    %717 = arith.divf %715, %716 : vector<8x1xf32>
    %718 = vector.extract_strided_slice %712 {offsets = [8, 0], sizes = [8, 16], strides = [1, 1]} : vector<16x16xf32> to vector<8x16xf32>
    %cst_530 = arith.constant dense<0.000000e+00> : vector<8xf32>
    %719 = vector.multi_reduction <add>, %718, %cst_530 [1] : vector<8x16xf32> to vector<8xf32>
    %720 = vector.shape_cast %719 : vector<8xf32> to vector<8x1xf32>
    %cst_531 = arith.constant 1.600000e+01 : f32
    %721 = vector.broadcast %cst_531 : f32 to vector<8x1xf32>
    %722 = arith.divf %720, %721 : vector<8x1xf32>
    %723 = vector.extract_strided_slice %709 {offsets = [0, 0], sizes = [8, 16], strides = [1, 1]} : vector<16x16xf32> to vector<8x16xf32>
    %c0_532 = arith.constant 0 : index
    %c0_533 = arith.constant 0 : index
    %c0_534 = arith.constant 0 : index
    %c0_535 = arith.constant 0 : index
    %724 = vector.load %arg5[%c0_532, %c0_533, %c0_534, %c0_535] : memref<4x1x37x16xf32, #tpu.memory_space<vmem>>, vector<1x1x8x16xf32>
    %725 = vector.shape_cast %724 : vector<1x1x8x16xf32> to vector<8x16xf32>
    %726 = vector.shape_cast %723 : vector<8x16xf32> to vector<1x1x8x16xf32>
    tpu.vector_store %arg5[%c0_532, %c0_533, %c0_534, %c0_535], %726 {strides = array<i32>} : memref<4x1x37x16xf32, #tpu.memory_space<vmem>>, vector<1x1x8x16xf32>,
    %727 = vector.shape_cast %717 : vector<8x1xf32> to vector<8x1xf32>
    %728 = vector.broadcast %727 : vector<8x1xf32> to vector<8x16xf32>
    %c0_536 = arith.constant 0 : index
    %c0_537 = arith.constant 0 : index
    %c8_538 = arith.constant 8 : index
    %c0_539 = arith.constant 0 : index
    %729 = vector.load %arg5[%c0_536, %c0_537, %c8_538, %c0_539] : memref<4x1x37x16xf32, #tpu.memory_space<vmem>>, vector<1x1x8x16xf32>
    %730 = vector.shape_cast %729 : vector<1x1x8x16xf32> to vector<8x16xf32>
    %731 = vector.shape_cast %728 : vector<8x16xf32> to vector<1x1x8x16xf32>
    tpu.vector_store %arg5[%c0_536, %c0_537, %c8_538, %c0_539], %731 {strides = array<i32>} : memref<4x1x37x16xf32, #tpu.memory_space<vmem>>, vector<1x1x8x16xf32>,
    %732 = vector.extract_strided_slice %712 {offsets = [0, 0], sizes = [8, 16], strides = [1, 1]} : vector<16x16xf32> to vector<8x16xf32>
    %c0_540 = arith.constant 0 : index
    %c0_541 = arith.constant 0 : index
    %c16_542 = arith.constant 16 : index
    %c0_543 = arith.constant 0 : index
    %733 = vector.load %arg5[%c0_540, %c0_541, %c16_542, %c0_543] : memref<4x1x37x16xf32, #tpu.memory_space<vmem>>, vector<1x1x8x16xf32>
    %734 = vector.shape_cast %733 : vector<1x1x8x16xf32> to vector<8x16xf32>
    %735 = vector.shape_cast %732 : vector<8x16xf32> to vector<1x1x8x16xf32>
    tpu.vector_store %arg5[%c0_540, %c0_541, %c16_542, %c0_543], %735 {strides = array<i32>} : memref<4x1x37x16xf32, #tpu.memory_space<vmem>>, vector<1x1x8x16xf32>,
    %736 = vector.shape_cast %722 : vector<8x1xf32> to vector<8x1xf32>
    %737 = vector.broadcast %736 : vector<8x1xf32> to vector<8x16xf32>
    %c0_544 = arith.constant 0 : index
    %c0_545 = arith.constant 0 : index
    %c24_546 = arith.constant 24 : index
    %c0_547 = arith.constant 0 : index
    %738 = vector.load %arg5[%c0_544, %c0_545, %c24_546, %c0_547] : memref<4x1x37x16xf32, #tpu.memory_space<vmem>>, vector<1x1x8x16xf32>
    %739 = vector.shape_cast %738 : vector<1x1x8x16xf32> to vector<8x16xf32>
    %740 = vector.shape_cast %737 : vector<8x16xf32> to vector<1x1x8x16xf32>
    tpu.vector_store %arg5[%c0_544, %c0_545, %c24_546, %c0_547], %740 {strides = array<i32>} : memref<4x1x37x16xf32, #tpu.memory_space<vmem>>, vector<1x1x8x16xf32>,
    %741 = vector.extract_strided_slice %691 {offsets = [0, 0], sizes = [16, 16], strides = [1, 1]} : vector<32x16xf32> to vector<16x16xf32>
    %742 = arith.subf %708, %703 : vector<16x16xf32>
    %cst_548 = arith.constant 0.333333343 : f32
    %743 = vector.broadcast %cst_548 : f32 to vector<16x16xf32>
    %744 = arith.mulf %742, %743 : vector<16x16xf32>
    %745 = vector.extract_strided_slice %741 {offsets = [8, 0], sizes = [8, 16], strides = [1, 1]} : vector<16x16xf32> to vector<8x16xf32>
    %cst_549 = arith.constant dense<0.000000e+00> : vector<8xf32>
    %746 = vector.multi_reduction <add>, %745, %cst_549 [1] : vector<8x16xf32> to vector<8xf32>
    %747 = vector.shape_cast %746 : vector<8xf32> to vector<8x1xf32>
    %cst_550 = arith.constant 1.600000e+01 : f32
    %748 = vector.broadcast %cst_550 : f32 to vector<8x1xf32>
    %749 = arith.divf %747, %748 : vector<8x1xf32>
    %750 = vector.extract_strided_slice %744 {offsets = [8, 0], sizes = [8, 16], strides = [1, 1]} : vector<16x16xf32> to vector<8x16xf32>
    %cst_551 = arith.constant dense<0.000000e+00> : vector<8xf32>
    %751 = vector.multi_reduction <add>, %750, %cst_551 [1] : vector<8x16xf32> to vector<8xf32>
    %752 = vector.shape_cast %751 : vector<8xf32> to vector<8x1xf32>
    %cst_552 = arith.constant 1.600000e+01 : f32
    %753 = vector.broadcast %cst_552 : f32 to vector<8x1xf32>
    %754 = arith.divf %752, %753 : vector<8x1xf32>
    %755 = vector.extract_strided_slice %741 {offsets = [0, 0], sizes = [8, 16], strides = [1, 1]} : vector<16x16xf32> to vector<8x16xf32>
    %c1_553 = arith.constant 1 : index
    %c0_554 = arith.constant 0 : index
    %c0_555 = arith.constant 0 : index
    %c0_556 = arith.constant 0 : index
    %756 = vector.load %arg5[%c1_553, %c0_554, %c0_555, %c0_556] : memref<4x1x37x16xf32, #tpu.memory_space<vmem>>, vector<1x1x8x16xf32>
    %757 = vector.shape_cast %756 : vector<1x1x8x16xf32> to vector<8x16xf32>
    %758 = vector.shape_cast %755 : vector<8x16xf32> to vector<1x1x8x16xf32>
    tpu.vector_store %arg5[%c1_553, %c0_554, %c0_555, %c0_556], %758 {strides = array<i32>} : memref<4x1x37x16xf32, #tpu.memory_space<vmem>>, vector<1x1x8x16xf32>,
    %759 = vector.shape_cast %749 : vector<8x1xf32> to vector<8x1xf32>
    %760 = vector.broadcast %759 : vector<8x1xf32> to vector<8x16xf32>
    %c1_557 = arith.constant 1 : index
    %c0_558 = arith.constant 0 : index
    %c8_559 = arith.constant 8 : index
    %c0_560 = arith.constant 0 : index
    %761 = vector.load %arg5[%c1_557, %c0_558, %c8_559, %c0_560] : memref<4x1x37x16xf32, #tpu.memory_space<vmem>>, vector<1x1x8x16xf32>
    %762 = vector.shape_cast %761 : vector<1x1x8x16xf32> to vector<8x16xf32>
    %763 = vector.shape_cast %760 : vector<8x16xf32> to vector<1x1x8x16xf32>
    tpu.vector_store %arg5[%c1_557, %c0_558, %c8_559, %c0_560], %763 {strides = array<i32>} : memref<4x1x37x16xf32, #tpu.memory_space<vmem>>, vector<1x1x8x16xf32>,
    %764 = vector.extract_strided_slice %744 {offsets = [0, 0], sizes = [8, 16], strides = [1, 1]} : vector<16x16xf32> to vector<8x16xf32>
    %c1_561 = arith.constant 1 : index
    %c0_562 = arith.constant 0 : index
    %c16_563 = arith.constant 16 : index
    %c0_564 = arith.constant 0 : index
    %765 = vector.load %arg5[%c1_561, %c0_562, %c16_563, %c0_564] : memref<4x1x37x16xf32, #tpu.memory_space<vmem>>, vector<1x1x8x16xf32>
    %766 = vector.shape_cast %765 : vector<1x1x8x16xf32> to vector<8x16xf32>
    %767 = vector.shape_cast %764 : vector<8x16xf32> to vector<1x1x8x16xf32>
    tpu.vector_store %arg5[%c1_561, %c0_562, %c16_563, %c0_564], %767 {strides = array<i32>} : memref<4x1x37x16xf32, #tpu.memory_space<vmem>>, vector<1x1x8x16xf32>,
    %768 = vector.shape_cast %754 : vector<8x1xf32> to vector<8x1xf32>
    %769 = vector.broadcast %768 : vector<8x1xf32> to vector<8x16xf32>
    %c1_565 = arith.constant 1 : index
    %c0_566 = arith.constant 0 : index
    %c24_567 = arith.constant 24 : index
    %c0_568 = arith.constant 0 : index
    %770 = vector.load %arg5[%c1_565, %c0_566, %c24_567, %c0_568] : memref<4x1x37x16xf32, #tpu.memory_space<vmem>>, vector<1x1x8x16xf32>
    %771 = vector.shape_cast %770 : vector<1x1x8x16xf32> to vector<8x16xf32>
    %772 = vector.shape_cast %769 : vector<8x16xf32> to vector<1x1x8x16xf32>
    tpu.vector_store %arg5[%c1_565, %c0_566, %c24_567, %c0_568], %772 {strides = array<i32>} : memref<4x1x37x16xf32, #tpu.memory_space<vmem>>, vector<1x1x8x16xf32>,
    %773 = vector.extract_strided_slice %696 {offsets = [0, 0], sizes = [16, 16], strides = [1, 1]} : vector<32x16xf32> to vector<16x16xf32>
    %774 = arith.subf %708, %704 : vector<16x16xf32>
    %cst_569 = arith.constant 0.333333343 : f32
    %775 = vector.broadcast %cst_569 : f32 to vector<16x16xf32>
    %776 = arith.mulf %774, %775 : vector<16x16xf32>
    %777 = vector.extract_strided_slice %773 {offsets = [8, 0], sizes = [8, 16], strides = [1, 1]} : vector<16x16xf32> to vector<8x16xf32>
    %cst_570 = arith.constant dense<0.000000e+00> : vector<8xf32>
    %778 = vector.multi_reduction <add>, %777, %cst_570 [1] : vector<8x16xf32> to vector<8xf32>
    %779 = vector.shape_cast %778 : vector<8xf32> to vector<8x1xf32>
    %cst_571 = arith.constant 1.600000e+01 : f32
    %780 = vector.broadcast %cst_571 : f32 to vector<8x1xf32>
    %781 = arith.divf %779, %780 : vector<8x1xf32>
    %782 = vector.extract_strided_slice %776 {offsets = [8, 0], sizes = [8, 16], strides = [1, 1]} : vector<16x16xf32> to vector<8x16xf32>
    %cst_572 = arith.constant dense<0.000000e+00> : vector<8xf32>
    %783 = vector.multi_reduction <add>, %782, %cst_572 [1] : vector<8x16xf32> to vector<8xf32>
    %784 = vector.shape_cast %783 : vector<8xf32> to vector<8x1xf32>
    %cst_573 = arith.constant 1.600000e+01 : f32
    %785 = vector.broadcast %cst_573 : f32 to vector<8x1xf32>
    %786 = arith.divf %784, %785 : vector<8x1xf32>
    %787 = vector.extract_strided_slice %773 {offsets = [0, 0], sizes = [8, 16], strides = [1, 1]} : vector<16x16xf32> to vector<8x16xf32>
    %c2_574 = arith.constant 2 : index
    %c0_575 = arith.constant 0 : index
    %c0_576 = arith.constant 0 : index
    %c0_577 = arith.constant 0 : index
    %788 = vector.load %arg5[%c2_574, %c0_575, %c0_576, %c0_577] : memref<4x1x37x16xf32, #tpu.memory_space<vmem>>, vector<1x1x8x16xf32>
    %789 = vector.shape_cast %788 : vector<1x1x8x16xf32> to vector<8x16xf32>
    %790 = vector.shape_cast %787 : vector<8x16xf32> to vector<1x1x8x16xf32>
    tpu.vector_store %arg5[%c2_574, %c0_575, %c0_576, %c0_577], %790 {strides = array<i32>} : memref<4x1x37x16xf32, #tpu.memory_space<vmem>>, vector<1x1x8x16xf32>,
    %791 = vector.shape_cast %781 : vector<8x1xf32> to vector<8x1xf32>
    %792 = vector.broadcast %791 : vector<8x1xf32> to vector<8x16xf32>
    %c2_578 = arith.constant 2 : index
    %c0_579 = arith.constant 0 : index
    %c8_580 = arith.constant 8 : index
    %c0_581 = arith.constant 0 : index
    %793 = vector.load %arg5[%c2_578, %c0_579, %c8_580, %c0_581] : memref<4x1x37x16xf32, #tpu.memory_space<vmem>>, vector<1x1x8x16xf32>
    %794 = vector.shape_cast %793 : vector<1x1x8x16xf32> to vector<8x16xf32>
    %795 = vector.shape_cast %792 : vector<8x16xf32> to vector<1x1x8x16xf32>
    tpu.vector_store %arg5[%c2_578, %c0_579, %c8_580, %c0_581], %795 {strides = array<i32>} : memref<4x1x37x16xf32, #tpu.memory_space<vmem>>, vector<1x1x8x16xf32>,
    %796 = vector.extract_strided_slice %776 {offsets = [0, 0], sizes = [8, 16], strides = [1, 1]} : vector<16x16xf32> to vector<8x16xf32>
    %c2_582 = arith.constant 2 : index
    %c0_583 = arith.constant 0 : index
    %c16_584 = arith.constant 16 : index
    %c0_585 = arith.constant 0 : index
    %797 = vector.load %arg5[%c2_582, %c0_583, %c16_584, %c0_585] : memref<4x1x37x16xf32, #tpu.memory_space<vmem>>, vector<1x1x8x16xf32>
    %798 = vector.shape_cast %797 : vector<1x1x8x16xf32> to vector<8x16xf32>
    %799 = vector.shape_cast %796 : vector<8x16xf32> to vector<1x1x8x16xf32>
    tpu.vector_store %arg5[%c2_582, %c0_583, %c16_584, %c0_585], %799 {strides = array<i32>} : memref<4x1x37x16xf32, #tpu.memory_space<vmem>>, vector<1x1x8x16xf32>,
    %800 = vector.shape_cast %786 : vector<8x1xf32> to vector<8x1xf32>
    %801 = vector.broadcast %800 : vector<8x1xf32> to vector<8x16xf32>
    %c2_586 = arith.constant 2 : index
    %c0_587 = arith.constant 0 : index
    %c24_588 = arith.constant 24 : index
    %c0_589 = arith.constant 0 : index
    %802 = vector.load %arg5[%c2_586, %c0_587, %c24_588, %c0_589] : memref<4x1x37x16xf32, #tpu.memory_space<vmem>>, vector<1x1x8x16xf32>
    %803 = vector.shape_cast %802 : vector<1x1x8x16xf32> to vector<8x16xf32>
    %804 = vector.shape_cast %801 : vector<8x16xf32> to vector<1x1x8x16xf32>
    tpu.vector_store %arg5[%c2_586, %c0_587, %c24_588, %c0_589], %804 {strides = array<i32>} : memref<4x1x37x16xf32, #tpu.memory_space<vmem>>, vector<1x1x8x16xf32>,
    %805 = vector.extract_strided_slice %701 {offsets = [0, 0], sizes = [16, 16], strides = [1, 1]} : vector<32x16xf32> to vector<16x16xf32>
    %806 = arith.subf %708, %705 : vector<16x16xf32>
    %cst_590 = arith.constant 0.333333343 : f32
    %807 = vector.broadcast %cst_590 : f32 to vector<16x16xf32>
    %808 = arith.mulf %806, %807 : vector<16x16xf32>
    %809 = vector.extract_strided_slice %805 {offsets = [8, 0], sizes = [8, 16], strides = [1, 1]} : vector<16x16xf32> to vector<8x16xf32>
    %cst_591 = arith.constant dense<0.000000e+00> : vector<8xf32>
    %810 = vector.multi_reduction <add>, %809, %cst_591 [1] : vector<8x16xf32> to vector<8xf32>
    %811 = vector.shape_cast %810 : vector<8xf32> to vector<8x1xf32>
    %cst_592 = arith.constant 1.600000e+01 : f32
    %812 = vector.broadcast %cst_592 : f32 to vector<8x1xf32>
    %813 = arith.divf %811, %812 : vector<8x1xf32>
    %814 = vector.extract_strided_slice %808 {offsets = [8, 0], sizes = [8, 16], strides = [1, 1]} : vector<16x16xf32> to vector<8x16xf32>
    %cst_593 = arith.constant dense<0.000000e+00> : vector<8xf32>
    %815 = vector.multi_reduction <add>, %814, %cst_593 [1] : vector<8x16xf32> to vector<8xf32>
    %816 = vector.shape_cast %815 : vector<8xf32> to vector<8x1xf32>
    %cst_594 = arith.constant 1.600000e+01 : f32
    %817 = vector.broadcast %cst_594 : f32 to vector<8x1xf32>
    %818 = arith.divf %816, %817 : vector<8x1xf32>
    %819 = vector.extract_strided_slice %805 {offsets = [0, 0], sizes = [8, 16], strides = [1, 1]} : vector<16x16xf32> to vector<8x16xf32>
    %c3_595 = arith.constant 3 : index
    %c0_596 = arith.constant 0 : index
    %c0_597 = arith.constant 0 : index
    %c0_598 = arith.constant 0 : index
    %820 = vector.load %arg5[%c3_595, %c0_596, %c0_597, %c0_598] : memref<4x1x37x16xf32, #tpu.memory_space<vmem>>, vector<1x1x8x16xf32>
    %821 = vector.shape_cast %820 : vector<1x1x8x16xf32> to vector<8x16xf32>
    %822 = vector.shape_cast %819 : vector<8x16xf32> to vector<1x1x8x16xf32>
    tpu.vector_store %arg5[%c3_595, %c0_596, %c0_597, %c0_598], %822 {strides = array<i32>} : memref<4x1x37x16xf32, #tpu.memory_space<vmem>>, vector<1x1x8x16xf32>,
    %823 = vector.shape_cast %813 : vector<8x1xf32> to vector<8x1xf32>
    %824 = vector.broadcast %823 : vector<8x1xf32> to vector<8x16xf32>
    %c3_599 = arith.constant 3 : index
    %c0_600 = arith.constant 0 : index
    %c8_601 = arith.constant 8 : index
    %c0_602 = arith.constant 0 : index
    %825 = vector.load %arg5[%c3_599, %c0_600, %c8_601, %c0_602] : memref<4x1x37x16xf32, #tpu.memory_space<vmem>>, vector<1x1x8x16xf32>
    %826 = vector.shape_cast %825 : vector<1x1x8x16xf32> to vector<8x16xf32>
    %827 = vector.shape_cast %824 : vector<8x16xf32> to vector<1x1x8x16xf32>
    tpu.vector_store %arg5[%c3_599, %c0_600, %c8_601, %c0_602], %827 {strides = array<i32>} : memref<4x1x37x16xf32, #tpu.memory_space<vmem>>, vector<1x1x8x16xf32>,
    %828 = vector.extract_strided_slice %808 {offsets = [0, 0], sizes = [8, 16], strides = [1, 1]} : vector<16x16xf32> to vector<8x16xf32>
    %c3_603 = arith.constant 3 : index
    %c0_604 = arith.constant 0 : index
    %c16_605 = arith.constant 16 : index
    %c0_606 = arith.constant 0 : index
    %829 = vector.load %arg5[%c3_603, %c0_604, %c16_605, %c0_606] : memref<4x1x37x16xf32, #tpu.memory_space<vmem>>, vector<1x1x8x16xf32>
    %830 = vector.shape_cast %829 : vector<1x1x8x16xf32> to vector<8x16xf32>
    %831 = vector.shape_cast %828 : vector<8x16xf32> to vector<1x1x8x16xf32>
    tpu.vector_store %arg5[%c3_603, %c0_604, %c16_605, %c0_606], %831 {strides = array<i32>} : memref<4x1x37x16xf32, #tpu.memory_space<vmem>>, vector<1x1x8x16xf32>,
    %832 = vector.shape_cast %818 : vector<8x1xf32> to vector<8x1xf32>
    %833 = vector.broadcast %832 : vector<8x1xf32> to vector<8x16xf32>
    %c3_607 = arith.constant 3 : index
    %c0_608 = arith.constant 0 : index
    %c24_609 = arith.constant 24 : index
    %c0_610 = arith.constant 0 : index
    %834 = vector.load %arg5[%c3_607, %c0_608, %c24_609, %c0_610] : memref<4x1x37x16xf32, #tpu.memory_space<vmem>>, vector<1x1x8x16xf32>
    %835 = vector.shape_cast %834 : vector<1x1x8x16xf32> to vector<8x16xf32>
    %836 = vector.shape_cast %833 : vector<8x16xf32> to vector<1x1x8x16xf32>
    tpu.vector_store %arg5[%c3_607, %c0_608, %c24_609, %c0_610], %836 {strides = array<i32>} : memref<4x1x37x16xf32, #tpu.memory_space<vmem>>, vector<1x1x8x16xf32>,
    %c5 = arith.constant 5 : index
    %c0_611 = arith.constant 0 : index
    %c0_612 = arith.constant 0 : index
    %837 = vector.load %arg2[%c5, %c0_611, %c0_612] : memref<7x32x37xf32, #tpu.memory_space<vmem>>, vector<1x32x37xf32>
    %838 = vector.shape_cast %837 : vector<1x32x37xf32> to vector<32x37xf32>
    %c0_613 = arith.constant 0 : index
    %c0_614 = arith.constant 0 : index
    %c0_615 = arith.constant 0 : index
    %c0_616 = arith.constant 0 : index
    %839 = vector.load %arg5[%c0_613, %c0_614, %c0_615, %c0_616] : memref<4x1x37x16xf32, #tpu.memory_space<vmem>>, vector<1x1x37x16xf32>
    %840 = vector.shape_cast %839 : vector<1x1x37x16xf32> to vector<37x16xf32>
    %cst_617 = arith.constant dense<0.000000e+00> : vector<32x16xf32>
    %841 = tpu.matmul %838, %840, %cst_617 {dimension_numbers = #tpu.dot_dimension_numbers<[1], [0], [0], [1], [0, 0, 1, 1], [], []>} : vector<32x37xf32>, vector<37x16xf32>, vector<32x16xf32> -> vector<32x16xf32>
    %cst_618 = arith.constant 0.000000e+00 : f32
    %842 = vector.broadcast %cst_618 : f32 to vector<32x16xf32>
    %843 = arith.maximumf %841, %842 : vector<32x16xf32>
    %c1_619 = arith.constant 1 : index
    %c0_620 = arith.constant 0 : index
    %c0_621 = arith.constant 0 : index
    %c0_622 = arith.constant 0 : index
    %844 = vector.load %arg5[%c1_619, %c0_620, %c0_621, %c0_622] : memref<4x1x37x16xf32, #tpu.memory_space<vmem>>, vector<1x1x37x16xf32>
    %845 = vector.shape_cast %844 : vector<1x1x37x16xf32> to vector<37x16xf32>
    %cst_623 = arith.constant dense<0.000000e+00> : vector<32x16xf32>
    %846 = tpu.matmul %838, %845, %cst_623 {dimension_numbers = #tpu.dot_dimension_numbers<[1], [0], [0], [1], [0, 0, 1, 1], [], []>} : vector<32x37xf32>, vector<37x16xf32>, vector<32x16xf32> -> vector<32x16xf32>
    %cst_624 = arith.constant 0.000000e+00 : f32
    %847 = vector.broadcast %cst_624 : f32 to vector<32x16xf32>
    %848 = arith.maximumf %846, %847 : vector<32x16xf32>
    %c2_625 = arith.constant 2 : index
    %c0_626 = arith.constant 0 : index
    %c0_627 = arith.constant 0 : index
    %c0_628 = arith.constant 0 : index
    %849 = vector.load %arg5[%c2_625, %c0_626, %c0_627, %c0_628] : memref<4x1x37x16xf32, #tpu.memory_space<vmem>>, vector<1x1x37x16xf32>
    %850 = vector.shape_cast %849 : vector<1x1x37x16xf32> to vector<37x16xf32>
    %cst_629 = arith.constant dense<0.000000e+00> : vector<32x16xf32>
    %851 = tpu.matmul %838, %850, %cst_629 {dimension_numbers = #tpu.dot_dimension_numbers<[1], [0], [0], [1], [0, 0, 1, 1], [], []>} : vector<32x37xf32>, vector<37x16xf32>, vector<32x16xf32> -> vector<32x16xf32>
    %cst_630 = arith.constant 0.000000e+00 : f32
    %852 = vector.broadcast %cst_630 : f32 to vector<32x16xf32>
    %853 = arith.maximumf %851, %852 : vector<32x16xf32>
    %c3_631 = arith.constant 3 : index
    %c0_632 = arith.constant 0 : index
    %c0_633 = arith.constant 0 : index
    %c0_634 = arith.constant 0 : index
    %854 = vector.load %arg5[%c3_631, %c0_632, %c0_633, %c0_634] : memref<4x1x37x16xf32, #tpu.memory_space<vmem>>, vector<1x1x37x16xf32>
    %855 = vector.shape_cast %854 : vector<1x1x37x16xf32> to vector<37x16xf32>
    %cst_635 = arith.constant dense<0.000000e+00> : vector<32x16xf32>
    %856 = tpu.matmul %838, %855, %cst_635 {dimension_numbers = #tpu.dot_dimension_numbers<[1], [0], [0], [1], [0, 0, 1, 1], [], []>} : vector<32x37xf32>, vector<37x16xf32>, vector<32x16xf32> -> vector<32x16xf32>
    %cst_636 = arith.constant 0.000000e+00 : f32
    %857 = vector.broadcast %cst_636 : f32 to vector<32x16xf32>
    %858 = arith.maximumf %856, %857 : vector<32x16xf32>
    %859 = vector.extract_strided_slice %843 {offsets = [16, 0], sizes = [16, 16], strides = [1, 1]} : vector<32x16xf32> to vector<16x16xf32>
    %860 = vector.extract_strided_slice %848 {offsets = [16, 0], sizes = [16, 16], strides = [1, 1]} : vector<32x16xf32> to vector<16x16xf32>
    %861 = vector.extract_strided_slice %853 {offsets = [16, 0], sizes = [16, 16], strides = [1, 1]} : vector<32x16xf32> to vector<16x16xf32>
    %862 = vector.extract_strided_slice %858 {offsets = [16, 0], sizes = [16, 16], strides = [1, 1]} : vector<32x16xf32> to vector<16x16xf32>
    %863 = arith.addf %859, %860 : vector<16x16xf32>
    %864 = arith.addf %863, %861 : vector<16x16xf32>
    %865 = arith.addf %864, %862 : vector<16x16xf32>
    %866 = vector.extract_strided_slice %843 {offsets = [0, 0], sizes = [16, 16], strides = [1, 1]} : vector<32x16xf32> to vector<16x16xf32>
    %867 = arith.subf %865, %859 : vector<16x16xf32>
    %cst_637 = arith.constant 0.333333343 : f32
    %868 = vector.broadcast %cst_637 : f32 to vector<16x16xf32>
    %869 = arith.mulf %867, %868 : vector<16x16xf32>
    %870 = vector.extract_strided_slice %866 {offsets = [8, 0], sizes = [8, 16], strides = [1, 1]} : vector<16x16xf32> to vector<8x16xf32>
    %cst_638 = arith.constant dense<0.000000e+00> : vector<8xf32>
    %871 = vector.multi_reduction <add>, %870, %cst_638 [1] : vector<8x16xf32> to vector<8xf32>
    %872 = vector.shape_cast %871 : vector<8xf32> to vector<8x1xf32>
    %cst_639 = arith.constant 1.600000e+01 : f32
    %873 = vector.broadcast %cst_639 : f32 to vector<8x1xf32>
    %874 = arith.divf %872, %873 : vector<8x1xf32>
    %875 = vector.extract_strided_slice %869 {offsets = [8, 0], sizes = [8, 16], strides = [1, 1]} : vector<16x16xf32> to vector<8x16xf32>
    %cst_640 = arith.constant dense<0.000000e+00> : vector<8xf32>
    %876 = vector.multi_reduction <add>, %875, %cst_640 [1] : vector<8x16xf32> to vector<8xf32>
    %877 = vector.shape_cast %876 : vector<8xf32> to vector<8x1xf32>
    %cst_641 = arith.constant 1.600000e+01 : f32
    %878 = vector.broadcast %cst_641 : f32 to vector<8x1xf32>
    %879 = arith.divf %877, %878 : vector<8x1xf32>
    %880 = vector.extract_strided_slice %866 {offsets = [0, 0], sizes = [8, 16], strides = [1, 1]} : vector<16x16xf32> to vector<8x16xf32>
    %c0_642 = arith.constant 0 : index
    %c0_643 = arith.constant 0 : index
    %c0_644 = arith.constant 0 : index
    %c0_645 = arith.constant 0 : index
    %881 = vector.load %arg5[%c0_642, %c0_643, %c0_644, %c0_645] : memref<4x1x37x16xf32, #tpu.memory_space<vmem>>, vector<1x1x8x16xf32>
    %882 = vector.shape_cast %881 : vector<1x1x8x16xf32> to vector<8x16xf32>
    %883 = vector.shape_cast %880 : vector<8x16xf32> to vector<1x1x8x16xf32>
    tpu.vector_store %arg5[%c0_642, %c0_643, %c0_644, %c0_645], %883 {strides = array<i32>} : memref<4x1x37x16xf32, #tpu.memory_space<vmem>>, vector<1x1x8x16xf32>,
    %884 = vector.shape_cast %874 : vector<8x1xf32> to vector<8x1xf32>
    %885 = vector.broadcast %884 : vector<8x1xf32> to vector<8x16xf32>
    %c0_646 = arith.constant 0 : index
    %c0_647 = arith.constant 0 : index
    %c8_648 = arith.constant 8 : index
    %c0_649 = arith.constant 0 : index
    %886 = vector.load %arg5[%c0_646, %c0_647, %c8_648, %c0_649] : memref<4x1x37x16xf32, #tpu.memory_space<vmem>>, vector<1x1x8x16xf32>
    %887 = vector.shape_cast %886 : vector<1x1x8x16xf32> to vector<8x16xf32>
    %888 = vector.shape_cast %885 : vector<8x16xf32> to vector<1x1x8x16xf32>
    tpu.vector_store %arg5[%c0_646, %c0_647, %c8_648, %c0_649], %888 {strides = array<i32>} : memref<4x1x37x16xf32, #tpu.memory_space<vmem>>, vector<1x1x8x16xf32>,
    %889 = vector.extract_strided_slice %869 {offsets = [0, 0], sizes = [8, 16], strides = [1, 1]} : vector<16x16xf32> to vector<8x16xf32>
    %c0_650 = arith.constant 0 : index
    %c0_651 = arith.constant 0 : index
    %c16_652 = arith.constant 16 : index
    %c0_653 = arith.constant 0 : index
    %890 = vector.load %arg5[%c0_650, %c0_651, %c16_652, %c0_653] : memref<4x1x37x16xf32, #tpu.memory_space<vmem>>, vector<1x1x8x16xf32>
    %891 = vector.shape_cast %890 : vector<1x1x8x16xf32> to vector<8x16xf32>
    %892 = vector.shape_cast %889 : vector<8x16xf32> to vector<1x1x8x16xf32>
    tpu.vector_store %arg5[%c0_650, %c0_651, %c16_652, %c0_653], %892 {strides = array<i32>} : memref<4x1x37x16xf32, #tpu.memory_space<vmem>>, vector<1x1x8x16xf32>,
    %893 = vector.shape_cast %879 : vector<8x1xf32> to vector<8x1xf32>
    %894 = vector.broadcast %893 : vector<8x1xf32> to vector<8x16xf32>
    %c0_654 = arith.constant 0 : index
    %c0_655 = arith.constant 0 : index
    %c24_656 = arith.constant 24 : index
    %c0_657 = arith.constant 0 : index
    %895 = vector.load %arg5[%c0_654, %c0_655, %c24_656, %c0_657] : memref<4x1x37x16xf32, #tpu.memory_space<vmem>>, vector<1x1x8x16xf32>
    %896 = vector.shape_cast %895 : vector<1x1x8x16xf32> to vector<8x16xf32>
    %897 = vector.shape_cast %894 : vector<8x16xf32> to vector<1x1x8x16xf32>
    tpu.vector_store %arg5[%c0_654, %c0_655, %c24_656, %c0_657], %897 {strides = array<i32>} : memref<4x1x37x16xf32, #tpu.memory_space<vmem>>, vector<1x1x8x16xf32>,
    %898 = vector.extract_strided_slice %848 {offsets = [0, 0], sizes = [16, 16], strides = [1, 1]} : vector<32x16xf32> to vector<16x16xf32>
    %899 = arith.subf %865, %860 : vector<16x16xf32>
    %cst_658 = arith.constant 0.333333343 : f32
    %900 = vector.broadcast %cst_658 : f32 to vector<16x16xf32>
    %901 = arith.mulf %899, %900 : vector<16x16xf32>
    %902 = vector.extract_strided_slice %898 {offsets = [8, 0], sizes = [8, 16], strides = [1, 1]} : vector<16x16xf32> to vector<8x16xf32>
    %cst_659 = arith.constant dense<0.000000e+00> : vector<8xf32>
    %903 = vector.multi_reduction <add>, %902, %cst_659 [1] : vector<8x16xf32> to vector<8xf32>
    %904 = vector.shape_cast %903 : vector<8xf32> to vector<8x1xf32>
    %cst_660 = arith.constant 1.600000e+01 : f32
    %905 = vector.broadcast %cst_660 : f32 to vector<8x1xf32>
    %906 = arith.divf %904, %905 : vector<8x1xf32>
    %907 = vector.extract_strided_slice %901 {offsets = [8, 0], sizes = [8, 16], strides = [1, 1]} : vector<16x16xf32> to vector<8x16xf32>
    %cst_661 = arith.constant dense<0.000000e+00> : vector<8xf32>
    %908 = vector.multi_reduction <add>, %907, %cst_661 [1] : vector<8x16xf32> to vector<8xf32>
    %909 = vector.shape_cast %908 : vector<8xf32> to vector<8x1xf32>
    %cst_662 = arith.constant 1.600000e+01 : f32
    %910 = vector.broadcast %cst_662 : f32 to vector<8x1xf32>
    %911 = arith.divf %909, %910 : vector<8x1xf32>
    %912 = vector.extract_strided_slice %898 {offsets = [0, 0], sizes = [8, 16], strides = [1, 1]} : vector<16x16xf32> to vector<8x16xf32>
    %c1_663 = arith.constant 1 : index
    %c0_664 = arith.constant 0 : index
    %c0_665 = arith.constant 0 : index
    %c0_666 = arith.constant 0 : index
    %913 = vector.load %arg5[%c1_663, %c0_664, %c0_665, %c0_666] : memref<4x1x37x16xf32, #tpu.memory_space<vmem>>, vector<1x1x8x16xf32>
    %914 = vector.shape_cast %913 : vector<1x1x8x16xf32> to vector<8x16xf32>
    %915 = vector.shape_cast %912 : vector<8x16xf32> to vector<1x1x8x16xf32>
    tpu.vector_store %arg5[%c1_663, %c0_664, %c0_665, %c0_666], %915 {strides = array<i32>} : memref<4x1x37x16xf32, #tpu.memory_space<vmem>>, vector<1x1x8x16xf32>,
    %916 = vector.shape_cast %906 : vector<8x1xf32> to vector<8x1xf32>
    %917 = vector.broadcast %916 : vector<8x1xf32> to vector<8x16xf32>
    %c1_667 = arith.constant 1 : index
    %c0_668 = arith.constant 0 : index
    %c8_669 = arith.constant 8 : index
    %c0_670 = arith.constant 0 : index
    %918 = vector.load %arg5[%c1_667, %c0_668, %c8_669, %c0_670] : memref<4x1x37x16xf32, #tpu.memory_space<vmem>>, vector<1x1x8x16xf32>
    %919 = vector.shape_cast %918 : vector<1x1x8x16xf32> to vector<8x16xf32>
    %920 = vector.shape_cast %917 : vector<8x16xf32> to vector<1x1x8x16xf32>
    tpu.vector_store %arg5[%c1_667, %c0_668, %c8_669, %c0_670], %920 {strides = array<i32>} : memref<4x1x37x16xf32, #tpu.memory_space<vmem>>, vector<1x1x8x16xf32>,
    %921 = vector.extract_strided_slice %901 {offsets = [0, 0], sizes = [8, 16], strides = [1, 1]} : vector<16x16xf32> to vector<8x16xf32>
    %c1_671 = arith.constant 1 : index
    %c0_672 = arith.constant 0 : index
    %c16_673 = arith.constant 16 : index
    %c0_674 = arith.constant 0 : index
    %922 = vector.load %arg5[%c1_671, %c0_672, %c16_673, %c0_674] : memref<4x1x37x16xf32, #tpu.memory_space<vmem>>, vector<1x1x8x16xf32>
    %923 = vector.shape_cast %922 : vector<1x1x8x16xf32> to vector<8x16xf32>
    %924 = vector.shape_cast %921 : vector<8x16xf32> to vector<1x1x8x16xf32>
    tpu.vector_store %arg5[%c1_671, %c0_672, %c16_673, %c0_674], %924 {strides = array<i32>} : memref<4x1x37x16xf32, #tpu.memory_space<vmem>>, vector<1x1x8x16xf32>,
    %925 = vector.shape_cast %911 : vector<8x1xf32> to vector<8x1xf32>
    %926 = vector.broadcast %925 : vector<8x1xf32> to vector<8x16xf32>
    %c1_675 = arith.constant 1 : index
    %c0_676 = arith.constant 0 : index
    %c24_677 = arith.constant 24 : index
    %c0_678 = arith.constant 0 : index
    %927 = vector.load %arg5[%c1_675, %c0_676, %c24_677, %c0_678] : memref<4x1x37x16xf32, #tpu.memory_space<vmem>>, vector<1x1x8x16xf32>
    %928 = vector.shape_cast %927 : vector<1x1x8x16xf32> to vector<8x16xf32>
    %929 = vector.shape_cast %926 : vector<8x16xf32> to vector<1x1x8x16xf32>
    tpu.vector_store %arg5[%c1_675, %c0_676, %c24_677, %c0_678], %929 {strides = array<i32>} : memref<4x1x37x16xf32, #tpu.memory_space<vmem>>, vector<1x1x8x16xf32>,
    %930 = vector.extract_strided_slice %853 {offsets = [0, 0], sizes = [16, 16], strides = [1, 1]} : vector<32x16xf32> to vector<16x16xf32>
    %931 = arith.subf %865, %861 : vector<16x16xf32>
    %cst_679 = arith.constant 0.333333343 : f32
    %932 = vector.broadcast %cst_679 : f32 to vector<16x16xf32>
    %933 = arith.mulf %931, %932 : vector<16x16xf32>
    %934 = vector.extract_strided_slice %930 {offsets = [8, 0], sizes = [8, 16], strides = [1, 1]} : vector<16x16xf32> to vector<8x16xf32>
    %cst_680 = arith.constant dense<0.000000e+00> : vector<8xf32>
    %935 = vector.multi_reduction <add>, %934, %cst_680 [1] : vector<8x16xf32> to vector<8xf32>
    %936 = vector.shape_cast %935 : vector<8xf32> to vector<8x1xf32>
    %cst_681 = arith.constant 1.600000e+01 : f32
    %937 = vector.broadcast %cst_681 : f32 to vector<8x1xf32>
    %938 = arith.divf %936, %937 : vector<8x1xf32>
    %939 = vector.extract_strided_slice %933 {offsets = [8, 0], sizes = [8, 16], strides = [1, 1]} : vector<16x16xf32> to vector<8x16xf32>
    %cst_682 = arith.constant dense<0.000000e+00> : vector<8xf32>
    %940 = vector.multi_reduction <add>, %939, %cst_682 [1] : vector<8x16xf32> to vector<8xf32>
    %941 = vector.shape_cast %940 : vector<8xf32> to vector<8x1xf32>
    %cst_683 = arith.constant 1.600000e+01 : f32
    %942 = vector.broadcast %cst_683 : f32 to vector<8x1xf32>
    %943 = arith.divf %941, %942 : vector<8x1xf32>
    %944 = vector.extract_strided_slice %930 {offsets = [0, 0], sizes = [8, 16], strides = [1, 1]} : vector<16x16xf32> to vector<8x16xf32>
    %c2_684 = arith.constant 2 : index
    %c0_685 = arith.constant 0 : index
    %c0_686 = arith.constant 0 : index
    %c0_687 = arith.constant 0 : index
    %945 = vector.load %arg5[%c2_684, %c0_685, %c0_686, %c0_687] : memref<4x1x37x16xf32, #tpu.memory_space<vmem>>, vector<1x1x8x16xf32>
    %946 = vector.shape_cast %945 : vector<1x1x8x16xf32> to vector<8x16xf32>
    %947 = vector.shape_cast %944 : vector<8x16xf32> to vector<1x1x8x16xf32>
    tpu.vector_store %arg5[%c2_684, %c0_685, %c0_686, %c0_687], %947 {strides = array<i32>} : memref<4x1x37x16xf32, #tpu.memory_space<vmem>>, vector<1x1x8x16xf32>,
    %948 = vector.shape_cast %938 : vector<8x1xf32> to vector<8x1xf32>
    %949 = vector.broadcast %948 : vector<8x1xf32> to vector<8x16xf32>
    %c2_688 = arith.constant 2 : index
    %c0_689 = arith.constant 0 : index
    %c8_690 = arith.constant 8 : index
    %c0_691 = arith.constant 0 : index
    %950 = vector.load %arg5[%c2_688, %c0_689, %c8_690, %c0_691] : memref<4x1x37x16xf32, #tpu.memory_space<vmem>>, vector<1x1x8x16xf32>
    %951 = vector.shape_cast %950 : vector<1x1x8x16xf32> to vector<8x16xf32>
    %952 = vector.shape_cast %949 : vector<8x16xf32> to vector<1x1x8x16xf32>
    tpu.vector_store %arg5[%c2_688, %c0_689, %c8_690, %c0_691], %952 {strides = array<i32>} : memref<4x1x37x16xf32, #tpu.memory_space<vmem>>, vector<1x1x8x16xf32>,
    %953 = vector.extract_strided_slice %933 {offsets = [0, 0], sizes = [8, 16], strides = [1, 1]} : vector<16x16xf32> to vector<8x16xf32>
    %c2_692 = arith.constant 2 : index
    %c0_693 = arith.constant 0 : index
    %c16_694 = arith.constant 16 : index
    %c0_695 = arith.constant 0 : index
    %954 = vector.load %arg5[%c2_692, %c0_693, %c16_694, %c0_695] : memref<4x1x37x16xf32, #tpu.memory_space<vmem>>, vector<1x1x8x16xf32>
    %955 = vector.shape_cast %954 : vector<1x1x8x16xf32> to vector<8x16xf32>
    %956 = vector.shape_cast %953 : vector<8x16xf32> to vector<1x1x8x16xf32>
    tpu.vector_store %arg5[%c2_692, %c0_693, %c16_694, %c0_695], %956 {strides = array<i32>} : memref<4x1x37x16xf32, #tpu.memory_space<vmem>>, vector<1x1x8x16xf32>,
    %957 = vector.shape_cast %943 : vector<8x1xf32> to vector<8x1xf32>
    %958 = vector.broadcast %957 : vector<8x1xf32> to vector<8x16xf32>
    %c2_696 = arith.constant 2 : index
    %c0_697 = arith.constant 0 : index
    %c24_698 = arith.constant 24 : index
    %c0_699 = arith.constant 0 : index
    %959 = vector.load %arg5[%c2_696, %c0_697, %c24_698, %c0_699] : memref<4x1x37x16xf32, #tpu.memory_space<vmem>>, vector<1x1x8x16xf32>
    %960 = vector.shape_cast %959 : vector<1x1x8x16xf32> to vector<8x16xf32>
    %961 = vector.shape_cast %958 : vector<8x16xf32> to vector<1x1x8x16xf32>
    tpu.vector_store %arg5[%c2_696, %c0_697, %c24_698, %c0_699], %961 {strides = array<i32>} : memref<4x1x37x16xf32, #tpu.memory_space<vmem>>, vector<1x1x8x16xf32>,
    %962 = vector.extract_strided_slice %858 {offsets = [0, 0], sizes = [16, 16], strides = [1, 1]} : vector<32x16xf32> to vector<16x16xf32>
    %963 = arith.subf %865, %862 : vector<16x16xf32>
    %cst_700 = arith.constant 0.333333343 : f32
    %964 = vector.broadcast %cst_700 : f32 to vector<16x16xf32>
    %965 = arith.mulf %963, %964 : vector<16x16xf32>
    %966 = vector.extract_strided_slice %962 {offsets = [8, 0], sizes = [8, 16], strides = [1, 1]} : vector<16x16xf32> to vector<8x16xf32>
    %cst_701 = arith.constant dense<0.000000e+00> : vector<8xf32>
    %967 = vector.multi_reduction <add>, %966, %cst_701 [1] : vector<8x16xf32> to vector<8xf32>
    %968 = vector.shape_cast %967 : vector<8xf32> to vector<8x1xf32>
    %cst_702 = arith.constant 1.600000e+01 : f32
    %969 = vector.broadcast %cst_702 : f32 to vector<8x1xf32>
    %970 = arith.divf %968, %969 : vector<8x1xf32>
    %971 = vector.extract_strided_slice %965 {offsets = [8, 0], sizes = [8, 16], strides = [1, 1]} : vector<16x16xf32> to vector<8x16xf32>
    %cst_703 = arith.constant dense<0.000000e+00> : vector<8xf32>
    %972 = vector.multi_reduction <add>, %971, %cst_703 [1] : vector<8x16xf32> to vector<8xf32>
    %973 = vector.shape_cast %972 : vector<8xf32> to vector<8x1xf32>
    %cst_704 = arith.constant 1.600000e+01 : f32
    %974 = vector.broadcast %cst_704 : f32 to vector<8x1xf32>
    %975 = arith.divf %973, %974 : vector<8x1xf32>
    %976 = vector.extract_strided_slice %962 {offsets = [0, 0], sizes = [8, 16], strides = [1, 1]} : vector<16x16xf32> to vector<8x16xf32>
    %c3_705 = arith.constant 3 : index
    %c0_706 = arith.constant 0 : index
    %c0_707 = arith.constant 0 : index
    %c0_708 = arith.constant 0 : index
    %977 = vector.load %arg5[%c3_705, %c0_706, %c0_707, %c0_708] : memref<4x1x37x16xf32, #tpu.memory_space<vmem>>, vector<1x1x8x16xf32>
    %978 = vector.shape_cast %977 : vector<1x1x8x16xf32> to vector<8x16xf32>
    %979 = vector.shape_cast %976 : vector<8x16xf32> to vector<1x1x8x16xf32>
    tpu.vector_store %arg5[%c3_705, %c0_706, %c0_707, %c0_708], %979 {strides = array<i32>} : memref<4x1x37x16xf32, #tpu.memory_space<vmem>>, vector<1x1x8x16xf32>,
    %980 = vector.shape_cast %970 : vector<8x1xf32> to vector<8x1xf32>
    %981 = vector.broadcast %980 : vector<8x1xf32> to vector<8x16xf32>
    %c3_709 = arith.constant 3 : index
    %c0_710 = arith.constant 0 : index
    %c8_711 = arith.constant 8 : index
    %c0_712 = arith.constant 0 : index
    %982 = vector.load %arg5[%c3_709, %c0_710, %c8_711, %c0_712] : memref<4x1x37x16xf32, #tpu.memory_space<vmem>>, vector<1x1x8x16xf32>
    %983 = vector.shape_cast %982 : vector<1x1x8x16xf32> to vector<8x16xf32>
    %984 = vector.shape_cast %981 : vector<8x16xf32> to vector<1x1x8x16xf32>
    tpu.vector_store %arg5[%c3_709, %c0_710, %c8_711, %c0_712], %984 {strides = array<i32>} : memref<4x1x37x16xf32, #tpu.memory_space<vmem>>, vector<1x1x8x16xf32>,
    %985 = vector.extract_strided_slice %965 {offsets = [0, 0], sizes = [8, 16], strides = [1, 1]} : vector<16x16xf32> to vector<8x16xf32>
    %c3_713 = arith.constant 3 : index
    %c0_714 = arith.constant 0 : index
    %c16_715 = arith.constant 16 : index
    %c0_716 = arith.constant 0 : index
    %986 = vector.load %arg5[%c3_713, %c0_714, %c16_715, %c0_716] : memref<4x1x37x16xf32, #tpu.memory_space<vmem>>, vector<1x1x8x16xf32>
    %987 = vector.shape_cast %986 : vector<1x1x8x16xf32> to vector<8x16xf32>
    %988 = vector.shape_cast %985 : vector<8x16xf32> to vector<1x1x8x16xf32>
    tpu.vector_store %arg5[%c3_713, %c0_714, %c16_715, %c0_716], %988 {strides = array<i32>} : memref<4x1x37x16xf32, #tpu.memory_space<vmem>>, vector<1x1x8x16xf32>,
    %989 = vector.shape_cast %975 : vector<8x1xf32> to vector<8x1xf32>
    %990 = vector.broadcast %989 : vector<8x1xf32> to vector<8x16xf32>
    %c3_717 = arith.constant 3 : index
    %c0_718 = arith.constant 0 : index
    %c24_719 = arith.constant 24 : index
    %c0_720 = arith.constant 0 : index
    %991 = vector.load %arg5[%c3_717, %c0_718, %c24_719, %c0_720] : memref<4x1x37x16xf32, #tpu.memory_space<vmem>>, vector<1x1x8x16xf32>
    %992 = vector.shape_cast %991 : vector<1x1x8x16xf32> to vector<8x16xf32>
    %993 = vector.shape_cast %990 : vector<8x16xf32> to vector<1x1x8x16xf32>
    tpu.vector_store %arg5[%c3_717, %c0_718, %c24_719, %c0_720], %993 {strides = array<i32>} : memref<4x1x37x16xf32, #tpu.memory_space<vmem>>, vector<1x1x8x16xf32>,
    %c6 = arith.constant 6 : index
    %c0_721 = arith.constant 0 : index
    %c0_722 = arith.constant 0 : index
    %994 = vector.load %arg2[%c6, %c0_721, %c0_722] : memref<7x32x37xf32, #tpu.memory_space<vmem>>, vector<1x32x37xf32>
    %995 = vector.shape_cast %994 : vector<1x32x37xf32> to vector<32x37xf32>
    %c0_723 = arith.constant 0 : index
    %c0_724 = arith.constant 0 : index
    %c0_725 = arith.constant 0 : index
    %c0_726 = arith.constant 0 : index
    %996 = vector.load %arg5[%c0_723, %c0_724, %c0_725, %c0_726] : memref<4x1x37x16xf32, #tpu.memory_space<vmem>>, vector<1x1x37x16xf32>
    %997 = vector.shape_cast %996 : vector<1x1x37x16xf32> to vector<37x16xf32>
    %cst_727 = arith.constant dense<0.000000e+00> : vector<32x16xf32>
    %998 = tpu.matmul %995, %997, %cst_727 {dimension_numbers = #tpu.dot_dimension_numbers<[1], [0], [0], [1], [0, 0, 1, 1], [], []>} : vector<32x37xf32>, vector<37x16xf32>, vector<32x16xf32> -> vector<32x16xf32>
    %cst_728 = arith.constant 0.000000e+00 : f32
    %999 = vector.broadcast %cst_728 : f32 to vector<32x16xf32>
    %1000 = arith.maximumf %998, %999 : vector<32x16xf32>
    %c1_729 = arith.constant 1 : index
    %c0_730 = arith.constant 0 : index
    %c0_731 = arith.constant 0 : index
    %c0_732 = arith.constant 0 : index
    %1001 = vector.load %arg5[%c1_729, %c0_730, %c0_731, %c0_732] : memref<4x1x37x16xf32, #tpu.memory_space<vmem>>, vector<1x1x37x16xf32>
    %1002 = vector.shape_cast %1001 : vector<1x1x37x16xf32> to vector<37x16xf32>
    %cst_733 = arith.constant dense<0.000000e+00> : vector<32x16xf32>
    %1003 = tpu.matmul %995, %1002, %cst_733 {dimension_numbers = #tpu.dot_dimension_numbers<[1], [0], [0], [1], [0, 0, 1, 1], [], []>} : vector<32x37xf32>, vector<37x16xf32>, vector<32x16xf32> -> vector<32x16xf32>
    %cst_734 = arith.constant 0.000000e+00 : f32
    %1004 = vector.broadcast %cst_734 : f32 to vector<32x16xf32>
    %1005 = arith.maximumf %1003, %1004 : vector<32x16xf32>
    %c2_735 = arith.constant 2 : index
    %c0_736 = arith.constant 0 : index
    %c0_737 = arith.constant 0 : index
    %c0_738 = arith.constant 0 : index
    %1006 = vector.load %arg5[%c2_735, %c0_736, %c0_737, %c0_738] : memref<4x1x37x16xf32, #tpu.memory_space<vmem>>, vector<1x1x37x16xf32>
    %1007 = vector.shape_cast %1006 : vector<1x1x37x16xf32> to vector<37x16xf32>
    %cst_739 = arith.constant dense<0.000000e+00> : vector<32x16xf32>
    %1008 = tpu.matmul %995, %1007, %cst_739 {dimension_numbers = #tpu.dot_dimension_numbers<[1], [0], [0], [1], [0, 0, 1, 1], [], []>} : vector<32x37xf32>, vector<37x16xf32>, vector<32x16xf32> -> vector<32x16xf32>
    %cst_740 = arith.constant 0.000000e+00 : f32
    %1009 = vector.broadcast %cst_740 : f32 to vector<32x16xf32>
    %1010 = arith.maximumf %1008, %1009 : vector<32x16xf32>
    %c3_741 = arith.constant 3 : index
    %c0_742 = arith.constant 0 : index
    %c0_743 = arith.constant 0 : index
    %c0_744 = arith.constant 0 : index
    %1011 = vector.load %arg5[%c3_741, %c0_742, %c0_743, %c0_744] : memref<4x1x37x16xf32, #tpu.memory_space<vmem>>, vector<1x1x37x16xf32>
    %1012 = vector.shape_cast %1011 : vector<1x1x37x16xf32> to vector<37x16xf32>
    %cst_745 = arith.constant dense<0.000000e+00> : vector<32x16xf32>
    %1013 = tpu.matmul %995, %1012, %cst_745 {dimension_numbers = #tpu.dot_dimension_numbers<[1], [0], [0], [1], [0, 0, 1, 1], [], []>} : vector<32x37xf32>, vector<37x16xf32>, vector<32x16xf32> -> vector<32x16xf32>
    %cst_746 = arith.constant 0.000000e+00 : f32
    %1014 = vector.broadcast %cst_746 : f32 to vector<32x16xf32>
    %1015 = arith.maximumf %1013, %1014 : vector<32x16xf32>
    %1016 = vector.extract_strided_slice %1000 {offsets = [16, 0], sizes = [16, 16], strides = [1, 1]} : vector<32x16xf32> to vector<16x16xf32>
    %1017 = vector.extract_strided_slice %1005 {offsets = [16, 0], sizes = [16, 16], strides = [1, 1]} : vector<32x16xf32> to vector<16x16xf32>
    %1018 = vector.extract_strided_slice %1010 {offsets = [16, 0], sizes = [16, 16], strides = [1, 1]} : vector<32x16xf32> to vector<16x16xf32>
    %1019 = vector.extract_strided_slice %1015 {offsets = [16, 0], sizes = [16, 16], strides = [1, 1]} : vector<32x16xf32> to vector<16x16xf32>
    %1020 = arith.addf %1016, %1017 : vector<16x16xf32>
    %1021 = arith.addf %1020, %1018 : vector<16x16xf32>
    %1022 = arith.addf %1021, %1019 : vector<16x16xf32>
    %1023 = vector.extract_strided_slice %1000 {offsets = [0, 0], sizes = [16, 16], strides = [1, 1]} : vector<32x16xf32> to vector<16x16xf32>
    %1024 = arith.subf %1022, %1016 : vector<16x16xf32>
    %cst_747 = arith.constant 0.333333343 : f32
    %1025 = vector.broadcast %cst_747 : f32 to vector<16x16xf32>
    %1026 = arith.mulf %1024, %1025 : vector<16x16xf32>
    %1027 = vector.extract_strided_slice %1023 {offsets = [8, 0], sizes = [8, 16], strides = [1, 1]} : vector<16x16xf32> to vector<8x16xf32>
    %cst_748 = arith.constant dense<0.000000e+00> : vector<8xf32>
    %1028 = vector.multi_reduction <add>, %1027, %cst_748 [1] : vector<8x16xf32> to vector<8xf32>
    %1029 = vector.shape_cast %1028 : vector<8xf32> to vector<8x1xf32>
    %cst_749 = arith.constant 1.600000e+01 : f32
    %1030 = vector.broadcast %cst_749 : f32 to vector<8x1xf32>
    %1031 = arith.divf %1029, %1030 : vector<8x1xf32>
    %1032 = vector.extract_strided_slice %1026 {offsets = [8, 0], sizes = [8, 16], strides = [1, 1]} : vector<16x16xf32> to vector<8x16xf32>
    %cst_750 = arith.constant dense<0.000000e+00> : vector<8xf32>
    %1033 = vector.multi_reduction <add>, %1032, %cst_750 [1] : vector<8x16xf32> to vector<8xf32>
    %1034 = vector.shape_cast %1033 : vector<8xf32> to vector<8x1xf32>
    %cst_751 = arith.constant 1.600000e+01 : f32
    %1035 = vector.broadcast %cst_751 : f32 to vector<8x1xf32>
    %1036 = arith.divf %1034, %1035 : vector<8x1xf32>
    %1037 = vector.extract_strided_slice %1023 {offsets = [0, 0], sizes = [8, 16], strides = [1, 1]} : vector<16x16xf32> to vector<8x16xf32>
    %c0_752 = arith.constant 0 : index
    %c0_753 = arith.constant 0 : index
    %c0_754 = arith.constant 0 : index
    %c0_755 = arith.constant 0 : index
    %1038 = vector.load %arg5[%c0_752, %c0_753, %c0_754, %c0_755] : memref<4x1x37x16xf32, #tpu.memory_space<vmem>>, vector<1x1x8x16xf32>
    %1039 = vector.shape_cast %1038 : vector<1x1x8x16xf32> to vector<8x16xf32>
    %1040 = vector.shape_cast %1037 : vector<8x16xf32> to vector<1x1x8x16xf32>
    tpu.vector_store %arg5[%c0_752, %c0_753, %c0_754, %c0_755], %1040 {strides = array<i32>} : memref<4x1x37x16xf32, #tpu.memory_space<vmem>>, vector<1x1x8x16xf32>,
    %1041 = vector.shape_cast %1031 : vector<8x1xf32> to vector<8x1xf32>
    %1042 = vector.broadcast %1041 : vector<8x1xf32> to vector<8x16xf32>
    %c0_756 = arith.constant 0 : index
    %c0_757 = arith.constant 0 : index
    %c8_758 = arith.constant 8 : index
    %c0_759 = arith.constant 0 : index
    %1043 = vector.load %arg5[%c0_756, %c0_757, %c8_758, %c0_759] : memref<4x1x37x16xf32, #tpu.memory_space<vmem>>, vector<1x1x8x16xf32>
    %1044 = vector.shape_cast %1043 : vector<1x1x8x16xf32> to vector<8x16xf32>
    %1045 = vector.shape_cast %1042 : vector<8x16xf32> to vector<1x1x8x16xf32>
    tpu.vector_store %arg5[%c0_756, %c0_757, %c8_758, %c0_759], %1045 {strides = array<i32>} : memref<4x1x37x16xf32, #tpu.memory_space<vmem>>, vector<1x1x8x16xf32>,
    %1046 = vector.extract_strided_slice %1026 {offsets = [0, 0], sizes = [8, 16], strides = [1, 1]} : vector<16x16xf32> to vector<8x16xf32>
    %c0_760 = arith.constant 0 : index
    %c0_761 = arith.constant 0 : index
    %c16_762 = arith.constant 16 : index
    %c0_763 = arith.constant 0 : index
    %1047 = vector.load %arg5[%c0_760, %c0_761, %c16_762, %c0_763] : memref<4x1x37x16xf32, #tpu.memory_space<vmem>>, vector<1x1x8x16xf32>
    %1048 = vector.shape_cast %1047 : vector<1x1x8x16xf32> to vector<8x16xf32>
    %1049 = vector.shape_cast %1046 : vector<8x16xf32> to vector<1x1x8x16xf32>
    tpu.vector_store %arg5[%c0_760, %c0_761, %c16_762, %c0_763], %1049 {strides = array<i32>} : memref<4x1x37x16xf32, #tpu.memory_space<vmem>>, vector<1x1x8x16xf32>,
    %1050 = vector.shape_cast %1036 : vector<8x1xf32> to vector<8x1xf32>
    %1051 = vector.broadcast %1050 : vector<8x1xf32> to vector<8x16xf32>
    %c0_764 = arith.constant 0 : index
    %c0_765 = arith.constant 0 : index
    %c24_766 = arith.constant 24 : index
    %c0_767 = arith.constant 0 : index
    %1052 = vector.load %arg5[%c0_764, %c0_765, %c24_766, %c0_767] : memref<4x1x37x16xf32, #tpu.memory_space<vmem>>, vector<1x1x8x16xf32>
    %1053 = vector.shape_cast %1052 : vector<1x1x8x16xf32> to vector<8x16xf32>
    %1054 = vector.shape_cast %1051 : vector<8x16xf32> to vector<1x1x8x16xf32>
    tpu.vector_store %arg5[%c0_764, %c0_765, %c24_766, %c0_767], %1054 {strides = array<i32>} : memref<4x1x37x16xf32, #tpu.memory_space<vmem>>, vector<1x1x8x16xf32>,
    %1055 = vector.extract_strided_slice %1005 {offsets = [0, 0], sizes = [16, 16], strides = [1, 1]} : vector<32x16xf32> to vector<16x16xf32>
    %1056 = arith.subf %1022, %1017 : vector<16x16xf32>
    %cst_768 = arith.constant 0.333333343 : f32
    %1057 = vector.broadcast %cst_768 : f32 to vector<16x16xf32>
    %1058 = arith.mulf %1056, %1057 : vector<16x16xf32>
    %1059 = vector.extract_strided_slice %1055 {offsets = [8, 0], sizes = [8, 16], strides = [1, 1]} : vector<16x16xf32> to vector<8x16xf32>
    %cst_769 = arith.constant dense<0.000000e+00> : vector<8xf32>
    %1060 = vector.multi_reduction <add>, %1059, %cst_769 [1] : vector<8x16xf32> to vector<8xf32>
    %1061 = vector.shape_cast %1060 : vector<8xf32> to vector<8x1xf32>
    %cst_770 = arith.constant 1.600000e+01 : f32
    %1062 = vector.broadcast %cst_770 : f32 to vector<8x1xf32>
    %1063 = arith.divf %1061, %1062 : vector<8x1xf32>
    %1064 = vector.extract_strided_slice %1058 {offsets = [8, 0], sizes = [8, 16], strides = [1, 1]} : vector<16x16xf32> to vector<8x16xf32>
    %cst_771 = arith.constant dense<0.000000e+00> : vector<8xf32>
    %1065 = vector.multi_reduction <add>, %1064, %cst_771 [1] : vector<8x16xf32> to vector<8xf32>
    %1066 = vector.shape_cast %1065 : vector<8xf32> to vector<8x1xf32>
    %cst_772 = arith.constant 1.600000e+01 : f32
    %1067 = vector.broadcast %cst_772 : f32 to vector<8x1xf32>
    %1068 = arith.divf %1066, %1067 : vector<8x1xf32>
    %1069 = vector.extract_strided_slice %1055 {offsets = [0, 0], sizes = [8, 16], strides = [1, 1]} : vector<16x16xf32> to vector<8x16xf32>
    %c1_773 = arith.constant 1 : index
    %c0_774 = arith.constant 0 : index
    %c0_775 = arith.constant 0 : index
    %c0_776 = arith.constant 0 : index
    %1070 = vector.load %arg5[%c1_773, %c0_774, %c0_775, %c0_776] : memref<4x1x37x16xf32, #tpu.memory_space<vmem>>, vector<1x1x8x16xf32>
    %1071 = vector.shape_cast %1070 : vector<1x1x8x16xf32> to vector<8x16xf32>
    %1072 = vector.shape_cast %1069 : vector<8x16xf32> to vector<1x1x8x16xf32>
    tpu.vector_store %arg5[%c1_773, %c0_774, %c0_775, %c0_776], %1072 {strides = array<i32>} : memref<4x1x37x16xf32, #tpu.memory_space<vmem>>, vector<1x1x8x16xf32>,
    %1073 = vector.shape_cast %1063 : vector<8x1xf32> to vector<8x1xf32>
    %1074 = vector.broadcast %1073 : vector<8x1xf32> to vector<8x16xf32>
    %c1_777 = arith.constant 1 : index
    %c0_778 = arith.constant 0 : index
    %c8_779 = arith.constant 8 : index
    %c0_780 = arith.constant 0 : index
    %1075 = vector.load %arg5[%c1_777, %c0_778, %c8_779, %c0_780] : memref<4x1x37x16xf32, #tpu.memory_space<vmem>>, vector<1x1x8x16xf32>
    %1076 = vector.shape_cast %1075 : vector<1x1x8x16xf32> to vector<8x16xf32>
    %1077 = vector.shape_cast %1074 : vector<8x16xf32> to vector<1x1x8x16xf32>
    tpu.vector_store %arg5[%c1_777, %c0_778, %c8_779, %c0_780], %1077 {strides = array<i32>} : memref<4x1x37x16xf32, #tpu.memory_space<vmem>>, vector<1x1x8x16xf32>,
    %1078 = vector.extract_strided_slice %1058 {offsets = [0, 0], sizes = [8, 16], strides = [1, 1]} : vector<16x16xf32> to vector<8x16xf32>
    %c1_781 = arith.constant 1 : index
    %c0_782 = arith.constant 0 : index
    %c16_783 = arith.constant 16 : index
    %c0_784 = arith.constant 0 : index
    %1079 = vector.load %arg5[%c1_781, %c0_782, %c16_783, %c0_784] : memref<4x1x37x16xf32, #tpu.memory_space<vmem>>, vector<1x1x8x16xf32>
    %1080 = vector.shape_cast %1079 : vector<1x1x8x16xf32> to vector<8x16xf32>
    %1081 = vector.shape_cast %1078 : vector<8x16xf32> to vector<1x1x8x16xf32>
    tpu.vector_store %arg5[%c1_781, %c0_782, %c16_783, %c0_784], %1081 {strides = array<i32>} : memref<4x1x37x16xf32, #tpu.memory_space<vmem>>, vector<1x1x8x16xf32>,
    %1082 = vector.shape_cast %1068 : vector<8x1xf32> to vector<8x1xf32>
    %1083 = vector.broadcast %1082 : vector<8x1xf32> to vector<8x16xf32>
    %c1_785 = arith.constant 1 : index
    %c0_786 = arith.constant 0 : index
    %c24_787 = arith.constant 24 : index
    %c0_788 = arith.constant 0 : index
    %1084 = vector.load %arg5[%c1_785, %c0_786, %c24_787, %c0_788] : memref<4x1x37x16xf32, #tpu.memory_space<vmem>>, vector<1x1x8x16xf32>
    %1085 = vector.shape_cast %1084 : vector<1x1x8x16xf32> to vector<8x16xf32>
    %1086 = vector.shape_cast %1083 : vector<8x16xf32> to vector<1x1x8x16xf32>
    tpu.vector_store %arg5[%c1_785, %c0_786, %c24_787, %c0_788], %1086 {strides = array<i32>} : memref<4x1x37x16xf32, #tpu.memory_space<vmem>>, vector<1x1x8x16xf32>,
    %1087 = vector.extract_strided_slice %1010 {offsets = [0, 0], sizes = [16, 16], strides = [1, 1]} : vector<32x16xf32> to vector<16x16xf32>
    %1088 = arith.subf %1022, %1018 : vector<16x16xf32>
    %cst_789 = arith.constant 0.333333343 : f32
    %1089 = vector.broadcast %cst_789 : f32 to vector<16x16xf32>
    %1090 = arith.mulf %1088, %1089 : vector<16x16xf32>
    %1091 = vector.extract_strided_slice %1087 {offsets = [8, 0], sizes = [8, 16], strides = [1, 1]} : vector<16x16xf32> to vector<8x16xf32>
    %cst_790 = arith.constant dense<0.000000e+00> : vector<8xf32>
    %1092 = vector.multi_reduction <add>, %1091, %cst_790 [1] : vector<8x16xf32> to vector<8xf32>
    %1093 = vector.shape_cast %1092 : vector<8xf32> to vector<8x1xf32>
    %cst_791 = arith.constant 1.600000e+01 : f32
    %1094 = vector.broadcast %cst_791 : f32 to vector<8x1xf32>
    %1095 = arith.divf %1093, %1094 : vector<8x1xf32>
    %1096 = vector.extract_strided_slice %1090 {offsets = [8, 0], sizes = [8, 16], strides = [1, 1]} : vector<16x16xf32> to vector<8x16xf32>
    %cst_792 = arith.constant dense<0.000000e+00> : vector<8xf32>
    %1097 = vector.multi_reduction <add>, %1096, %cst_792 [1] : vector<8x16xf32> to vector<8xf32>
    %1098 = vector.shape_cast %1097 : vector<8xf32> to vector<8x1xf32>
    %cst_793 = arith.constant 1.600000e+01 : f32
    %1099 = vector.broadcast %cst_793 : f32 to vector<8x1xf32>
    %1100 = arith.divf %1098, %1099 : vector<8x1xf32>
    %1101 = vector.extract_strided_slice %1087 {offsets = [0, 0], sizes = [8, 16], strides = [1, 1]} : vector<16x16xf32> to vector<8x16xf32>
    %c2_794 = arith.constant 2 : index
    %c0_795 = arith.constant 0 : index
    %c0_796 = arith.constant 0 : index
    %c0_797 = arith.constant 0 : index
    %1102 = vector.load %arg5[%c2_794, %c0_795, %c0_796, %c0_797] : memref<4x1x37x16xf32, #tpu.memory_space<vmem>>, vector<1x1x8x16xf32>
    %1103 = vector.shape_cast %1102 : vector<1x1x8x16xf32> to vector<8x16xf32>
    %1104 = vector.shape_cast %1101 : vector<8x16xf32> to vector<1x1x8x16xf32>
    tpu.vector_store %arg5[%c2_794, %c0_795, %c0_796, %c0_797], %1104 {strides = array<i32>} : memref<4x1x37x16xf32, #tpu.memory_space<vmem>>, vector<1x1x8x16xf32>,
    %1105 = vector.shape_cast %1095 : vector<8x1xf32> to vector<8x1xf32>
    %1106 = vector.broadcast %1105 : vector<8x1xf32> to vector<8x16xf32>
    %c2_798 = arith.constant 2 : index
    %c0_799 = arith.constant 0 : index
    %c8_800 = arith.constant 8 : index
    %c0_801 = arith.constant 0 : index
    %1107 = vector.load %arg5[%c2_798, %c0_799, %c8_800, %c0_801] : memref<4x1x37x16xf32, #tpu.memory_space<vmem>>, vector<1x1x8x16xf32>
    %1108 = vector.shape_cast %1107 : vector<1x1x8x16xf32> to vector<8x16xf32>
    %1109 = vector.shape_cast %1106 : vector<8x16xf32> to vector<1x1x8x16xf32>
    tpu.vector_store %arg5[%c2_798, %c0_799, %c8_800, %c0_801], %1109 {strides = array<i32>} : memref<4x1x37x16xf32, #tpu.memory_space<vmem>>, vector<1x1x8x16xf32>,
    %1110 = vector.extract_strided_slice %1090 {offsets = [0, 0], sizes = [8, 16], strides = [1, 1]} : vector<16x16xf32> to vector<8x16xf32>
    %c2_802 = arith.constant 2 : index
    %c0_803 = arith.constant 0 : index
    %c16_804 = arith.constant 16 : index
    %c0_805 = arith.constant 0 : index
    %1111 = vector.load %arg5[%c2_802, %c0_803, %c16_804, %c0_805] : memref<4x1x37x16xf32, #tpu.memory_space<vmem>>, vector<1x1x8x16xf32>
    %1112 = vector.shape_cast %1111 : vector<1x1x8x16xf32> to vector<8x16xf32>
    %1113 = vector.shape_cast %1110 : vector<8x16xf32> to vector<1x1x8x16xf32>
    tpu.vector_store %arg5[%c2_802, %c0_803, %c16_804, %c0_805], %1113 {strides = array<i32>} : memref<4x1x37x16xf32, #tpu.memory_space<vmem>>, vector<1x1x8x16xf32>,
    %1114 = vector.shape_cast %1100 : vector<8x1xf32> to vector<8x1xf32>
    %1115 = vector.broadcast %1114 : vector<8x1xf32> to vector<8x16xf32>
    %c2_806 = arith.constant 2 : index
    %c0_807 = arith.constant 0 : index
    %c24_808 = arith.constant 24 : index
    %c0_809 = arith.constant 0 : index
    %1116 = vector.load %arg5[%c2_806, %c0_807, %c24_808, %c0_809] : memref<4x1x37x16xf32, #tpu.memory_space<vmem>>, vector<1x1x8x16xf32>
    %1117 = vector.shape_cast %1116 : vector<1x1x8x16xf32> to vector<8x16xf32>
    %1118 = vector.shape_cast %1115 : vector<8x16xf32> to vector<1x1x8x16xf32>
    tpu.vector_store %arg5[%c2_806, %c0_807, %c24_808, %c0_809], %1118 {strides = array<i32>} : memref<4x1x37x16xf32, #tpu.memory_space<vmem>>, vector<1x1x8x16xf32>,
    %1119 = vector.extract_strided_slice %1015 {offsets = [0, 0], sizes = [16, 16], strides = [1, 1]} : vector<32x16xf32> to vector<16x16xf32>
    %1120 = arith.subf %1022, %1019 : vector<16x16xf32>
    %cst_810 = arith.constant 0.333333343 : f32
    %1121 = vector.broadcast %cst_810 : f32 to vector<16x16xf32>
    %1122 = arith.mulf %1120, %1121 : vector<16x16xf32>
    %1123 = vector.extract_strided_slice %1119 {offsets = [8, 0], sizes = [8, 16], strides = [1, 1]} : vector<16x16xf32> to vector<8x16xf32>
    %cst_811 = arith.constant dense<0.000000e+00> : vector<8xf32>
    %1124 = vector.multi_reduction <add>, %1123, %cst_811 [1] : vector<8x16xf32> to vector<8xf32>
    %1125 = vector.shape_cast %1124 : vector<8xf32> to vector<8x1xf32>
    %cst_812 = arith.constant 1.600000e+01 : f32
    %1126 = vector.broadcast %cst_812 : f32 to vector<8x1xf32>
    %1127 = arith.divf %1125, %1126 : vector<8x1xf32>
    %1128 = vector.extract_strided_slice %1122 {offsets = [8, 0], sizes = [8, 16], strides = [1, 1]} : vector<16x16xf32> to vector<8x16xf32>
    %cst_813 = arith.constant dense<0.000000e+00> : vector<8xf32>
    %1129 = vector.multi_reduction <add>, %1128, %cst_813 [1] : vector<8x16xf32> to vector<8xf32>
    %1130 = vector.shape_cast %1129 : vector<8xf32> to vector<8x1xf32>
    %cst_814 = arith.constant 1.600000e+01 : f32
    %1131 = vector.broadcast %cst_814 : f32 to vector<8x1xf32>
    %1132 = arith.divf %1130, %1131 : vector<8x1xf32>
    %1133 = vector.extract_strided_slice %1119 {offsets = [0, 0], sizes = [8, 16], strides = [1, 1]} : vector<16x16xf32> to vector<8x16xf32>
    %c3_815 = arith.constant 3 : index
    %c0_816 = arith.constant 0 : index
    %c0_817 = arith.constant 0 : index
    %c0_818 = arith.constant 0 : index
    %1134 = vector.load %arg5[%c3_815, %c0_816, %c0_817, %c0_818] : memref<4x1x37x16xf32, #tpu.memory_space<vmem>>, vector<1x1x8x16xf32>
    %1135 = vector.shape_cast %1134 : vector<1x1x8x16xf32> to vector<8x16xf32>
    %1136 = vector.shape_cast %1133 : vector<8x16xf32> to vector<1x1x8x16xf32>
    tpu.vector_store %arg5[%c3_815, %c0_816, %c0_817, %c0_818], %1136 {strides = array<i32>} : memref<4x1x37x16xf32, #tpu.memory_space<vmem>>, vector<1x1x8x16xf32>,
    %1137 = vector.shape_cast %1127 : vector<8x1xf32> to vector<8x1xf32>
    %1138 = vector.broadcast %1137 : vector<8x1xf32> to vector<8x16xf32>
    %c3_819 = arith.constant 3 : index
    %c0_820 = arith.constant 0 : index
    %c8_821 = arith.constant 8 : index
    %c0_822 = arith.constant 0 : index
    %1139 = vector.load %arg5[%c3_819, %c0_820, %c8_821, %c0_822] : memref<4x1x37x16xf32, #tpu.memory_space<vmem>>, vector<1x1x8x16xf32>
    %1140 = vector.shape_cast %1139 : vector<1x1x8x16xf32> to vector<8x16xf32>
    %1141 = vector.shape_cast %1138 : vector<8x16xf32> to vector<1x1x8x16xf32>
    tpu.vector_store %arg5[%c3_819, %c0_820, %c8_821, %c0_822], %1141 {strides = array<i32>} : memref<4x1x37x16xf32, #tpu.memory_space<vmem>>, vector<1x1x8x16xf32>,
    %1142 = vector.extract_strided_slice %1122 {offsets = [0, 0], sizes = [8, 16], strides = [1, 1]} : vector<16x16xf32> to vector<8x16xf32>
    %c3_823 = arith.constant 3 : index
    %c0_824 = arith.constant 0 : index
    %c16_825 = arith.constant 16 : index
    %c0_826 = arith.constant 0 : index
    %1143 = vector.load %arg5[%c3_823, %c0_824, %c16_825, %c0_826] : memref<4x1x37x16xf32, #tpu.memory_space<vmem>>, vector<1x1x8x16xf32>
    %1144 = vector.shape_cast %1143 : vector<1x1x8x16xf32> to vector<8x16xf32>
    %1145 = vector.shape_cast %1142 : vector<8x16xf32> to vector<1x1x8x16xf32>
    tpu.vector_store %arg5[%c3_823, %c0_824, %c16_825, %c0_826], %1145 {strides = array<i32>} : memref<4x1x37x16xf32, #tpu.memory_space<vmem>>, vector<1x1x8x16xf32>,
    %1146 = vector.shape_cast %1132 : vector<8x1xf32> to vector<8x1xf32>
    %1147 = vector.broadcast %1146 : vector<8x1xf32> to vector<8x16xf32>
    %c3_827 = arith.constant 3 : index
    %c0_828 = arith.constant 0 : index
    %c24_829 = arith.constant 24 : index
    %c0_830 = arith.constant 0 : index
    %1148 = vector.load %arg5[%c3_827, %c0_828, %c24_829, %c0_830] : memref<4x1x37x16xf32, #tpu.memory_space<vmem>>, vector<1x1x8x16xf32>
    %1149 = vector.shape_cast %1148 : vector<1x1x8x16xf32> to vector<8x16xf32>
    %1150 = vector.shape_cast %1147 : vector<8x16xf32> to vector<1x1x8x16xf32>
    tpu.vector_store %arg5[%c3_827, %c0_828, %c24_829, %c0_830], %1150 {strides = array<i32>} : memref<4x1x37x16xf32, #tpu.memory_space<vmem>>, vector<1x1x8x16xf32>,
    %c0_831 = arith.constant 0 : index
    %c0_832 = arith.constant 0 : index
    %1151 = vector.load %arg3[%c0_831, %c0_832] : memref<37x1xf32, #tpu.memory_space<vmem>>, vector<37x1xf32>
    %c0_833 = arith.constant 0 : index
    %c0_834 = arith.constant 0 : index
    %c0_835 = arith.constant 0 : index
    %c0_836 = arith.constant 0 : index
    %1152 = vector.load %arg5[%c0_833, %c0_834, %c0_835, %c0_836] : memref<4x1x37x16xf32, #tpu.memory_space<vmem>>, vector<1x1x37x16xf32>
    %1153 = vector.shape_cast %1152 : vector<1x1x37x16xf32> to vector<37x16xf32>
    %c1_837 = arith.constant 1 : index
    %c0_838 = arith.constant 0 : index
    %c0_839 = arith.constant 0 : index
    %c0_840 = arith.constant 0 : index
    %1154 = vector.load %arg5[%c1_837, %c0_838, %c0_839, %c0_840] : memref<4x1x37x16xf32, #tpu.memory_space<vmem>>, vector<1x1x37x16xf32>
    %1155 = vector.shape_cast %1154 : vector<1x1x37x16xf32> to vector<37x16xf32>
    %1156 = arith.addf %1153, %1155 : vector<37x16xf32>
    %c2_841 = arith.constant 2 : index
    %c0_842 = arith.constant 0 : index
    %c0_843 = arith.constant 0 : index
    %c0_844 = arith.constant 0 : index
    %1157 = vector.load %arg5[%c2_841, %c0_842, %c0_843, %c0_844] : memref<4x1x37x16xf32, #tpu.memory_space<vmem>>, vector<1x1x37x16xf32>
    %1158 = vector.shape_cast %1157 : vector<1x1x37x16xf32> to vector<37x16xf32>
    %1159 = arith.addf %1156, %1158 : vector<37x16xf32>
    %c3_845 = arith.constant 3 : index
    %c0_846 = arith.constant 0 : index
    %c0_847 = arith.constant 0 : index
    %c0_848 = arith.constant 0 : index
    %1160 = vector.load %arg5[%c3_845, %c0_846, %c0_847, %c0_848] : memref<4x1x37x16xf32, #tpu.memory_space<vmem>>, vector<1x1x37x16xf32>
    %1161 = vector.shape_cast %1160 : vector<1x1x37x16xf32> to vector<37x16xf32>
    %1162 = arith.addf %1159, %1161 : vector<37x16xf32>
    %cst_849 = arith.constant 2.500000e-01 : f32
    %1163 = vector.broadcast %cst_849 : f32 to vector<37x16xf32>
    %1164 = arith.mulf %1162, %1163 : vector<37x16xf32>
    %1165 = vector.broadcast %1151 : vector<37x1xf32> to vector<37x16xf32>
    %1166 = arith.mulf %1164, %1165 : vector<37x16xf32>
    %cst_850 = arith.constant dense<0.000000e+00> : vector<16xf32>
    %1167 = vector.multi_reduction <add>, %1166, %cst_850 [0] : vector<37x16xf32> to vector<16xf32>
    %1168 = vector.shape_cast %1167 : vector<16xf32> to vector<1x16xf32>
    %cst_851 = arith.constant 3.14159274 : f32
    %1169 = vector.broadcast %cst_851 : f32 to vector<1x16xf32>
    %1170 = arith.mulf %1168, %1169 : vector<1x16xf32>
    %c0_852 = arith.constant 0 : index
    %c0_853 = arith.constant 0 : index
    %c0_854 = arith.constant 0 : index
    %1171 = vector.load %arg4[%c0_852, %c0_853, %c0_854] : memref<1x1x16xf32, #tpu.memory_space<vmem>>, vector<1x1x16xf32>
    %1172 = vector.shape_cast %1171 : vector<1x1x16xf32> to vector<1x16xf32>
    %1173 = vector.shape_cast %1170 : vector<1x16xf32> to vector<1x1x16xf32>
    tpu.vector_store %arg4[%c0_852, %c0_853, %c0_854], %1173 {strides = array<i32>} : memref<1x1x16xf32, #tpu.memory_space<vmem>>, vector<1x1x16xf32>,
    return
  }
  func.func @transform_0(%arg0: i32) -> (i32, i32, i32) {
    %c0_i32 = arith.constant 0 : i32
    %c0_i32_0 = arith.constant 0 : i32
    %c0_i32_1 = arith.constant 0 : i32
    return %arg0, %c0_i32, %c0_i32_0 : i32, i32, i32
  }
  func.func @transform_1(%arg0: i32) -> (i32, i32, i32) {
    %c0_i32 = arith.constant 0 : i32
    %c0_i32_0 = arith.constant 0 : i32
    %c0_i32_1 = arith.constant 0 : i32
    %c0_i32_2 = arith.constant 0 : i32
    return %c0_i32, %c0_i32_0, %c0_i32_1 : i32, i32, i32
  }
  func.func @transform_2(%arg0: i32) -> (i32, i32) {
    %c0_i32 = arith.constant 0 : i32
    %c0_i32_0 = arith.constant 0 : i32
    %c0_i32_1 = arith.constant 0 : i32
    return %c0_i32, %c0_i32_0 : i32, i32
  }
  func.func @transform_3(%arg0: i32) -> (i32, i32, i32) {
    %c0_i32 = arith.constant 0 : i32
    %c0_i32_0 = arith.constant 0 : i32
    %c0_i32_1 = arith.constant 0 : i32
    return %arg0, %c0_i32, %c0_i32_0 : i32, i32, i32
  }
}

</mosaic_0001>

<bundles_post_ra>
// kernel: risnet_pi_forward.1
= control target key start
LH: loop header
LB: loop body
LE: loop exit
PB: predicated region body
PF: predicated region fallthrough
CT: control target
= control target key end

     0   :  { %8 = vsyncpa [#allocation4], 0  ;;  %s5524_s0 = inlined_call_operand.vmem [shape: f32[2,16,16], index: 0, kind: input, shape index: {}]   ;;  %s5525_s1 = inlined_call_operand.vmem [shape: f32[7,32,37], index: 1, kind: input, shape index: {}]   ;;  %s5526_s2 = inlined_call_operand.vmem [shape: f32[37,1], index: 2, kind: input, shape index: {}]   ;;  %s5527_s3 = inlined_call_operand.hbm [shape: f32[2,1,16], index: 3, kind: output, shape index: {}]  }
   0x1   :  { %10 = vsyncpa [#allocation4 + $0x1], 0  ;;  %s4920_s12 = smov 0   ;;  %s4922_s13 = smov 0  }
   0x2   :  { %s4924_s14 = smov 0   ;;  %s4926_s15 = smov 0  }
   0x3 LB: > { %s4941_s16 = sadd.s32 4294967295, %s4894_s15   ;;  %s3690_s17 = sadd.s32 4294967294, %s4894_s15   ;;  %s4894_s15 = sphi %s4926_s15, %s5533_s15   ;;  %s4890_s14 = sphi %s4924_s14, %s5532_s14   ;;  %s4886_s13 = sphi %s4922_s13, %s5531_s13   ;;  %s4882_s12 = sphi %s4920_s12, %s5530_s12  }
   0x4   : > { %s4945_s18 = sadd.s32 1, %s4894_s15   ;;  %s91_s19 = sadd.s32 1, %s4890_s14 }
   0x5   : > { %s88_s20 = ssub.s32 %s4894_s15, %s4945_s18  ;;  %p101_p0 = scmp.ne.s32.totalorder %s4890_s14, %s4886_s13 }
   0x6   : > { %p89_p1 = scmp.eq.s32.totalorder %s88_s20, 0  ;;  %p102_p2 = scmp.eq.s32.totalorder %s4941_s16, 1 }
   0x7   : > { %p107_p3 = scmp.ne.s32.totalorder %s4886_s13, %s4882_s12  ;;  %p108_p4 = scmp.eq.s32.totalorder %s3690_s17, 1 }
   0x8   : > { %s4956_s21 = scalar_select %p89_p1, %s4890_s14, %s91_s19  }
   0x9   : > { %p4958_p5 = por %p102_p2, %p101_p0  ;;  %p4962_p6 = por %p108_p4, %p107_p3 }
   0xa   : > { %p3693_p7 = scmp.ge.s32.totalorder %s4894_s15, 1  ;;  %p140_p8 = scmp.lt.s32.totalorder %s4894_s15, 3 }
   0xc   : > { %p141_p9 = pnand %p3693_p7, %p140_p8 }
   0xd   : > { %vm168_vm0 = vcmask (!%p141_p9), 130048   ;;  %p163_p10 = scmp.lt.s32.totalorder (!%p141_p9), %s4941_s16, 1  ;;  %vm176_vm1 = vcmask (!%p141_p9), 122880   ;;  %v4972_v0 = vld [vmem:[%s5525_s1] sm:$0xff] (!%p141_p9)  ;;  %v4896_v1 = vmov (!%p141_p9), 0.0   ;;  %vm211_vm2 = vcmask (!%p141_p9), 302080  }
   0xe   : > { %144 = sbr.rel (%p141_p9) target bundleno = 2915 (0xb63), region = 32  ;;  %169 = vst.msk [vmem:[#allocation2] sm:$0xff] (!%p141_p9), %vm168_vm0, %v4896_v1  ;;  %170 = vst.msk [vmem:[#allocation2 + $0x8] sm:$0xff] (!%p141_p9), %vm168_vm0, %v4896_v1  ;;  %v4897_v2 = vmov (!%p141_p9), 1.0   ;;  %4126 = vmatprep.mubr.msk.f32.mxu0 (!%p141_p9), %vm211_vm2, %v4972_v0  ;;  %4142 = vmatprep.mubr.msk.f32.mxu1 (!%p141_p9), %vm211_vm2, %v4972_v0  ;;  %vm174_vm3 = vcmask (!%p141_p9), 125952   ;;  %vm224_vm4 = vcmask (!%p141_p9), 1044480  }
   0xf   : > { %171 = vst.msk [vmem:[#allocation2 + $0x10] sm:$0xff] (!%p141_p9), %vm168_vm0, %v4896_v1  ;;  %172 = vst.msk [vmem:[#allocation2 + $0x18] sm:$0xff] (!%p141_p9), %vm168_vm0, %v4896_v1  ;;  %v203_v25 = vld [vmem:[%s5525_s1 + $0x8] sm:$0xff] (!%p141_p9)  ;;  %v204_v32 = vld [vmem:[%s5525_s1 + $0x10] sm:$0xff] (!%p141_p9)  ;;  %vm3611_vm5 = vcmask (!%p141_p9), 126976   ;;  %s161_s20 = sand.u32 (!%p141_p9), 1, %s4886_s13  }
  0x10   : > { %179 = vst.msk [vmem:[#allocation2 + $0x28] sm:$0xff] (!%p141_p9), %vm168_vm0, %v4896_v1  ;;  %180 = vst.msk [vmem:[#allocation2 + $0x30] sm:$0xff] (!%p141_p9), %vm168_vm0, %v4896_v1  ;;  %v205_v34 = vld [vmem:[%s5525_s1 + $0x18] sm:$0xff] (!%p141_p9)  ;;  %s3860_s24 = sshll.u32 (!%p141_p9), %s4941_s16, 4  ;;  %s162_s25 = scalar_lea.vmem (!%p141_p9), [#allocation3], %s161_s20 }
  0x11   : > { %181 = vst.msk [vmem:[#allocation2 + $0x38] sm:$0xff] (!%p141_p9), %vm168_vm0, %v4896_v1  ;;  %182 = vst.msk [vmem:[#allocation2 + $0x40] sm:$0xff] (!%p141_p9), %vm168_vm0, %v4896_v1  ;;  %s5481_s29 = scalar_lea.hbm (!%p141_p9), %s5527_s3, %s3860_s24 }
  0x12   : > { %187 = vst.msk [vmem:[#allocation2 + $0x50] sm:$0xff] (!%p141_p9), %vm168_vm0, %v4896_v1  ;;  %188 = vst.msk [vmem:[#allocation2 + $0x58] sm:$0xff] (!%p141_p9), %vm168_vm0, %v4896_v1 }
  0x13   : > { %189 = vst.msk [vmem:[#allocation2 + $0x60] sm:$0xff] (!%p141_p9), %vm168_vm0, %v4896_v1  ;;  %190 = vst.msk [vmem:[#allocation2 + $0x68] sm:$0xff] (!%p141_p9), %vm168_vm0, %v4896_v1 }
  0x14   : > { %195 = vst.msk [vmem:[#allocation2 + $0x78] sm:$0xff] (!%p141_p9), %vm168_vm0, %v4896_v1  ;;  %196 = vst.msk [vmem:[#allocation2 + $0x80] sm:$0xff] (!%p141_p9), %vm168_vm0, %v4896_v1 }
  0x15   : > { %197 = vst.msk [vmem:[#allocation2 + $0x88] sm:$0xff] %vm168_vm0, %v4896_v1  ;;  %198 = vst.msk [vmem:[#allocation2 + $0x90] sm:$0xff] %vm168_vm0, %v4896_v1  ;;  %s164_s26 = scalar_select %p163_p10, %s4941_s16, 1  ;;  %v206_v7 = vld [vmem:[#allocation2] sm:$0xff]  ;;  %v207_v8 = vld [vmem:[#allocation2 + $0x8] sm:$0xff] }
  0x16   : > { %177 = vst.msk [vmem:[#allocation2 + $0x24] sm:$0x1] %vm176_vm1, %v4897_v2  ;;  %185 = vst.msk [vmem:[#allocation2 + $0x4c] sm:$0x1] %vm176_vm1, %v4897_v2  ;;  %v4564_v10 = vpack.c.bf16 %v207_v8, %v206_v7  ;;  %v208_v12 = vld [vmem:[#allocation2 + $0x10] sm:$0xff]  ;;  %v209_v13 = vld [vmem:[#allocation2 + $0x18] sm:$0xff] }
  0x17   : > { %193 = vst.msk [vmem:[#allocation2 + $0x74] sm:$0x1] %vm176_vm1, %v4897_v2  ;;  %201 = vst.msk [vmem:[#allocation2 + $0x9c] sm:$0x1] %vm176_vm1, %v4897_v2  ;;  %s3863_s27 = sshll.u32 %s164_s26, 4  ;;  %v317_v9 = vld [vmem:[#allocation2 + $0x28] sm:$0xff]  ;;  %v4568_v15 = vpack.c.bf16 %v209_v13, %v208_v12 }
  0x18   : > { %s167_s30 = scalar_lea.vmem %s5524_s0, %s3863_s27  ;;  %v318_v11 = vld [vmem:[#allocation2 + $0x30] sm:$0xff]  ;;  %v319_v16 = vld [vmem:[#allocation2 + $0x38] sm:$0xff]  ;;  %v320_v17 = vld [vmem:[#allocation2 + $0x40] sm:$0xff]  ;;  %4565 = vmatprep.subr.bf16.mxu0 %v4564_v10  ;;  %s3635_s26 = sshll.u32 %s162_s25, 4  ;;  %s5483_s26 = int_to_ptr.vmem [resolvable:$true] %s3635_s26 }
  0x19   : > { %v173_v3 = vld [vmem:[%s167_s30] sm:$0xf]  ;;  %v183_v4 = vld [vmem:[%s167_s30 + $0x4] sm:$0xf]  ;;  %v191_v5 = vld [vmem:[%s167_s30 + $0x8] sm:$0xf]  ;;  %v4572_v14 = vpack.c.bf16 %v318_v11, %v317_v9  ;;  %v4576_v18 = vpack.c.bf16 %v320_v17, %v319_v16  ;;  %4567 = vmatpush3.bf16.msra.mxu0 %v4564_v10 }
  0x1a   : > { %175 = vst.msk [vmem:[#allocation2 + $0x20] sm:$0xf] %vm174_vm3, %v173_v3  ;;  %184 = vst.msk [vmem:[#allocation2 + $0x48] sm:$0xf] %vm174_vm3, %v183_v4  ;;  %v199_v6 = vld [vmem:[%s167_s30 + $0xc] sm:$0xf]  ;;  %4569 = vmatprep.subr.bf16.mxu0 %v4568_v15 }
  0x1b   : > { %192 = vst.msk [vmem:[#allocation2 + $0x70] sm:$0xf] %vm174_vm3, %v191_v5  ;;  %200 = vst.msk [vmem:[#allocation2 + $0x98] sm:$0xf] %vm174_vm3, %v199_v6  ;;  %4573 = vmatprep.subr.bf16.mxu1 %v4572_v14  ;;  %v414_v21 = vld [vmem:[#allocation2 + $0x50] sm:$0xff]  ;;  %v415_v22 = vld [vmem:[#allocation2 + $0x58] sm:$0xff] }
  0x1c   : > { %4575 = vmatpush3.bf16.msra.mxu1 %v4572_v14  ;;  %v511_v23 = vld [vmem:[#allocation2 + $0x78] sm:$0xff]  ;;  %v512_v24 = vld [vmem:[#allocation2 + $0x80] sm:$0xff]  ;;  %v4580_v26 = vpack.c.bf16 %v415_v22, %v414_v21  ;;  %v417_v28 = vld [vmem:[#allocation2 + $0x68] sm:$0xff]  ;;  %s3623_s30 = scalar_lea.sflag [#allocation4], %s161_s20  ;;  %s4832_s4 = scalar_lea.vmem %s5483_s26, 16 }
  0x1d   : > { %4577 = vmatprep.subr.bf16.mxu1 %v4576_v18  ;;  %4571 = vmatpush3.bf16.msra.mxu0 %v4568_v15  ;;  %v416_v27 = vld [vmem:[#allocation2 + $0x60] sm:$0xff]  ;;  %v4588_v29 = vpack.c.bf16 %v512_v24, %v511_v23  ;;  %v513_v30 = vld [vmem:[#allocation2 + $0x88] sm:$0xff]  ;;  %v514_v31 = vld [vmem:[#allocation2 + $0x90] sm:$0xff]  ;;  %p4833_p11 = scmp.ne.s32.totalorder %s5483_s26, %s4832_s4  ;;  %s4899_s16 = smov [#allocation3]  }
  0x1e   : > { %v4584_v33 = vpack.c.bf16 %v417_v28, %v416_v27  ;;  %v4592_v35 = vpack.c.bf16 %v514_v31, %v513_v30  ;;  %s4836_s5 = sshll.u32 %s4899_s16, 4  ;;  %s4837_s5 = int_to_ptr.vmem [resolvable:$false] %s4836_s5 }
  0x1f   : > { %p4834_p12 = pnand %p4833_p11, %p4958_p5  ;;  %s4838_s6 = scalar_lea.vmem %s4837_s5, 32 }
  0x20   : > { %4579 = vmatpush3.bf16.msra.mxu1 %v4576_v18  ;;  %p4839_p0 = scmp.lt.s32.totalorder %s5483_s26, %s4837_s5  ;;  %p4840_p1 = scmp.lt.s32.totalorder %s4838_s6, %s4832_s4 }
  0x21   : > { %v210_v19 = vld [vmem:[#allocation2 + $0x20] sm:$0x1f]  ;;  %v321_v20 = vld [vmem:[#allocation2 + $0x48] sm:$0x1f]  ;;  %p4835_p13 = pneg %p4834_p12 }
  0x22   : > { %4124 = vmatprep.subr.msk.mxu0 %vm224_vm4, %v210_v19  ;;  %4140 = vmatprep.subr.msk.mxu1 %vm224_vm4, %v321_v20  ;;  %v418_v36 = vld [vmem:[#allocation2 + $0x70] sm:$0x1f]  ;;  %v515_v37 = vld [vmem:[#allocation2 + $0x98] sm:$0x1f]  ;;  %p4841_p2 = por %p4840_p1, %p4839_p0 }
  0x23   : > { %4125 = vmatpush3.msk.msra.mxu0 %vm224_vm4, %v210_v19 }
  0x24   : > { %4127 = vmatmul.mubr.msk.f32.vlgmr.msra.gmra.mrb[0].mxu0 %vm211_vm2, %v203_v25  ;;  %4141 = vmatpush3.msk.msra.mxu1 %vm224_vm4, %v321_v20  ;;  %p4842_p3 = pnand %p4841_p2, %p4835_p13 }
  0x25   : > { %4581 = vmatprep.subr.bf16.mxu0 %v4580_v26  ;;  %4143 = vmatmul.mubr.msk.f32.vlgmr.msra.gmra.mrb[0].mxu1 %vm211_vm2, %v203_v25 }
  0x26   : > { %4583 = vmatpush3.bf16.msra.mxu0 %v4580_v26  ;;  %4589 = vmatprep.subr.bf16.mxu1 %v4588_v29 }
  0x27   : > { %4591 = vmatpush3.bf16.msra.mxu1 %v4588_v29  ;;  %4129 = vmatprep.mubr.msk.f32.mxu0 %vm211_vm2, %v204_v32 }
  0x28   : > { %4145 = vmatprep.mubr.msk.f32.mxu1 %vm211_vm2, %v204_v32  ;;  %4585 = vmatprep.subr.bf16.mxu0 %v4584_v33 }
  0x29   : > { %4130 = vmatmul.mubr.msk.f32.gmra.mrb[2].mxu0 %vm211_vm2, %v205_v34  ;;  %4146 = vmatmul.mubr.msk.f32.gmra.mrb[2].mxu1 %vm211_vm2, %v205_v34 }
  0x2a   : > { %4587 = vmatpush3.bf16.msra.mxu0 %v4584_v33  ;;  %4593 = vmatprep.subr.bf16.mxu1 %v4592_v35 }
  0x2b   : > { %4595 = vmatpush3.bf16.msra.mxu1 %v4592_v35  ;;  %4156 = vmatprep.subr.msk.mxu0 %vm224_vm4, %v418_v36 }
  0x2c   : > { %4158 = vmatprep.mubr.msk.f32.mxu0 %vm211_vm2, %v4972_v0  ;;  %4172 = vmatprep.subr.msk.mxu1 %vm224_vm4, %v515_v37 }
  0x2d   : > { %4174 = vmatprep.mubr.msk.f32.mxu1 %vm211_vm2, %v4972_v0 }
  0x2e   : > { %4157 = vmatpush3.msk.msra.mxu0 %vm224_vm4, %v418_v36  ;;  %v5056_v36 = vld [vmem:[%s5525_s1 + $0x20] sm:$0xff] }
  0x2f   : > { %4159 = vmatmul.mubr.msk.f32.vlgmr.msra.gmra.mrb[4].mxu0 %vm211_vm2, %v203_v25  ;;  %4173 = vmatpush3.msk.msra.mxu1 %vm224_vm4, %v515_v37 }
  0x30   : > { %4175 = vmatmul.mubr.msk.f32.vlgmr.msra.gmra.mrb[4].mxu1 %vm211_vm2, %v203_v25  ;;  %4161 = vmatprep.mubr.msk.f32.mxu0 %vm211_vm2, %v204_v32 }
  0x31   : > { %4177 = vmatprep.mubr.msk.f32.mxu1 %vm211_vm2, %v204_v32 }
  0x33   : > { %4162 = vmatmul.mubr.msk.f32.gmra.mrb[6].mxu0 %vm211_vm2, %v205_v34 }
  0x34   : > { %4178 = vmatmul.mubr.msk.f32.gmra.mrb[6].mxu1 %vm211_vm2, %v205_v34  ;;  %4190 = vmatprep.mubr.msk.f32.mxu0 %vm211_vm2, %v5056_v36 }
  0x35   : > { %4206 = vmatprep.mubr.msk.f32.mxu1 %vm211_vm2, %v5056_v36 }
  0xf7   : > { %v4128_v38 = vpop.f32.mrb[0].mxu0 }
  0xf8   : > { %v314_v39 = vmax.f32 %v4128_v38, 0.0  ;;  %v294_v40 = vpop.f32.mrb[1].mxu0  ;;  %v4144_v41 = vpop.f32.mrb[0].mxu1 }
  0xf9   : > { %v313_v42 = vmax.f32 %v294_v40, 0.0  ;;  %v411_v43 = vmax.f32 %v4144_v41, 0.0  ;;  %v391_v44 = vpop.f32.mrb[1].mxu1 }
  0xfa   : > { %v410_v45 = vmax.f32 %v391_v44, 0.0  ;;  %v618_v46 = vsel %vm168_vm0, %v314_v39, 0.0 }
  0xfb   : > { %627 = vst.msk [vmem:[#allocation2] sm:$0xff] %vm168_vm0, %v313_v42  ;;  %619 = vadd.xlane.f32.xlu0 %v618_v46  ;;  %v635_v49 = vsel %vm168_vm0, %v411_v43, 0.0 }
  0xfc   : > { %643 = vst.msk [vmem:[#allocation2 + $0x28] sm:$0xff] %vm168_vm0, %v410_v45  ;;  %v4131_v47 = vpop.f32.mrb[2].mxu0  ;;  %v4147_v48 = vpop.f32.mrb[2].mxu1 }
  0xfd   : > { %v316_v50 = vmax.f32 %v4131_v47, 0.0  ;;  %v413_v51 = vmax.f32 %v4147_v48, 0.0  ;;  %v304_v52 = vpop.f32.mrb[3].mxu0  ;;  %v401_v53 = vpop.f32.mrb[3].mxu1 }
  0xfe   : > { %v315_v54 = vmax.f32 %v304_v52, 0.0  ;;  %v412_v55 = vmax.f32 %v401_v53, 0.0 }
  0xff   : > { %v609_v56 = vadd.f32 %v413_v51, %v316_v50  ;;  %636 = vadd.xlane.f32.xlu0 %v635_v49 }
 0x100   : > { %v608_v57 = vadd.f32 %v412_v55, %v315_v54 }
 0x102   : > { %v4160_v58 = vpop.f32.mrb[4].mxu0  ;;  %v684_v41 = vld [vmem:[#allocation2] sm:$0xff] }
 0x103   : > { %v508_v59 = vmax.f32 %v4160_v58, 0.0  ;;  %v488_v60 = vpop.f32.mrb[5].mxu0  ;;  %v4176_v61 = vpop.f32.mrb[4].mxu1  ;;  %v793_v46 = vld [vmem:[#allocation2 + $0x28] sm:$0xff] }
 0x104   : > { %v507_v62 = vmax.f32 %v488_v60, 0.0  ;;  %v585_v63 = vpop.f32.mrb[5].mxu1  ;;  %v605_v31 = vmax.f32 %v4176_v61, 0.0  ;;  %v688_v61 = vld [vmem:[#allocation2 + $0x20] sm:$0x1f] }
 0x105   : > { %v604_v0 = vmax.f32 %v585_v63, 0.0  ;;  %v651_v1 = vsel %vm168_vm0, %v508_v59, 0.0 }
 0x106   : > { %659 = vst.msk [vmem:[#allocation2 + $0x50] sm:$0xff] %vm168_vm0, %v507_v62  ;;  %652 = vadd.xlane.f32.xlu0 %v651_v1  ;;  %v4163_v2 = vpop.f32.mrb[6].mxu0  ;;  %v667_v33 = vsel %vm168_vm0, %v605_v31, 0.0 }
 0x107   : > { %675 = vst.msk [vmem:[#allocation2 + $0x78] sm:$0xff] %vm168_vm0, %v604_v0  ;;  %v510_v3 = vmax.f32 %v4163_v2, 0.0  ;;  %v498_v4 = vpop.f32.mrb[7].mxu0  ;;  %v4179_v5 = vpop.f32.mrb[6].mxu1 }
 0x108   : > { %v509_v6 = vmax.f32 %v498_v4, 0.0  ;;  %v607_v7 = vmax.f32 %v4179_v5, 0.0  ;;  %v595_v8 = vpop.f32.mrb[7].mxu1 }
 0x109   : > { %v611_v9 = vadd.f32 %v609_v56, %v510_v3  ;;  %v606_v10 = vmax.f32 %v595_v8, 0.0 }
 0x10a   : > { %v610_v11 = vadd.f32 %v608_v57, %v509_v6 }
 0x10b   : > { %v613_v12 = vadd.f32 %v611_v9, %v607_v7 }
 0x10c   : > { %v612_v13 = vadd.f32 %v610_v11, %v606_v10 }
 0x10d   : > { %v664_v14 = vsub.f32 %v613_v12, %v607_v7  ;;  %v648_v15 = vsub.f32 %v613_v12, %v510_v3  ;;  %v615_v16 = vsub.f32 %v613_v12, %v316_v50  ;;  %v632_v17 = vsub.f32 %v613_v12, %v413_v51  ;;  %v3717_v3 = vld [vmem:[%s5525_s1 + $0x28] sm:$0xff]  ;;  %v890_v4 = vld [vmem:[#allocation2 + $0x50] sm:$0xff] }
 0x10e   : > { %v614_v18 = vsub.f32 %v612_v13, %v315_v54  ;;  %v631_v19 = vsub.f32 %v612_v13, %v412_v55  ;;  %v647_v20 = vsub.f32 %v612_v13, %v509_v6  ;;  %v663_v21 = vsub.f32 %v612_v13, %v606_v10  ;;  %v797_v7 = vld [vmem:[#allocation2 + $0x48] sm:$0x1f]  ;;  %v3718_v10 = vld [vmem:[%s5525_s1 + $0x30] sm:$0xff]  ;;  %v987_v12 = vld [vmem:[#allocation2 + $0x78] sm:$0xff] }
 0x10f   : > { %v650_v22 = vmul.f32 0.33333334, %v648_v15  ;;  %v617_v23 = vmul.f32 0.33333334, %v615_v16  ;;  %v634_v30 = vmul.f32 0.33333334, %v632_v17 }
 0x110   : > { %v616_v24 = vmul.f32 0.33333334, %v614_v18  ;;  %v633_v25 = vmul.f32 0.33333334, %v631_v19  ;;  %v649_v26 = vmul.f32 0.33333334, %v647_v20 }
 0x111   : > { %v665_v27 = vmul.f32 0.33333334, %v663_v21  ;;  %v655_v28 = vsel %vm168_vm0, %v650_v22, 0.0  ;;  %v623_v29 = vsel %vm168_vm0, %v617_v23, 0.0  ;;  %v639_v32 = vsel %vm168_vm0, %v634_v30, 0.0 }
 0x112   : > { %629 = vst.msk [vmem:[#allocation2 + $0x10] sm:$0xff] %vm168_vm0, %v616_v24  ;;  %645 = vst.msk [vmem:[#allocation2 + $0x38] sm:$0xff] %vm168_vm0, %v633_v25  ;;  %656 = vadd.xlane.f32.xlu0 %v655_v28  ;;  %624 = vadd.xlane.f32.xlu1 %v623_v29  ;;  %v666_v34 = vmul.f32 0.33333334, %v664_v14  ;;  %v3719_v14 = vld [vmem:[%s5525_s1 + $0x38] sm:$0xff] }
 0x113   : > { %661 = vst.msk [vmem:[#allocation2 + $0x60] sm:$0xff] %vm168_vm0, %v649_v26  ;;  %677 = vst.msk [vmem:[#allocation2 + $0x88] sm:$0xff] %vm168_vm0, %v665_v27  ;;  %v894_v18 = vld [vmem:[#allocation2 + $0x70] sm:$0x1f]  ;;  %v991_v19 = vld [vmem:[#allocation2 + $0x98] sm:$0x1f] }
 0x114   : > { %v671_v35 = vsel %vm168_vm0, %v666_v34, 0.0 }
 0x116   : > { %640 = vadd.xlane.f32.xlu1 %v639_v32 }
 0x119   : > { %v686_v57 = vld [vmem:[#allocation2 + $0x10] sm:$0xff]  ;;  %v795_v63 = vld [vmem:[#allocation2 + $0x38] sm:$0xff] }
 0x11a   : > { %668 = vadd.xlane.f32.xlu1 %v667_v33  ;;  %v892_v8 = vld [vmem:[#allocation2 + $0x60] sm:$0xff]  ;;  %v989_v15 = vld [vmem:[#allocation2 + $0x88] sm:$0xff] }
 0x11e   : > { %672 = vadd.xlane.f32.xlu1 %v671_v35 }
 0x188   : > { %v620_v37 = vpop.xlane.xlu0 %619 }
 0x189   : > { %v622_v38 = vmul.f32 0.0625, %v620_v37 }
 0x18b   : > { %628 = vst.msk [vmem:[#allocation2 + $0x8] sm:$0xff] %vm168_vm0, %v622_v38 }
 0x18c   : > { %v637_v39 = vpop.xlane.xlu0 %636 }
 0x18d   : > { %v638_v40 = vmul.f32 0.0625, %v637_v39 }
 0x18f   : > { %644 = vst.msk [vmem:[#allocation2 + $0x30] sm:$0xff] %vm168_vm0, %v638_v40 }
 0x192   : > { %v685_v42 = vld [vmem:[#allocation2 + $0x8] sm:$0xff] }
 0x193   : > { %v653_v43 = vpop.xlane.xlu0 %652  ;;  %v4596_v44 = vpack.c.bf16 %v685_v42, %v684_v41 }
 0x194   : > { %v654_v45 = vmul.f32 0.0625, %v653_v43 }
 0x195   : > { %4597 = vmatprep.subr.bf16.mxu0 %v4596_v44 }
 0x196   : > { %660 = vst.msk [vmem:[#allocation2 + $0x58] sm:$0xff] %vm168_vm0, %v654_v45  ;;  %4599 = vmatpush3.bf16.msra.mxu0 %v4596_v44  ;;  %v794_v47 = vld [vmem:[#allocation2 + $0x30] sm:$0xff] }
 0x197   : > { %v4604_v48 = vpack.c.bf16 %v794_v47, %v793_v46 }
 0x199   : > { %4605 = vmatprep.subr.bf16.mxu1 %v4604_v48 }
 0x19a   : > { %4607 = vmatpush3.bf16.msra.mxu1 %v4604_v48 }
 0x19d   : > { %v891_v1 = vld [vmem:[#allocation2 + $0x58] sm:$0xff] }
 0x19e   : > { %v4612_v6 = vpack.c.bf16 %v891_v1, %v890_v4 }
 0x19f   : > { %v657_v49 = vpop.xlane.xlu0 %656  ;;  %v625_v50 = vpop.xlane.xlu1 %624 }
 0x1a0   : > { %v658_v51 = vmul.f32 0.0625, %v657_v49  ;;  %v626_v52 = vmul.f32 0.0625, %v625_v50 }
 0x1a2   : > { %662 = vst.msk [vmem:[#allocation2 + $0x68] sm:$0xff] %vm168_vm0, %v658_v51  ;;  %630 = vst.msk [vmem:[#allocation2 + $0x18] sm:$0xff] %vm168_vm0, %v626_v52 }
 0x1a3   : > { %v641_v53 = vpop.xlane.xlu1 %640 }
 0x1a4   : > { %v642_v54 = vmul.f32 0.0625, %v641_v53 }
 0x1a6   : > { %646 = vst.msk [vmem:[#allocation2 + $0x40] sm:$0xff] %vm168_vm0, %v642_v54 }
 0x1a7   : > { %v669_v55 = vpop.xlane.xlu1 %668 }
 0x1a8   : > { %v670_v56 = vmul.f32 0.0625, %v669_v55 }
 0x1a9   : > { %v687_v58 = vld [vmem:[#allocation2 + $0x18] sm:$0xff]  ;;  %v893_v5 = vld [vmem:[#allocation2 + $0x68] sm:$0xff] }
 0x1aa   : > { %676 = vst.msk [vmem:[#allocation2 + $0x80] sm:$0xff] %vm168_vm0, %v670_v56  ;;  %v4600_v59 = vpack.c.bf16 %v687_v58, %v686_v57  ;;  %v4616_v11 = vpack.c.bf16 %v893_v5, %v892_v8 }
 0x1ab   : > { %v673_v60 = vpop.xlane.xlu1 %672 }
 0x1ac   : > { %v674_v62 = vmul.f32 0.0625, %v673_v60  ;;  %4601 = vmatprep.subr.bf16.mxu0 %v4600_v59 }
 0x1ad   : > { %4603 = vmatpush3.bf16.msra.mxu0 %v4600_v59  ;;  %v796_v0 = vld [vmem:[#allocation2 + $0x40] sm:$0xff] }
 0x1ae   : > { %678 = vst.msk [vmem:[#allocation2 + $0x90] sm:$0xff] %vm168_vm0, %v674_v62  ;;  %4188 = vmatprep.subr.msk.mxu0 %vm224_vm4, %v688_v61  ;;  %v4608_v2 = vpack.c.bf16 %v796_v0, %v795_v63 }
 0x1b0   : > { %4609 = vmatprep.subr.bf16.mxu1 %v4608_v2 }
 0x1b1   : > { %4189 = vmatpush3.msk.msra.mxu0 %vm224_vm4, %v688_v61  ;;  %4611 = vmatpush3.bf16.msra.mxu1 %v4608_v2  ;;  %v988_v9 = vld [vmem:[#allocation2 + $0x80] sm:$0xff] }
 0x1b2   : > { %4191 = vmatmul.mubr.msk.f32.vlgmr.msra.gmra.mrb[8].mxu0 %vm211_vm2, %v3717_v3  ;;  %4613 = vmatprep.subr.bf16.mxu0 %v4612_v6  ;;  %v4620_v13 = vpack.c.bf16 %v988_v9, %v987_v12 }
 0x1b3   : > { %4615 = vmatpush3.bf16.msra.mxu0 %v4612_v6  ;;  %4204 = vmatprep.subr.msk.mxu1 %vm224_vm4, %v797_v7 }
 0x1b4   : > { %4617 = vmatprep.subr.bf16.mxu0 %v4616_v11  ;;  %4193 = vmatprep.mubr.msk.f32.mxu0 %vm211_vm2, %v3718_v10 }
 0x1b5   : > { %4205 = vmatpush3.msk.msra.mxu1 %vm224_vm4, %v797_v7  ;;  %v990_v16 = vld [vmem:[#allocation2 + $0x90] sm:$0xff] }
 0x1b6   : > { %4207 = vmatmul.mubr.msk.f32.vlgmr.msra.gmra.mrb[8].mxu1 %vm211_vm2, %v3717_v3  ;;  %4621 = vmatprep.subr.bf16.mxu1 %v4620_v13  ;;  %v4624_v17 = vpack.c.bf16 %v990_v16, %v989_v15 }
 0x1b7   : > { %4619 = vmatpush3.bf16.msra.mxu0 %v4616_v11  ;;  %4623 = vmatpush3.bf16.msra.mxu1 %v4620_v13 }
 0x1b8   : > { %4194 = vmatmul.mubr.msk.f32.gmra.mrb[10].mxu0 %vm211_vm2, %v3719_v14  ;;  %4625 = vmatprep.subr.bf16.mxu1 %v4624_v17 }
 0x1b9   : > { %4209 = vmatprep.mubr.msk.f32.mxu1 %vm211_vm2, %v3718_v10  ;;  %4220 = vmatprep.subr.msk.mxu0 %vm224_vm4, %v894_v18 }
 0x1ba   : > { %4210 = vmatmul.mubr.msk.f32.gmra.mrb[10].mxu1 %vm211_vm2, %v3719_v14  ;;  %4222 = vmatprep.mubr.msk.f32.mxu0 %vm211_vm2, %v5056_v36 }
 0x1bb   : > { %4221 = vmatpush3.msk.msra.mxu0 %vm224_vm4, %v894_v18  ;;  %4627 = vmatpush3.bf16.msra.mxu1 %v4624_v17  ;;  %v5122_v18 = vld [vmem:[%s5525_s1 + $0x40] sm:$0xff] }
 0x1bc   : > { %4223 = vmatmul.mubr.msk.f32.vlgmr.msra.gmra.mrb[12].mxu0 %vm211_vm2, %v3717_v3  ;;  %4236 = vmatprep.subr.msk.mxu1 %vm224_vm4, %v991_v19 }
 0x1bd   : > { %4225 = vmatprep.mubr.msk.f32.mxu0 %vm211_vm2, %v3718_v10  ;;  %4238 = vmatprep.mubr.msk.f32.mxu1 %vm211_vm2, %v5056_v36 }
 0x1bf   : > { %4237 = vmatpush3.msk.msra.mxu1 %vm224_vm4, %v991_v19 }
 0x1c0   : > { %4226 = vmatmul.mubr.msk.f32.gmra.mrb[14].mxu0 %vm211_vm2, %v3719_v14  ;;  %4239 = vmatmul.mubr.msk.f32.vlgmr.msra.gmra.mrb[12].mxu1 %vm211_vm2, %v3717_v3 }
 0x1c1   : > { %4241 = vmatprep.mubr.msk.f32.mxu1 %vm211_vm2, %v3718_v10  ;;  %4254 = vmatprep.mubr.msk.f32.mxu0 %vm211_vm2, %v5122_v18 }
 0x1c4   : > { %4242 = vmatmul.mubr.msk.f32.gmra.mrb[14].mxu1 %vm211_vm2, %v3719_v14 }
 0x1c5   : > { %4270 = vmatprep.mubr.msk.f32.mxu1 %vm211_vm2, %v5122_v18 }
 0x285   : > { %v4192_v20 = vpop.f32.mrb[8].mxu0 }
 0x286   : > { %v790_v21 = vmax.f32 %v4192_v20, 0.0  ;;  %v770_v22 = vpop.f32.mrb[9].mxu0 }
 0x287   : > { %v789_v23 = vmax.f32 %v770_v22, 0.0 }
 0x288   : > { %v1094_v24 = vsel %vm168_vm0, %v790_v21, 0.0 }
 0x289   : > { %1102 = vst.msk [vmem:[#allocation2] sm:$0xff] %vm168_vm0, %v789_v23  ;;  %v4208_v25 = vpop.f32.mrb[8].mxu1  ;;  %1095 = vadd.xlane.f32.xlu0 %v1094_v24 }
 0x28a   : > { %v887_v26 = vmax.f32 %v4208_v25, 0.0  ;;  %v867_v27 = vpop.f32.mrb[9].mxu1 }
 0x28b   : > { %v886_v28 = vmax.f32 %v867_v27, 0.0  ;;  %v4195_v29 = vpop.f32.mrb[10].mxu0 }
 0x28c   : > { %v792_v30 = vmax.f32 %v4195_v29, 0.0  ;;  %v1110_v31 = vsel %vm168_vm0, %v887_v26, 0.0  ;;  %v780_v32 = vpop.f32.mrb[11].mxu0 }
 0x28d   : > { %1118 = vst.msk [vmem:[#allocation2 + $0x28] sm:$0xff] %vm168_vm0, %v886_v28  ;;  %1111 = vadd.xlane.f32.xlu1 %v1110_v31  ;;  %v791_v33 = vmax.f32 %v780_v32, 0.0  ;;  %v4211_v34 = vpop.f32.mrb[10].mxu1 }
 0x28e   : > { %v889_v35 = vmax.f32 %v4211_v34, 0.0  ;;  %v877_v36 = vpop.f32.mrb[11].mxu1 }
 0x28f   : > { %v888_v37 = vmax.f32 %v877_v36, 0.0  ;;  %v4224_v38 = vpop.f32.mrb[12].mxu0 }
 0x290   : > { %v1085_v39 = vadd.f32 %v889_v35, %v792_v30  ;;  %v964_v40 = vpop.f32.mrb[13].mxu0  ;;  %v984_v2 = vmax.f32 %v4224_v38, 0.0  ;;  %v1159_v23 = vld [vmem:[#allocation2] sm:$0xff] }
 0x291   : > { %v1084_v41 = vadd.f32 %v888_v37, %v791_v33  ;;  %v983_v42 = vmax.f32 %v964_v40, 0.0 }
 0x292   : > { %v1126_v13 = vsel %vm168_vm0, %v984_v2, 0.0 }
 0x293   : > { %1134 = vst.msk [vmem:[#allocation2 + $0x50] sm:$0xff] %vm168_vm0, %v983_v42  ;;  %v4227_v43 = vpop.f32.mrb[14].mxu0  ;;  %v4240_v44 = vpop.f32.mrb[12].mxu1 }
 0x294   : > { %v986_v45 = vmax.f32 %v4227_v43, 0.0  ;;  %v974_v46 = vpop.f32.mrb[15].mxu0  ;;  %v1061_v47 = vpop.f32.mrb[13].mxu1  ;;  %v1081_v8 = vmax.f32 %v4240_v44, 0.0  ;;  %v1268_v26 = vld [vmem:[#allocation2 + $0x28] sm:$0xff] }
 0x295   : > { %v985_v48 = vmax.f32 %v974_v46, 0.0  ;;  %v1080_v49 = vmax.f32 %v1061_v47, 0.0  ;;  %v1163_v47 = vld [vmem:[#allocation2 + $0x20] sm:$0x1f] }
 0x296   : > { %v1087_v50 = vadd.f32 %v1085_v39, %v986_v45  ;;  %v1142_v12 = vsel %vm168_vm0, %v1081_v8, 0.0 }
 0x297   : > { %v1086_v51 = vadd.f32 %v1084_v41, %v985_v48  ;;  %1150 = vst.msk [vmem:[#allocation2 + $0x78] sm:$0xff] %vm168_vm0, %v1080_v49  ;;  %v4243_v52 = vpop.f32.mrb[14].mxu1 }
 0x298   : > { %v1083_v53 = vmax.f32 %v4243_v52, 0.0  ;;  %v1071_v54 = vpop.f32.mrb[15].mxu1 }
 0x299   : > { %v1082_v55 = vmax.f32 %v1071_v54, 0.0 }
 0x29a   : > { %v1089_v56 = vadd.f32 %v1087_v50, %v1083_v53  ;;  %v1365_v52 = vld [vmem:[#allocation2 + $0x50] sm:$0xff] }
 0x29b   : > { %v1088_v57 = vadd.f32 %v1086_v51, %v1082_v55  ;;  %v3741_v51 = vld [vmem:[%s5525_s1 + $0x48] sm:$0xff] }
 0x29c   : > { %v1139_v58 = vsub.f32 %v1089_v56, %v1083_v53  ;;  %v1107_v59 = vsub.f32 %v1089_v56, %v889_v35  ;;  %v1091_v60 = vsub.f32 %v1089_v56, %v792_v30  ;;  %v1123_v61 = vsub.f32 %v1089_v56, %v986_v45 }
 0x29d   : > { %v1090_v62 = vsub.f32 %v1088_v57, %v791_v33  ;;  %v1106_v63 = vsub.f32 %v1088_v57, %v888_v37  ;;  %v1122_v0 = vsub.f32 %v1088_v57, %v985_v48  ;;  %v1138_v1 = vsub.f32 %v1088_v57, %v1082_v55  ;;  %v1272_v48 = vld [vmem:[#allocation2 + $0x48] sm:$0x1f] }
 0x29e   : > { %v1109_v3 = vmul.f32 0.33333334, %v1107_v59  ;;  %v1093_v4 = vmul.f32 0.33333334, %v1091_v60  ;;  %v1141_v14 = vmul.f32 0.33333334, %v1139_v58 }
 0x29f   : > { %v1092_v5 = vmul.f32 0.33333334, %v1090_v62  ;;  %v1108_v6 = vmul.f32 0.33333334, %v1106_v63  ;;  %v1124_v7 = vmul.f32 0.33333334, %v1122_v0 }
 0x2a0   : > { %v1140_v9 = vmul.f32 0.33333334, %v1138_v1  ;;  %v1114_v10 = vsel %vm168_vm0, %v1109_v3, 0.0  ;;  %v1098_v11 = vsel %vm168_vm0, %v1093_v4, 0.0  ;;  %v1125_v15 = vmul.f32 0.33333334, %v1123_v61 }
 0x2a1   : > { %1104 = vst.msk [vmem:[#allocation2 + $0x10] sm:$0xff] %vm168_vm0, %v1092_v5  ;;  %1120 = vst.msk [vmem:[#allocation2 + $0x38] sm:$0xff] %vm168_vm0, %v1108_v6  ;;  %1115 = vadd.xlane.f32.xlu1 %v1114_v10  ;;  %1099 = vadd.xlane.f32.xlu0 %v1098_v11  ;;  %v1146_v16 = vsel %vm168_vm0, %v1141_v14, 0.0  ;;  %v1462_v53 = vld [vmem:[#allocation2 + $0x78] sm:$0xff]  ;;  %v3742_v62 = vld [vmem:[%s5525_s1 + $0x50] sm:$0xff] }
 0x2a2   : > { %1136 = vst.msk [vmem:[#allocation2 + $0x60] sm:$0xff] %vm168_vm0, %v1124_v7  ;;  %1152 = vst.msk [vmem:[#allocation2 + $0x88] sm:$0xff] %vm168_vm0, %v1140_v9  ;;  %v1130_v17 = vsel %vm168_vm0, %v1125_v15, 0.0  ;;  %v3743_v63 = vld [vmem:[%s5525_s1 + $0x58] sm:$0xff]  ;;  %v1369_v0 = vld [vmem:[#allocation2 + $0x70] sm:$0x1f] }
 0x2a3   : > { %v1466_v1 = vld [vmem:[#allocation2 + $0x98] sm:$0x1f] }
 0x2a5   : > { %1143 = vadd.xlane.f32.xlu1 %v1142_v12  ;;  %1127 = vadd.xlane.f32.xlu0 %v1126_v13 }
 0x2a8   : > { %v1161_v41 = vld [vmem:[#allocation2 + $0x10] sm:$0xff]  ;;  %v1270_v43 = vld [vmem:[#allocation2 + $0x38] sm:$0xff] }
 0x2a9   : > { %1147 = vadd.xlane.f32.xlu1 %v1146_v16  ;;  %1131 = vadd.xlane.f32.xlu0 %v1130_v17  ;;  %v1367_v54 = vld [vmem:[#allocation2 + $0x60] sm:$0xff]  ;;  %v1464_v58 = vld [vmem:[#allocation2 + $0x88] sm:$0xff] }
 0x316   : > { %v1096_v19 = vpop.xlane.xlu0 %1095 }
 0x317   : > { %v1097_v20 = vmul.f32 0.0625, %v1096_v19 }
 0x319   : > { %1103 = vst.msk [vmem:[#allocation2 + $0x8] sm:$0xff] %vm168_vm0, %v1097_v20 }
 0x31a   : > { %v1112_v21 = vpop.xlane.xlu1 %1111 }
 0x31b   : > { %v1113_v22 = vmul.f32 0.0625, %v1112_v21 }
 0x31d   : > { %1119 = vst.msk [vmem:[#allocation2 + $0x30] sm:$0xff] %vm168_vm0, %v1113_v22 }
 0x320   : > { %v1160_v24 = vld [vmem:[#allocation2 + $0x8] sm:$0xff] }
 0x321   : > { %v4628_v25 = vpack.c.bf16 %v1160_v24, %v1159_v23 }
 0x323   : > { %4629 = vmatprep.subr.bf16.mxu0 %v4628_v25 }
 0x324   : > { %4631 = vmatpush3.bf16.msra.mxu0 %v4628_v25  ;;  %v1269_v27 = vld [vmem:[#allocation2 + $0x30] sm:$0xff] }
 0x325   : > { %v4636_v28 = vpack.c.bf16 %v1269_v27, %v1268_v26 }
 0x327   : > { %4637 = vmatprep.subr.bf16.mxu1 %v4636_v28 }
 0x328   : > { %4639 = vmatpush3.bf16.msra.mxu1 %v4636_v28 }
 0x32e   : > { %v1116_v29 = vpop.xlane.xlu1 %1115  ;;  %v1100_v30 = vpop.xlane.xlu0 %1099 }
 0x32f   : > { %v1117_v31 = vmul.f32 0.0625, %v1116_v29  ;;  %v1101_v32 = vmul.f32 0.0625, %v1100_v30 }
 0x331   : > { %1121 = vst.msk [vmem:[#allocation2 + $0x40] sm:$0xff] %vm168_vm0, %v1117_v31  ;;  %1105 = vst.msk [vmem:[#allocation2 + $0x18] sm:$0xff] %vm168_vm0, %v1101_v32 }
 0x332   : > { %v1144_v33 = vpop.xlane.xlu1 %1143  ;;  %v1128_v34 = vpop.xlane.xlu0 %1127 }
 0x333   : > { %v1145_v35 = vmul.f32 0.0625, %v1144_v33  ;;  %v1129_v36 = vmul.f32 0.0625, %v1128_v34 }
 0x335   : > { %1151 = vst.msk [vmem:[#allocation2 + $0x80] sm:$0xff] %vm168_vm0, %v1145_v35  ;;  %1135 = vst.msk [vmem:[#allocation2 + $0x58] sm:$0xff] %vm168_vm0, %v1129_v36 }
 0x336   : > { %v1148_v37 = vpop.xlane.xlu1 %1147  ;;  %v1132_v38 = vpop.xlane.xlu0 %1131 }
 0x337   : > { %v1149_v39 = vmul.f32 0.0625, %v1148_v37  ;;  %v1133_v40 = vmul.f32 0.0625, %v1132_v38 }
 0x338   : > { %v1162_v42 = vld [vmem:[#allocation2 + $0x18] sm:$0xff]  ;;  %v1271_v44 = vld [vmem:[#allocation2 + $0x40] sm:$0xff] }
 0x339   : > { %1153 = vst.msk [vmem:[#allocation2 + $0x90] sm:$0xff] %vm168_vm0, %v1149_v39  ;;  %1137 = vst.msk [vmem:[#allocation2 + $0x68] sm:$0xff] %vm168_vm0, %v1133_v40  ;;  %v4632_v45 = vpack.c.bf16 %v1162_v42, %v1161_v41  ;;  %v4640_v46 = vpack.c.bf16 %v1271_v44, %v1270_v43 }
 0x33b   : > { %4633 = vmatprep.subr.bf16.mxu0 %v4632_v45  ;;  %4641 = vmatprep.subr.bf16.mxu1 %v4640_v46 }
 0x33c   : > { %4635 = vmatpush3.bf16.msra.mxu0 %v4632_v45  ;;  %4643 = vmatpush3.bf16.msra.mxu1 %v4640_v46  ;;  %v1366_v49 = vld [vmem:[#allocation2 + $0x58] sm:$0xff]  ;;  %v1463_v50 = vld [vmem:[#allocation2 + $0x80] sm:$0xff] }
 0x33d   : > { %4252 = vmatprep.subr.msk.mxu0 %vm224_vm4, %v1163_v47  ;;  %4268 = vmatprep.subr.msk.mxu1 %vm224_vm4, %v1272_v48  ;;  %v4644_v55 = vpack.c.bf16 %v1366_v49, %v1365_v52  ;;  %v4652_v56 = vpack.c.bf16 %v1463_v50, %v1462_v53 }
 0x340   : > { %4253 = vmatpush3.msk.msra.mxu0 %vm224_vm4, %v1163_v47  ;;  %4269 = vmatpush3.msk.msra.mxu1 %vm224_vm4, %v1272_v48  ;;  %v1368_v57 = vld [vmem:[#allocation2 + $0x68] sm:$0xff]  ;;  %v1465_v59 = vld [vmem:[#allocation2 + $0x90] sm:$0xff] }
 0x341   : > { %4255 = vmatmul.mubr.msk.f32.vlgmr.msra.gmra.mrb[16].mxu0 %vm211_vm2, %v3741_v51  ;;  %4271 = vmatmul.mubr.msk.f32.vlgmr.msra.gmra.mrb[16].mxu1 %vm211_vm2, %v3741_v51  ;;  %v4648_v60 = vpack.c.bf16 %v1368_v57, %v1367_v54  ;;  %v4656_v61 = vpack.c.bf16 %v1465_v59, %v1464_v58 }
 0x342   : > { %4645 = vmatprep.subr.bf16.mxu0 %v4644_v55  ;;  %4653 = vmatprep.subr.bf16.mxu1 %v4652_v56 }
 0x343   : > { %4647 = vmatpush3.bf16.msra.mxu0 %v4644_v55  ;;  %4655 = vmatpush3.bf16.msra.mxu1 %v4652_v56 }
 0x344   : > { %4649 = vmatprep.subr.bf16.mxu0 %v4648_v60  ;;  %4657 = vmatprep.subr.bf16.mxu1 %v4656_v61 }
 0x345   : > { %4257 = vmatprep.mubr.msk.f32.mxu0 %vm211_vm2, %v3742_v62  ;;  %4273 = vmatprep.mubr.msk.f32.mxu1 %vm211_vm2, %v3742_v62 }
 0x346   : > { %4258 = vmatmul.mubr.msk.f32.gmra.mrb[18].mxu0 %vm211_vm2, %v3743_v63  ;;  %4274 = vmatmul.mubr.msk.f32.gmra.mrb[18].mxu1 %vm211_vm2, %v3743_v63 }
 0x347   : > { %4651 = vmatpush3.bf16.msra.mxu0 %v4648_v60  ;;  %4659 = vmatpush3.bf16.msra.mxu1 %v4656_v61 }
 0x348   : > { %4284 = vmatprep.subr.msk.mxu0 %vm224_vm4, %v1369_v0  ;;  %4286 = vmatprep.mubr.msk.f32.mxu0 %vm211_vm2, %v5122_v18 }
 0x349   : > { %4300 = vmatprep.subr.msk.mxu1 %vm224_vm4, %v1466_v1  ;;  %4302 = vmatprep.mubr.msk.f32.mxu1 %vm211_vm2, %v5122_v18 }
 0x34b   : > { %4285 = vmatpush3.msk.msra.mxu0 %vm224_vm4, %v1369_v0  ;;  %4301 = vmatpush3.msk.msra.mxu1 %vm224_vm4, %v1466_v1  ;;  %v5188_v0 = vld [vmem:[%s5525_s1 + $0x60] sm:$0xff] }
 0x34c   : > { %4287 = vmatmul.mubr.msk.f32.vlgmr.msra.gmra.mrb[20].mxu0 %vm211_vm2, %v3741_v51  ;;  %4303 = vmatmul.mubr.msk.f32.vlgmr.msra.gmra.mrb[20].mxu1 %vm211_vm2, %v3741_v51 }
 0x34d   : > { %4289 = vmatprep.mubr.msk.f32.mxu0 %vm211_vm2, %v3742_v62  ;;  %4305 = vmatprep.mubr.msk.f32.mxu1 %vm211_vm2, %v3742_v62 }
 0x350   : > { %4290 = vmatmul.mubr.msk.f32.gmra.mrb[22].mxu0 %vm211_vm2, %v3743_v63  ;;  %4306 = vmatmul.mubr.msk.f32.gmra.mrb[22].mxu1 %vm211_vm2, %v3743_v63 }
 0x351   : > { %4318 = vmatprep.mubr.msk.f32.mxu0 %vm211_vm2, %v5188_v0  ;;  %4334 = vmatprep.mubr.msk.f32.mxu1 %vm211_vm2, %v5188_v0 }
 0x414   : > { %v4256_v2 = vpop.f32.mrb[16].mxu0  ;;  %v4272_v3 = vpop.f32.mrb[16].mxu1 }
 0x415   : > { %v1265_v4 = vmax.f32 %v4256_v2, 0.0  ;;  %v1362_v5 = vmax.f32 %v4272_v3, 0.0  ;;  %v1245_v6 = vpop.f32.mrb[17].mxu0  ;;  %v1342_v7 = vpop.f32.mrb[17].mxu1 }
 0x416   : > { %v1264_v8 = vmax.f32 %v1245_v6, 0.0  ;;  %v1361_v9 = vmax.f32 %v1342_v7, 0.0 }
 0x417   : > { %v1585_v10 = vsel %vm168_vm0, %v1362_v5, 0.0  ;;  %v1569_v11 = vsel %vm168_vm0, %v1265_v4, 0.0 }
 0x418   : > { %1577 = vst.msk [vmem:[#allocation2] sm:$0xff] %vm168_vm0, %v1264_v8  ;;  %1593 = vst.msk [vmem:[#allocation2 + $0x28] sm:$0xff] %vm168_vm0, %v1361_v9  ;;  %1586 = vadd.xlane.f32.xlu1 %v1585_v10  ;;  %1570 = vadd.xlane.f32.xlu0 %v1569_v11 }
 0x419   : > { %v4259_v12 = vpop.f32.mrb[18].mxu0  ;;  %v4275_v13 = vpop.f32.mrb[18].mxu1 }
 0x41a   : > { %v1267_v14 = vmax.f32 %v4259_v12, 0.0  ;;  %v1364_v15 = vmax.f32 %v4275_v13, 0.0  ;;  %v1255_v16 = vpop.f32.mrb[19].mxu0  ;;  %v1352_v17 = vpop.f32.mrb[19].mxu1 }
 0x41b   : > { %v1266_v18 = vmax.f32 %v1255_v16, 0.0  ;;  %v1363_v19 = vmax.f32 %v1352_v17, 0.0 }
 0x41c   : > { %v1560_v20 = vadd.f32 %v1364_v15, %v1267_v14 }
 0x41d   : > { %v1559_v21 = vadd.f32 %v1363_v19, %v1266_v18 }
 0x41f   : > { %v4288_v22 = vpop.f32.mrb[20].mxu0  ;;  %v4304_v23 = vpop.f32.mrb[20].mxu1  ;;  %v1634_v5 = vld [vmem:[#allocation2] sm:$0xff]  ;;  %v1743_v7 = vld [vmem:[#allocation2 + $0x28] sm:$0xff] }
 0x420   : > { %v1439_v24 = vpop.f32.mrb[21].mxu0  ;;  %v1536_v25 = vpop.f32.mrb[21].mxu1  ;;  %v1459_v48 = vmax.f32 %v4288_v22, 0.0  ;;  %v1556_v54 = vmax.f32 %v4304_v23, 0.0 }
 0x421   : > { %v1458_v26 = vmax.f32 %v1439_v24, 0.0  ;;  %v1555_v27 = vmax.f32 %v1536_v25, 0.0 }
 0x422   : > { %v1617_v58 = vsel %vm168_vm0, %v1556_v54, 0.0  ;;  %v1601_v59 = vsel %vm168_vm0, %v1459_v48, 0.0 }
 0x423   : > { %1609 = vst.msk [vmem:[#allocation2 + $0x50] sm:$0xff] %vm168_vm0, %v1458_v26  ;;  %1625 = vst.msk [vmem:[#allocation2 + $0x78] sm:$0xff] %vm168_vm0, %v1555_v27  ;;  %v4291_v28 = vpop.f32.mrb[22].mxu0  ;;  %v4307_v29 = vpop.f32.mrb[22].mxu1 }
 0x424   : > { %v1461_v30 = vmax.f32 %v4291_v28, 0.0  ;;  %v1449_v31 = vpop.f32.mrb[23].mxu0  ;;  %v1558_v32 = vmax.f32 %v4307_v29, 0.0  ;;  %v1546_v33 = vpop.f32.mrb[23].mxu1  ;;  %v1638_v29 = vld [vmem:[#allocation2 + $0x20] sm:$0x1f] }
 0x425   : > { %v1460_v34 = vmax.f32 %v1449_v31, 0.0  ;;  %v1557_v35 = vmax.f32 %v1546_v33, 0.0  ;;  %v3765_v33 = vld [vmem:[%s5525_s1 + $0x68] sm:$0xff] }
 0x426   : > { %v1562_v36 = vadd.f32 %v1560_v20, %v1461_v30 }
 0x427   : > { %v1561_v37 = vadd.f32 %v1559_v21, %v1460_v34 }
 0x428   : > { %v1564_v38 = vadd.f32 %v1562_v36, %v1558_v32 }
 0x429   : > { %v1563_v39 = vadd.f32 %v1561_v37, %v1557_v35 }
 0x42a   : > { %v1614_v40 = vsub.f32 %v1564_v38, %v1558_v32  ;;  %v1582_v41 = vsub.f32 %v1564_v38, %v1364_v15  ;;  %v1566_v42 = vsub.f32 %v1564_v38, %v1267_v14  ;;  %v1598_v43 = vsub.f32 %v1564_v38, %v1461_v30  ;;  %v1747_v30 = vld [vmem:[#allocation2 + $0x48] sm:$0x1f] }
 0x42b   : > { %v1565_v44 = vsub.f32 %v1563_v39, %v1266_v18  ;;  %v1581_v45 = vsub.f32 %v1563_v39, %v1363_v19  ;;  %v1597_v46 = vsub.f32 %v1563_v39, %v1460_v34  ;;  %v1613_v47 = vsub.f32 %v1563_v39, %v1557_v35  ;;  %v1840_v34 = vld [vmem:[#allocation2 + $0x50] sm:$0xff]  ;;  %v1937_v35 = vld [vmem:[#allocation2 + $0x78] sm:$0xff] }
 0x42c   : > { %v1584_v49 = vmul.f32 0.33333334, %v1582_v41  ;;  %v1568_v50 = vmul.f32 0.33333334, %v1566_v42  ;;  %v1616_v60 = vmul.f32 0.33333334, %v1614_v40 }
 0x42d   : > { %v1567_v51 = vmul.f32 0.33333334, %v1565_v44  ;;  %v1583_v52 = vmul.f32 0.33333334, %v1581_v45  ;;  %v1599_v53 = vmul.f32 0.33333334, %v1597_v46 }
 0x42e   : > { %v1615_v55 = vmul.f32 0.33333334, %v1613_v47  ;;  %v1589_v56 = vsel %vm168_vm0, %v1584_v49, 0.0  ;;  %v1573_v57 = vsel %vm168_vm0, %v1568_v50, 0.0  ;;  %v1600_v61 = vmul.f32 0.33333334, %v1598_v43 }
 0x42f   : > { %1579 = vst.msk [vmem:[#allocation2 + $0x10] sm:$0xff] %vm168_vm0, %v1567_v51  ;;  %1595 = vst.msk [vmem:[#allocation2 + $0x38] sm:$0xff] %vm168_vm0, %v1583_v52  ;;  %1590 = vadd.xlane.f32.xlu1 %v1589_v56  ;;  %1574 = vadd.xlane.f32.xlu0 %v1573_v57  ;;  %v1621_v62 = vsel %vm168_vm0, %v1616_v60, 0.0  ;;  %v3766_v44 = vld [vmem:[%s5525_s1 + $0x70] sm:$0xff]  ;;  %v3767_v45 = vld [vmem:[%s5525_s1 + $0x78] sm:$0xff] }
 0x430   : > { %1611 = vst.msk [vmem:[#allocation2 + $0x60] sm:$0xff] %vm168_vm0, %v1599_v53  ;;  %1627 = vst.msk [vmem:[#allocation2 + $0x88] sm:$0xff] %vm168_vm0, %v1615_v55  ;;  %v1605_v63 = vsel %vm168_vm0, %v1600_v61, 0.0  ;;  %v1844_v46 = vld [vmem:[#allocation2 + $0x70] sm:$0x1f] }
 0x431   : > { %v1941_v47 = vld [vmem:[#allocation2 + $0x98] sm:$0x1f] }
 0x433   : > { %1618 = vadd.xlane.f32.xlu1 %v1617_v58  ;;  %1602 = vadd.xlane.f32.xlu0 %v1601_v59 }
 0x436   : > { %v1636_v23 = vld [vmem:[#allocation2 + $0x10] sm:$0xff]  ;;  %v1745_v25 = vld [vmem:[#allocation2 + $0x38] sm:$0xff] }
 0x437   : > { %1622 = vadd.xlane.f32.xlu1 %v1621_v62  ;;  %1606 = vadd.xlane.f32.xlu0 %v1605_v63  ;;  %v1842_v36 = vld [vmem:[#allocation2 + $0x60] sm:$0xff]  ;;  %v1939_v40 = vld [vmem:[#allocation2 + $0x88] sm:$0xff] }
 0x4a5   : > { %v1587_v1 = vpop.xlane.xlu1 %1586  ;;  %v1571_v2 = vpop.xlane.xlu0 %1570 }
 0x4a6   : > { %v1588_v3 = vmul.f32 0.0625, %v1587_v1  ;;  %v1572_v4 = vmul.f32 0.0625, %v1571_v2 }
 0x4a8   : > { %1594 = vst.msk [vmem:[#allocation2 + $0x30] sm:$0xff] %vm168_vm0, %v1588_v3  ;;  %1578 = vst.msk [vmem:[#allocation2 + $0x8] sm:$0xff] %vm168_vm0, %v1572_v4 }
 0x4af   : > { %v1635_v6 = vld [vmem:[#allocation2 + $0x8] sm:$0xff]  ;;  %v1744_v8 = vld [vmem:[#allocation2 + $0x30] sm:$0xff] }
 0x4b0   : > { %v4660_v9 = vpack.c.bf16 %v1635_v6, %v1634_v5  ;;  %v4668_v10 = vpack.c.bf16 %v1744_v8, %v1743_v7 }
 0x4b2   : > { %4661 = vmatprep.subr.bf16.mxu0 %v4660_v9  ;;  %4669 = vmatprep.subr.bf16.mxu1 %v4668_v10 }
 0x4b3   : > { %4663 = vmatpush3.bf16.msra.mxu0 %v4660_v9  ;;  %4671 = vmatpush3.bf16.msra.mxu1 %v4668_v10 }
 0x4bc   : > { %v1591_v11 = vpop.xlane.xlu1 %1590  ;;  %v1575_v12 = vpop.xlane.xlu0 %1574 }
 0x4bd   : > { %v1592_v13 = vmul.f32 0.0625, %v1591_v11  ;;  %v1576_v14 = vmul.f32 0.0625, %v1575_v12 }
 0x4bf   : > { %1596 = vst.msk [vmem:[#allocation2 + $0x40] sm:$0xff] %vm168_vm0, %v1592_v13  ;;  %1580 = vst.msk [vmem:[#allocation2 + $0x18] sm:$0xff] %vm168_vm0, %v1576_v14 }
 0x4c0   : > { %v1619_v15 = vpop.xlane.xlu1 %1618  ;;  %v1603_v16 = vpop.xlane.xlu0 %1602 }
 0x4c1   : > { %v1620_v17 = vmul.f32 0.0625, %v1619_v15  ;;  %v1604_v18 = vmul.f32 0.0625, %v1603_v16 }
 0x4c3   : > { %1626 = vst.msk [vmem:[#allocation2 + $0x80] sm:$0xff] %vm168_vm0, %v1620_v17  ;;  %1610 = vst.msk [vmem:[#allocation2 + $0x58] sm:$0xff] %vm168_vm0, %v1604_v18 }
 0x4c4   : > { %v1623_v19 = vpop.xlane.xlu1 %1622  ;;  %v1607_v20 = vpop.xlane.xlu0 %1606 }
 0x4c5   : > { %v1624_v21 = vmul.f32 0.0625, %v1623_v19  ;;  %v1608_v22 = vmul.f32 0.0625, %v1607_v20 }
 0x4c6   : > { %v1637_v24 = vld [vmem:[#allocation2 + $0x18] sm:$0xff]  ;;  %v1746_v26 = vld [vmem:[#allocation2 + $0x40] sm:$0xff] }
 0x4c7   : > { %1628 = vst.msk [vmem:[#allocation2 + $0x90] sm:$0xff] %vm168_vm0, %v1624_v21  ;;  %1612 = vst.msk [vmem:[#allocation2 + $0x68] sm:$0xff] %vm168_vm0, %v1608_v22  ;;  %v4664_v27 = vpack.c.bf16 %v1637_v24, %v1636_v23  ;;  %v4672_v28 = vpack.c.bf16 %v1746_v26, %v1745_v25 }
 0x4c9   : > { %4665 = vmatprep.subr.bf16.mxu0 %v4664_v27  ;;  %4673 = vmatprep.subr.bf16.mxu1 %v4672_v28 }
 0x4ca   : > { %4667 = vmatpush3.bf16.msra.mxu0 %v4664_v27  ;;  %4675 = vmatpush3.bf16.msra.mxu1 %v4672_v28  ;;  %v1841_v31 = vld [vmem:[#allocation2 + $0x58] sm:$0xff]  ;;  %v1938_v32 = vld [vmem:[#allocation2 + $0x80] sm:$0xff] }
 0x4cb   : > { %4316 = vmatprep.subr.msk.mxu0 %vm224_vm4, %v1638_v29  ;;  %4332 = vmatprep.subr.msk.mxu1 %vm224_vm4, %v1747_v30  ;;  %v4676_v37 = vpack.c.bf16 %v1841_v31, %v1840_v34  ;;  %v4684_v38 = vpack.c.bf16 %v1938_v32, %v1937_v35 }
 0x4ce   : > { %4317 = vmatpush3.msk.msra.mxu0 %vm224_vm4, %v1638_v29  ;;  %4333 = vmatpush3.msk.msra.mxu1 %vm224_vm4, %v1747_v30  ;;  %v1843_v39 = vld [vmem:[#allocation2 + $0x68] sm:$0xff]  ;;  %v1940_v41 = vld [vmem:[#allocation2 + $0x90] sm:$0xff] }
 0x4cf   : > { %4319 = vmatmul.mubr.msk.f32.vlgmr.msra.gmra.mrb[24].mxu0 %vm211_vm2, %v3765_v33  ;;  %4335 = vmatmul.mubr.msk.f32.vlgmr.msra.gmra.mrb[24].mxu1 %vm211_vm2, %v3765_v33  ;;  %v4680_v42 = vpack.c.bf16 %v1843_v39, %v1842_v36  ;;  %v4688_v43 = vpack.c.bf16 %v1940_v41, %v1939_v40 }
 0x4d0   : > { %4677 = vmatprep.subr.bf16.mxu0 %v4676_v37  ;;  %4685 = vmatprep.subr.bf16.mxu1 %v4684_v38 }
 0x4d1   : > { %4679 = vmatpush3.bf16.msra.mxu0 %v4676_v37  ;;  %4687 = vmatpush3.bf16.msra.mxu1 %v4684_v38 }
 0x4d2   : > { %4681 = vmatprep.subr.bf16.mxu0 %v4680_v42  ;;  %4689 = vmatprep.subr.bf16.mxu1 %v4688_v43 }
 0x4d3   : > { %4321 = vmatprep.mubr.msk.f32.mxu0 %vm211_vm2, %v3766_v44  ;;  %4337 = vmatprep.mubr.msk.f32.mxu1 %vm211_vm2, %v3766_v44 }
 0x4d4   : > { %4322 = vmatmul.mubr.msk.f32.gmra.mrb[26].mxu0 %vm211_vm2, %v3767_v45  ;;  %4338 = vmatmul.mubr.msk.f32.gmra.mrb[26].mxu1 %vm211_vm2, %v3767_v45 }
 0x4d5   : > { %4683 = vmatpush3.bf16.msra.mxu0 %v4680_v42  ;;  %4691 = vmatpush3.bf16.msra.mxu1 %v4688_v43 }
 0x4d6   : > { %4348 = vmatprep.subr.msk.mxu0 %vm224_vm4, %v1844_v46  ;;  %4350 = vmatprep.mubr.msk.f32.mxu0 %vm211_vm2, %v5188_v0 }
 0x4d7   : > { %4364 = vmatprep.subr.msk.mxu1 %vm224_vm4, %v1941_v47  ;;  %4366 = vmatprep.mubr.msk.f32.mxu1 %vm211_vm2, %v5188_v0 }
 0x4d9   : > { %4349 = vmatpush3.msk.msra.mxu0 %vm224_vm4, %v1844_v46  ;;  %4365 = vmatpush3.msk.msra.mxu1 %vm224_vm4, %v1941_v47  ;;  %v5254_v46 = vld [vmem:[%s5525_s1 + $0x80] sm:$0xff] }
 0x4da   : > { %4351 = vmatmul.mubr.msk.f32.vlgmr.msra.gmra.mrb[28].mxu0 %vm211_vm2, %v3765_v33  ;;  %4367 = vmatmul.mubr.msk.f32.vlgmr.msra.gmra.mrb[28].mxu1 %vm211_vm2, %v3765_v33 }
 0x4db   : > { %4353 = vmatprep.mubr.msk.f32.mxu0 %vm211_vm2, %v3766_v44  ;;  %4369 = vmatprep.mubr.msk.f32.mxu1 %vm211_vm2, %v3766_v44 }
 0x4de   : > { %4354 = vmatmul.mubr.msk.f32.gmra.mrb[30].mxu0 %vm211_vm2, %v3767_v45  ;;  %4370 = vmatmul.mubr.msk.f32.gmra.mrb[30].mxu1 %vm211_vm2, %v3767_v45 }
 0x4df   : > { %4382 = vmatprep.mubr.msk.f32.mxu0 %vm211_vm2, %v5254_v46  ;;  %4398 = vmatprep.mubr.msk.f32.mxu1 %vm211_vm2, %v5254_v46 }
 0x5a2   : > { %v4320_v48 = vpop.f32.mrb[24].mxu0  ;;  %v4336_v49 = vpop.f32.mrb[24].mxu1 }
 0x5a3   : > { %v1740_v50 = vmax.f32 %v4320_v48, 0.0  ;;  %v1837_v51 = vmax.f32 %v4336_v49, 0.0  ;;  %v1720_v52 = vpop.f32.mrb[25].mxu0  ;;  %v1817_v53 = vpop.f32.mrb[25].mxu1 }
 0x5a4   : > { %v1739_v54 = vmax.f32 %v1720_v52, 0.0  ;;  %v1836_v55 = vmax.f32 %v1817_v53, 0.0 }
 0x5a5   : > { %v2060_v56 = vsel %vm168_vm0, %v1837_v51, 0.0  ;;  %v2044_v57 = vsel %vm168_vm0, %v1740_v50, 0.0 }
 0x5a6   : > { %2052 = vst.msk [vmem:[#allocation2] sm:$0xff] %vm168_vm0, %v1739_v54  ;;  %2068 = vst.msk [vmem:[#allocation2 + $0x28] sm:$0xff] %vm168_vm0, %v1836_v55  ;;  %2061 = vadd.xlane.f32.xlu1 %v2060_v56  ;;  %2045 = vadd.xlane.f32.xlu0 %v2044_v57 }
 0x5a7   : > { %v4323_v58 = vpop.f32.mrb[26].mxu0  ;;  %v4339_v59 = vpop.f32.mrb[26].mxu1 }
 0x5a8   : > { %v1742_v60 = vmax.f32 %v4323_v58, 0.0  ;;  %v1839_v61 = vmax.f32 %v4339_v59, 0.0  ;;  %v1730_v62 = vpop.f32.mrb[27].mxu0  ;;  %v1827_v63 = vpop.f32.mrb[27].mxu1 }
 0x5a9   : > { %v1741_v0 = vmax.f32 %v1730_v62, 0.0  ;;  %v1838_v1 = vmax.f32 %v1827_v63, 0.0 }
 0x5aa   : > { %v2035_v2 = vadd.f32 %v1839_v61, %v1742_v60 }
 0x5ab   : > { %v2034_v3 = vadd.f32 %v1838_v1, %v1741_v0 }
 0x5ad   : > { %v4352_v4 = vpop.f32.mrb[28].mxu0  ;;  %v4368_v5 = vpop.f32.mrb[28].mxu1  ;;  %v2109_v51 = vld [vmem:[#allocation2] sm:$0xff]  ;;  %v2218_v53 = vld [vmem:[#allocation2 + $0x28] sm:$0xff] }
 0x5ae   : > { %v1914_v6 = vpop.f32.mrb[29].mxu0  ;;  %v2011_v7 = vpop.f32.mrb[29].mxu1  ;;  %v1934_v30 = vmax.f32 %v4352_v4, 0.0  ;;  %v2031_v36 = vmax.f32 %v4368_v5, 0.0 }
 0x5af   : > { %v1933_v8 = vmax.f32 %v1914_v6, 0.0  ;;  %v2030_v9 = vmax.f32 %v2011_v7, 0.0 }
 0x5b0   : > { %v2092_v40 = vsel %vm168_vm0, %v2031_v36, 0.0  ;;  %v2076_v41 = vsel %vm168_vm0, %v1934_v30, 0.0 }
 0x5b1   : > { %2084 = vst.msk [vmem:[#allocation2 + $0x50] sm:$0xff] %vm168_vm0, %v1933_v8  ;;  %2100 = vst.msk [vmem:[#allocation2 + $0x78] sm:$0xff] %vm168_vm0, %v2030_v9  ;;  %v4355_v10 = vpop.f32.mrb[30].mxu0  ;;  %v4371_v11 = vpop.f32.mrb[30].mxu1 }
 0x5b2   : > { %v1936_v12 = vmax.f32 %v4355_v10, 0.0  ;;  %v1924_v13 = vpop.f32.mrb[31].mxu0  ;;  %v2033_v14 = vmax.f32 %v4371_v11, 0.0  ;;  %v2021_v15 = vpop.f32.mrb[31].mxu1  ;;  %v2113_v11 = vld [vmem:[#allocation2 + $0x20] sm:$0x1f] }
 0x5b3   : > { %v1935_v16 = vmax.f32 %v1924_v13, 0.0  ;;  %v2032_v17 = vmax.f32 %v2021_v15, 0.0  ;;  %v3789_v15 = vld [vmem:[%s5525_s1 + $0x88] sm:$0xff] }
 0x5b4   : > { %v2037_v18 = vadd.f32 %v2035_v2, %v1936_v12 }
 0x5b5   : > { %v2036_v19 = vadd.f32 %v2034_v3, %v1935_v16 }
 0x5b6   : > { %v2039_v20 = vadd.f32 %v2037_v18, %v2033_v14 }
 0x5b7   : > { %v2038_v21 = vadd.f32 %v2036_v19, %v2032_v17 }
 0x5b8   : > { %v2089_v22 = vsub.f32 %v2039_v20, %v2033_v14  ;;  %v2057_v23 = vsub.f32 %v2039_v20, %v1839_v61  ;;  %v2041_v24 = vsub.f32 %v2039_v20, %v1742_v60  ;;  %v2073_v25 = vsub.f32 %v2039_v20, %v1936_v12  ;;  %v2222_v12 = vld [vmem:[#allocation2 + $0x48] sm:$0x1f] }
 0x5b9   : > { %v2040_v26 = vsub.f32 %v2038_v21, %v1741_v0  ;;  %v2056_v27 = vsub.f32 %v2038_v21, %v1838_v1  ;;  %v2072_v28 = vsub.f32 %v2038_v21, %v1935_v16  ;;  %v2088_v29 = vsub.f32 %v2038_v21, %v2032_v17  ;;  %v2315_v16 = vld [vmem:[#allocation2 + $0x50] sm:$0xff]  ;;  %v2412_v17 = vld [vmem:[#allocation2 + $0x78] sm:$0xff] }
 0x5ba   : > { %v2059_v31 = vmul.f32 0.33333334, %v2057_v23  ;;  %v2043_v32 = vmul.f32 0.33333334, %v2041_v24  ;;  %v2091_v42 = vmul.f32 0.33333334, %v2089_v22 }
 0x5bb   : > { %v2042_v33 = vmul.f32 0.33333334, %v2040_v26  ;;  %v2058_v34 = vmul.f32 0.33333334, %v2056_v27  ;;  %v2074_v35 = vmul.f32 0.33333334, %v2072_v28 }
 0x5bc   : > { %v2090_v37 = vmul.f32 0.33333334, %v2088_v29  ;;  %v2064_v38 = vsel %vm168_vm0, %v2059_v31, 0.0  ;;  %v2048_v39 = vsel %vm168_vm0, %v2043_v32, 0.0  ;;  %v2075_v43 = vmul.f32 0.33333334, %v2073_v25 }
 0x5bd   : > { %2054 = vst.msk [vmem:[#allocation2 + $0x10] sm:$0xff] %vm168_vm0, %v2042_v33  ;;  %2070 = vst.msk [vmem:[#allocation2 + $0x38] sm:$0xff] %vm168_vm0, %v2058_v34  ;;  %2065 = vadd.xlane.f32.xlu1 %v2064_v38  ;;  %2049 = vadd.xlane.f32.xlu0 %v2048_v39  ;;  %v2096_v44 = vsel %vm168_vm0, %v2091_v42, 0.0  ;;  %v3790_v26 = vld [vmem:[%s5525_s1 + $0x90] sm:$0xff]  ;;  %v3791_v27 = vld [vmem:[%s5525_s1 + $0x98] sm:$0xff] }
 0x5be   : > { %2086 = vst.msk [vmem:[#allocation2 + $0x60] sm:$0xff] %vm168_vm0, %v2074_v35  ;;  %2102 = vst.msk [vmem:[#allocation2 + $0x88] sm:$0xff] %vm168_vm0, %v2090_v37  ;;  %v2080_v45 = vsel %vm168_vm0, %v2075_v43, 0.0  ;;  %v2319_v28 = vld [vmem:[#allocation2 + $0x70] sm:$0x1f] }
 0x5bf   : > { %v2416_v29 = vld [vmem:[#allocation2 + $0x98] sm:$0x1f] }
 0x5c1   : > { %2093 = vadd.xlane.f32.xlu1 %v2092_v40  ;;  %2077 = vadd.xlane.f32.xlu0 %v2076_v41 }
 0x5c4   : > { %v2111_v5 = vld [vmem:[#allocation2 + $0x10] sm:$0xff]  ;;  %v2220_v7 = vld [vmem:[#allocation2 + $0x38] sm:$0xff] }
 0x5c5   : > { %2097 = vadd.xlane.f32.xlu1 %v2096_v44  ;;  %2081 = vadd.xlane.f32.xlu0 %v2080_v45  ;;  %v2317_v18 = vld [vmem:[#allocation2 + $0x60] sm:$0xff]  ;;  %v2414_v22 = vld [vmem:[#allocation2 + $0x88] sm:$0xff] }
 0x633   : > { %v2062_v47 = vpop.xlane.xlu1 %2061  ;;  %v2046_v48 = vpop.xlane.xlu0 %2045 }
 0x634   : > { %v2063_v49 = vmul.f32 0.0625, %v2062_v47  ;;  %v2047_v50 = vmul.f32 0.0625, %v2046_v48 }
 0x636   : > { %2069 = vst.msk [vmem:[#allocation2 + $0x30] sm:$0xff] %vm168_vm0, %v2063_v49  ;;  %2053 = vst.msk [vmem:[#allocation2 + $0x8] sm:$0xff] %vm168_vm0, %v2047_v50 }
 0x63d   : > { %v2110_v52 = vld [vmem:[#allocation2 + $0x8] sm:$0xff]  ;;  %v2219_v54 = vld [vmem:[#allocation2 + $0x30] sm:$0xff] }
 0x63e   : > { %v4692_v55 = vpack.c.bf16 %v2110_v52, %v2109_v51  ;;  %v4700_v56 = vpack.c.bf16 %v2219_v54, %v2218_v53 }
 0x640   : > { %4693 = vmatprep.subr.bf16.mxu0 %v4692_v55  ;;  %4701 = vmatprep.subr.bf16.mxu1 %v4700_v56 }
 0x641   : > { %4695 = vmatpush3.bf16.msra.mxu0 %v4692_v55  ;;  %4703 = vmatpush3.bf16.msra.mxu1 %v4700_v56 }
 0x64a   : > { %v2066_v57 = vpop.xlane.xlu1 %2065  ;;  %v2050_v58 = vpop.xlane.xlu0 %2049 }
 0x64b   : > { %v2067_v59 = vmul.f32 0.0625, %v2066_v57  ;;  %v2051_v60 = vmul.f32 0.0625, %v2050_v58 }
 0x64d   : > { %2071 = vst.msk [vmem:[#allocation2 + $0x40] sm:$0xff] %vm168_vm0, %v2067_v59  ;;  %2055 = vst.msk [vmem:[#allocation2 + $0x18] sm:$0xff] %vm168_vm0, %v2051_v60 }
 0x64e   : > { %v2094_v61 = vpop.xlane.xlu1 %2093  ;;  %v2078_v62 = vpop.xlane.xlu0 %2077 }
 0x64f   : > { %v2095_v63 = vmul.f32 0.0625, %v2094_v61  ;;  %v2079_v0 = vmul.f32 0.0625, %v2078_v62 }
 0x651   : > { %2101 = vst.msk [vmem:[#allocation2 + $0x80] sm:$0xff] %vm168_vm0, %v2095_v63  ;;  %2085 = vst.msk [vmem:[#allocation2 + $0x58] sm:$0xff] %vm168_vm0, %v2079_v0 }
 0x652   : > { %v2098_v1 = vpop.xlane.xlu1 %2097  ;;  %v2082_v2 = vpop.xlane.xlu0 %2081 }
 0x653   : > { %v2099_v3 = vmul.f32 0.0625, %v2098_v1  ;;  %v2083_v4 = vmul.f32 0.0625, %v2082_v2 }
 0x654   : > { %v2112_v6 = vld [vmem:[#allocation2 + $0x18] sm:$0xff]  ;;  %v2221_v8 = vld [vmem:[#allocation2 + $0x40] sm:$0xff] }
 0x655   : > { %2103 = vst.msk [vmem:[#allocation2 + $0x90] sm:$0xff] %vm168_vm0, %v2099_v3  ;;  %2087 = vst.msk [vmem:[#allocation2 + $0x68] sm:$0xff] %vm168_vm0, %v2083_v4  ;;  %v4696_v9 = vpack.c.bf16 %v2112_v6, %v2111_v5  ;;  %v4704_v10 = vpack.c.bf16 %v2221_v8, %v2220_v7 }
 0x657   : > { %4697 = vmatprep.subr.bf16.mxu0 %v4696_v9  ;;  %4705 = vmatprep.subr.bf16.mxu1 %v4704_v10 }
 0x658   : > { %4699 = vmatpush3.bf16.msra.mxu0 %v4696_v9  ;;  %4707 = vmatpush3.bf16.msra.mxu1 %v4704_v10  ;;  %v2316_v13 = vld [vmem:[#allocation2 + $0x58] sm:$0xff]  ;;  %v2413_v14 = vld [vmem:[#allocation2 + $0x80] sm:$0xff] }
 0x659   : > { %4380 = vmatprep.subr.msk.mxu0 %vm224_vm4, %v2113_v11  ;;  %4396 = vmatprep.subr.msk.mxu1 %vm224_vm4, %v2222_v12  ;;  %v4708_v19 = vpack.c.bf16 %v2316_v13, %v2315_v16  ;;  %v4716_v20 = vpack.c.bf16 %v2413_v14, %v2412_v17 }
 0x65c   : > { %4381 = vmatpush3.msk.msra.mxu0 %vm224_vm4, %v2113_v11  ;;  %4397 = vmatpush3.msk.msra.mxu1 %vm224_vm4, %v2222_v12  ;;  %v2318_v21 = vld [vmem:[#allocation2 + $0x68] sm:$0xff]  ;;  %v2415_v23 = vld [vmem:[#allocation2 + $0x90] sm:$0xff] }
 0x65d   : > { %4383 = vmatmul.mubr.msk.f32.vlgmr.msra.gmra.mrb[32].mxu0 %vm211_vm2, %v3789_v15  ;;  %4399 = vmatmul.mubr.msk.f32.vlgmr.msra.gmra.mrb[32].mxu1 %vm211_vm2, %v3789_v15  ;;  %v4712_v24 = vpack.c.bf16 %v2318_v21, %v2317_v18  ;;  %v4720_v25 = vpack.c.bf16 %v2415_v23, %v2414_v22 }
 0x65e   : > { %4709 = vmatprep.subr.bf16.mxu0 %v4708_v19  ;;  %4717 = vmatprep.subr.bf16.mxu1 %v4716_v20 }
 0x65f   : > { %4711 = vmatpush3.bf16.msra.mxu0 %v4708_v19  ;;  %4719 = vmatpush3.bf16.msra.mxu1 %v4716_v20 }
 0x660   : > { %4713 = vmatprep.subr.bf16.mxu0 %v4712_v24  ;;  %4721 = vmatprep.subr.bf16.mxu1 %v4720_v25 }
 0x661   : > { %4385 = vmatprep.mubr.msk.f32.mxu0 %vm211_vm2, %v3790_v26  ;;  %4401 = vmatprep.mubr.msk.f32.mxu1 %vm211_vm2, %v3790_v26 }
 0x662   : > { %4386 = vmatmul.mubr.msk.f32.gmra.mrb[34].mxu0 %vm211_vm2, %v3791_v27  ;;  %4402 = vmatmul.mubr.msk.f32.gmra.mrb[34].mxu1 %vm211_vm2, %v3791_v27 }
 0x663   : > { %4715 = vmatpush3.bf16.msra.mxu0 %v4712_v24  ;;  %4723 = vmatpush3.bf16.msra.mxu1 %v4720_v25 }
 0x664   : > { %4412 = vmatprep.subr.msk.mxu0 %vm224_vm4, %v2319_v28  ;;  %4414 = vmatprep.mubr.msk.f32.mxu0 %vm211_vm2, %v5254_v46 }
 0x665   : > { %4428 = vmatprep.subr.msk.mxu1 %vm224_vm4, %v2416_v29  ;;  %4430 = vmatprep.mubr.msk.f32.mxu1 %vm211_vm2, %v5254_v46 }
 0x667   : > { %4413 = vmatpush3.msk.msra.mxu0 %vm224_vm4, %v2319_v28  ;;  %4429 = vmatpush3.msk.msra.mxu1 %vm224_vm4, %v2416_v29  ;;  %v5320_v28 = vld [vmem:[%s5525_s1 + $0xa0] sm:$0xff] }
 0x668   : > { %4415 = vmatmul.mubr.msk.f32.vlgmr.msra.gmra.mrb[36].mxu0 %vm211_vm2, %v3789_v15  ;;  %4431 = vmatmul.mubr.msk.f32.vlgmr.msra.gmra.mrb[36].mxu1 %vm211_vm2, %v3789_v15 }
 0x669   : > { %4417 = vmatprep.mubr.msk.f32.mxu0 %vm211_vm2, %v3790_v26  ;;  %4433 = vmatprep.mubr.msk.f32.mxu1 %vm211_vm2, %v3790_v26 }
 0x66c   : > { %4418 = vmatmul.mubr.msk.f32.gmra.mrb[38].mxu0 %vm211_vm2, %v3791_v27  ;;  %4434 = vmatmul.mubr.msk.f32.gmra.mrb[38].mxu1 %vm211_vm2, %v3791_v27 }
 0x66d   : > { %4446 = vmatprep.mubr.msk.f32.mxu0 %vm211_vm2, %v5320_v28  ;;  %4462 = vmatprep.mubr.msk.f32.mxu1 %vm211_vm2, %v5320_v28 }
 0x730   : > { %v4384_v30 = vpop.f32.mrb[32].mxu0  ;;  %v4400_v31 = vpop.f32.mrb[32].mxu1 }
 0x731   : > { %v2215_v32 = vmax.f32 %v4384_v30, 0.0  ;;  %v2312_v33 = vmax.f32 %v4400_v31, 0.0  ;;  %v2195_v34 = vpop.f32.mrb[33].mxu0  ;;  %v2292_v35 = vpop.f32.mrb[33].mxu1 }
 0x732   : > { %v2214_v36 = vmax.f32 %v2195_v34, 0.0  ;;  %v2311_v37 = vmax.f32 %v2292_v35, 0.0 }
 0x733   : > { %v2535_v38 = vsel %vm168_vm0, %v2312_v33, 0.0  ;;  %v2519_v39 = vsel %vm168_vm0, %v2215_v32, 0.0 }
 0x734   : > { %2527 = vst.msk [vmem:[#allocation2] sm:$0xff] %vm168_vm0, %v2214_v36  ;;  %2543 = vst.msk [vmem:[#allocation2 + $0x28] sm:$0xff] %vm168_vm0, %v2311_v37  ;;  %2536 = vadd.xlane.f32.xlu1 %v2535_v38  ;;  %2520 = vadd.xlane.f32.xlu0 %v2519_v39 }
 0x735   : > { %v4387_v40 = vpop.f32.mrb[34].mxu0  ;;  %v4403_v41 = vpop.f32.mrb[34].mxu1 }
 0x736   : > { %v2217_v42 = vmax.f32 %v4387_v40, 0.0  ;;  %v2314_v43 = vmax.f32 %v4403_v41, 0.0  ;;  %v2205_v44 = vpop.f32.mrb[35].mxu0  ;;  %v2302_v45 = vpop.f32.mrb[35].mxu1 }
 0x737   : > { %v2216_v46 = vmax.f32 %v2205_v44, 0.0  ;;  %v2313_v47 = vmax.f32 %v2302_v45, 0.0 }
 0x738   : > { %v2510_v48 = vadd.f32 %v2314_v43, %v2217_v42 }
 0x739   : > { %v2509_v49 = vadd.f32 %v2313_v47, %v2216_v46 }
 0x73b   : > { %v4416_v50 = vpop.f32.mrb[36].mxu0  ;;  %v4432_v51 = vpop.f32.mrb[36].mxu1  ;;  %v2584_v33 = vld [vmem:[#allocation2] sm:$0xff]  ;;  %v2693_v35 = vld [vmem:[#allocation2 + $0x28] sm:$0xff] }
 0x73c   : > { %v2389_v52 = vpop.f32.mrb[37].mxu0  ;;  %v2486_v53 = vpop.f32.mrb[37].mxu1  ;;  %v2409_v12 = vmax.f32 %v4416_v50, 0.0  ;;  %v2506_v18 = vmax.f32 %v4432_v51, 0.0 }
 0x73d   : > { %v2408_v54 = vmax.f32 %v2389_v52, 0.0  ;;  %v2505_v55 = vmax.f32 %v2486_v53, 0.0 }
 0x73e   : > { %v2567_v22 = vsel %vm168_vm0, %v2506_v18, 0.0  ;;  %v2551_v23 = vsel %vm168_vm0, %v2409_v12, 0.0 }
 0x73f   : > { %2559 = vst.msk [vmem:[#allocation2 + $0x50] sm:$0xff] %vm168_vm0, %v2408_v54  ;;  %2575 = vst.msk [vmem:[#allocation2 + $0x78] sm:$0xff] %vm168_vm0, %v2505_v55  ;;  %v4419_v56 = vpop.f32.mrb[38].mxu0  ;;  %v4435_v57 = vpop.f32.mrb[38].mxu1 }
 0x740   : > { %v2411_v58 = vmax.f32 %v4419_v56, 0.0  ;;  %v2399_v59 = vpop.f32.mrb[39].mxu0  ;;  %v2508_v60 = vmax.f32 %v4435_v57, 0.0  ;;  %v2496_v61 = vpop.f32.mrb[39].mxu1  ;;  %v2588_v57 = vld [vmem:[#allocation2 + $0x20] sm:$0x1f] }
 0x741   : > { %v2410_v62 = vmax.f32 %v2399_v59, 0.0  ;;  %v2507_v63 = vmax.f32 %v2496_v61, 0.0  ;;  %v3813_v61 = vld [vmem:[%s5525_s1 + $0xa8] sm:$0xff] }
 0x742   : > { %v2512_v0 = vadd.f32 %v2510_v48, %v2411_v58 }
 0x743   : > { %v2511_v1 = vadd.f32 %v2509_v49, %v2410_v62 }
 0x744   : > { %v2514_v2 = vadd.f32 %v2512_v0, %v2508_v60 }
 0x745   : > { %v2513_v3 = vadd.f32 %v2511_v1, %v2507_v63 }
 0x746   : > { %v2564_v4 = vsub.f32 %v2514_v2, %v2508_v60  ;;  %v2532_v5 = vsub.f32 %v2514_v2, %v2314_v43  ;;  %v2516_v6 = vsub.f32 %v2514_v2, %v2217_v42  ;;  %v2548_v7 = vsub.f32 %v2514_v2, %v2411_v58  ;;  %v2697_v58 = vld [vmem:[#allocation2 + $0x48] sm:$0x1f] }
 0x747   : > { %v2515_v8 = vsub.f32 %v2513_v3, %v2216_v46  ;;  %v2531_v9 = vsub.f32 %v2513_v3, %v2313_v47  ;;  %v2547_v10 = vsub.f32 %v2513_v3, %v2410_v62  ;;  %v2563_v11 = vsub.f32 %v2513_v3, %v2507_v63  ;;  %v2790_v62 = vld [vmem:[#allocation2 + $0x50] sm:$0xff]  ;;  %v2887_v63 = vld [vmem:[#allocation2 + $0x78] sm:$0xff] }
 0x748   : > { %v2534_v13 = vmul.f32 0.33333334, %v2532_v5  ;;  %v2518_v14 = vmul.f32 0.33333334, %v2516_v6  ;;  %v2566_v24 = vmul.f32 0.33333334, %v2564_v4 }
 0x749   : > { %v2517_v15 = vmul.f32 0.33333334, %v2515_v8  ;;  %v2533_v16 = vmul.f32 0.33333334, %v2531_v9  ;;  %v2549_v17 = vmul.f32 0.33333334, %v2547_v10 }
 0x74a   : > { %v2565_v19 = vmul.f32 0.33333334, %v2563_v11  ;;  %v2539_v20 = vsel %vm168_vm0, %v2534_v13, 0.0  ;;  %v2523_v21 = vsel %vm168_vm0, %v2518_v14, 0.0  ;;  %v2550_v25 = vmul.f32 0.33333334, %v2548_v7 }
 0x74b   : > { %2529 = vst.msk [vmem:[#allocation2 + $0x10] sm:$0xff] %vm168_vm0, %v2517_v15  ;;  %2545 = vst.msk [vmem:[#allocation2 + $0x38] sm:$0xff] %vm168_vm0, %v2533_v16  ;;  %2540 = vadd.xlane.f32.xlu1 %v2539_v20  ;;  %2524 = vadd.xlane.f32.xlu0 %v2523_v21  ;;  %v2571_v26 = vsel %vm168_vm0, %v2566_v24, 0.0  ;;  %v3814_v8 = vld [vmem:[%s5525_s1 + $0xb0] sm:$0xff]  ;;  %v3815_v9 = vld [vmem:[%s5525_s1 + $0xb8] sm:$0xff] }
 0x74c   : > { %2561 = vst.msk [vmem:[#allocation2 + $0x60] sm:$0xff] %vm168_vm0, %v2549_v17  ;;  %2577 = vst.msk [vmem:[#allocation2 + $0x88] sm:$0xff] %vm168_vm0, %v2565_v19  ;;  %v2555_v27 = vsel %vm168_vm0, %v2550_v25, 0.0  ;;  %v2794_v10 = vld [vmem:[#allocation2 + $0x70] sm:$0x1f] }
 0x74d   : > { %v2891_v11 = vld [vmem:[#allocation2 + $0x98] sm:$0x1f] }
 0x74f   : > { %2568 = vadd.xlane.f32.xlu1 %v2567_v22  ;;  %2552 = vadd.xlane.f32.xlu0 %v2551_v23 }
 0x752   : > { %v2586_v51 = vld [vmem:[#allocation2 + $0x10] sm:$0xff]  ;;  %v2695_v53 = vld [vmem:[#allocation2 + $0x38] sm:$0xff] }
 0x753   : > { %2572 = vadd.xlane.f32.xlu1 %v2571_v26  ;;  %2556 = vadd.xlane.f32.xlu0 %v2555_v27  ;;  %v2792_v0 = vld [vmem:[#allocation2 + $0x60] sm:$0xff]  ;;  %v2889_v4 = vld [vmem:[#allocation2 + $0x88] sm:$0xff] }
 0x7c1   : > { %v2537_v29 = vpop.xlane.xlu1 %2536  ;;  %v2521_v30 = vpop.xlane.xlu0 %2520 }
 0x7c2   : > { %v2538_v31 = vmul.f32 0.0625, %v2537_v29  ;;  %v2522_v32 = vmul.f32 0.0625, %v2521_v30 }
 0x7c4   : > { %2544 = vst.msk [vmem:[#allocation2 + $0x30] sm:$0xff] %vm168_vm0, %v2538_v31  ;;  %2528 = vst.msk [vmem:[#allocation2 + $0x8] sm:$0xff] %vm168_vm0, %v2522_v32 }
 0x7cb   : > { %v2585_v34 = vld [vmem:[#allocation2 + $0x8] sm:$0xff]  ;;  %v2694_v36 = vld [vmem:[#allocation2 + $0x30] sm:$0xff] }
 0x7cc   : > { %v4724_v37 = vpack.c.bf16 %v2585_v34, %v2584_v33  ;;  %v4732_v38 = vpack.c.bf16 %v2694_v36, %v2693_v35 }
 0x7ce   : > { %4725 = vmatprep.subr.bf16.mxu0 %v4724_v37  ;;  %4733 = vmatprep.subr.bf16.mxu1 %v4732_v38 }
 0x7cf   : > { %4727 = vmatpush3.bf16.msra.mxu0 %v4724_v37  ;;  %4735 = vmatpush3.bf16.msra.mxu1 %v4732_v38 }
 0x7d8   : > { %v2541_v39 = vpop.xlane.xlu1 %2540  ;;  %v2525_v40 = vpop.xlane.xlu0 %2524 }
 0x7d9   : > { %v2542_v41 = vmul.f32 0.0625, %v2541_v39  ;;  %v2526_v42 = vmul.f32 0.0625, %v2525_v40 }
 0x7db   : > { %2546 = vst.msk [vmem:[#allocation2 + $0x40] sm:$0xff] %vm168_vm0, %v2542_v41  ;;  %2530 = vst.msk [vmem:[#allocation2 + $0x18] sm:$0xff] %vm168_vm0, %v2526_v42 }
 0x7dc   : > { %v2569_v43 = vpop.xlane.xlu1 %2568  ;;  %v2553_v44 = vpop.xlane.xlu0 %2552 }
 0x7dd   : > { %v2570_v45 = vmul.f32 0.0625, %v2569_v43  ;;  %v2554_v46 = vmul.f32 0.0625, %v2553_v44 }
 0x7df   : > { %2576 = vst.msk [vmem:[#allocation2 + $0x80] sm:$0xff] %vm168_vm0, %v2570_v45  ;;  %2560 = vst.msk [vmem:[#allocation2 + $0x58] sm:$0xff] %vm168_vm0, %v2554_v46 }
 0x7e0   : > { %v2573_v47 = vpop.xlane.xlu1 %2572  ;;  %v2557_v48 = vpop.xlane.xlu0 %2556 }
 0x7e1   : > { %v2574_v49 = vmul.f32 0.0625, %v2573_v47  ;;  %v2558_v50 = vmul.f32 0.0625, %v2557_v48 }
 0x7e2   : > { %v2587_v52 = vld [vmem:[#allocation2 + $0x18] sm:$0xff]  ;;  %v2696_v54 = vld [vmem:[#allocation2 + $0x40] sm:$0xff] }
 0x7e3   : > { %2578 = vst.msk [vmem:[#allocation2 + $0x90] sm:$0xff] %vm168_vm0, %v2574_v49  ;;  %2562 = vst.msk [vmem:[#allocation2 + $0x68] sm:$0xff] %vm168_vm0, %v2558_v50  ;;  %v4728_v55 = vpack.c.bf16 %v2587_v52, %v2586_v51  ;;  %v4736_v56 = vpack.c.bf16 %v2696_v54, %v2695_v53 }
 0x7e5   : > { %4729 = vmatprep.subr.bf16.mxu0 %v4728_v55  ;;  %4737 = vmatprep.subr.bf16.mxu1 %v4736_v56 }
 0x7e6   : > { %4731 = vmatpush3.bf16.msra.mxu0 %v4728_v55  ;;  %4739 = vmatpush3.bf16.msra.mxu1 %v4736_v56  ;;  %v2791_v59 = vld [vmem:[#allocation2 + $0x58] sm:$0xff]  ;;  %v2888_v60 = vld [vmem:[#allocation2 + $0x80] sm:$0xff] }
 0x7e7   : > { %4444 = vmatprep.subr.msk.mxu0 %vm224_vm4, %v2588_v57  ;;  %4460 = vmatprep.subr.msk.mxu1 %vm224_vm4, %v2697_v58  ;;  %v4740_v1 = vpack.c.bf16 %v2791_v59, %v2790_v62  ;;  %v4748_v2 = vpack.c.bf16 %v2888_v60, %v2887_v63 }
 0x7ea   : > { %4445 = vmatpush3.msk.msra.mxu0 %vm224_vm4, %v2588_v57  ;;  %4461 = vmatpush3.msk.msra.mxu1 %vm224_vm4, %v2697_v58  ;;  %v2793_v3 = vld [vmem:[#allocation2 + $0x68] sm:$0xff]  ;;  %v2890_v5 = vld [vmem:[#allocation2 + $0x90] sm:$0xff] }
 0x7eb   : > { %4447 = vmatmul.mubr.msk.f32.vlgmr.msra.gmra.mrb[40].mxu0 %vm211_vm2, %v3813_v61  ;;  %4463 = vmatmul.mubr.msk.f32.vlgmr.msra.gmra.mrb[40].mxu1 %vm211_vm2, %v3813_v61  ;;  %v4744_v6 = vpack.c.bf16 %v2793_v3, %v2792_v0  ;;  %v4752_v7 = vpack.c.bf16 %v2890_v5, %v2889_v4 }
 0x7ec   : > { %4741 = vmatprep.subr.bf16.mxu0 %v4740_v1  ;;  %4749 = vmatprep.subr.bf16.mxu1 %v4748_v2 }
 0x7ed   : > { %4743 = vmatpush3.bf16.msra.mxu0 %v4740_v1  ;;  %4751 = vmatpush3.bf16.msra.mxu1 %v4748_v2 }
 0x7ee   : > { %4745 = vmatprep.subr.bf16.mxu0 %v4744_v6  ;;  %4753 = vmatprep.subr.bf16.mxu1 %v4752_v7 }
 0x7ef   : > { %4449 = vmatprep.mubr.msk.f32.mxu0 %vm211_vm2, %v3814_v8  ;;  %4465 = vmatprep.mubr.msk.f32.mxu1 %vm211_vm2, %v3814_v8 }
 0x7f0   : > { %4450 = vmatmul.mubr.msk.f32.gmra.mrb[42].mxu0 %vm211_vm2, %v3815_v9  ;;  %4466 = vmatmul.mubr.msk.f32.gmra.mrb[42].mxu1 %vm211_vm2, %v3815_v9 }
 0x7f1   : > { %4747 = vmatpush3.bf16.msra.mxu0 %v4744_v6  ;;  %4755 = vmatpush3.bf16.msra.mxu1 %v4752_v7 }
 0x7f2   : > { %4476 = vmatprep.subr.msk.mxu0 %vm224_vm4, %v2794_v10  ;;  %4478 = vmatprep.mubr.msk.f32.mxu0 %vm211_vm2, %v5320_v28 }
 0x7f3   : > { %4492 = vmatprep.subr.msk.mxu1 %vm224_vm4, %v2891_v11  ;;  %4494 = vmatprep.mubr.msk.f32.mxu1 %vm211_vm2, %v5320_v28 }
 0x7f5   : > { %4477 = vmatpush3.msk.msra.mxu0 %vm224_vm4, %v2794_v10  ;;  %4493 = vmatpush3.msk.msra.mxu1 %vm224_vm4, %v2891_v11  ;;  %v5386_v10 = vld [vmem:[%s5525_s1 + $0xc0] sm:$0xff] }
 0x7f6   : > { %4479 = vmatmul.mubr.msk.f32.vlgmr.msra.gmra.mrb[44].mxu0 %vm211_vm2, %v3813_v61  ;;  %4495 = vmatmul.mubr.msk.f32.vlgmr.msra.gmra.mrb[44].mxu1 %vm211_vm2, %v3813_v61 }
 0x7f7   : > { %4481 = vmatprep.mubr.msk.f32.mxu0 %vm211_vm2, %v3814_v8  ;;  %4497 = vmatprep.mubr.msk.f32.mxu1 %vm211_vm2, %v3814_v8 }
 0x7fa   : > { %4482 = vmatmul.mubr.msk.f32.gmra.mrb[46].mxu0 %vm211_vm2, %v3815_v9  ;;  %4498 = vmatmul.mubr.msk.f32.gmra.mrb[46].mxu1 %vm211_vm2, %v3815_v9 }
 0x7fb   : > { %4510 = vmatprep.mubr.msk.f32.mxu0 %vm211_vm2, %v5386_v10  ;;  %4526 = vmatprep.mubr.msk.f32.mxu1 %vm211_vm2, %v5386_v10 }
 0x8be   : > { %v4448_v12 = vpop.f32.mrb[40].mxu0  ;;  %v4464_v13 = vpop.f32.mrb[40].mxu1 }
 0x8bf   : > { %v2690_v14 = vmax.f32 %v4448_v12, 0.0  ;;  %v2787_v15 = vmax.f32 %v4464_v13, 0.0  ;;  %v2670_v16 = vpop.f32.mrb[41].mxu0  ;;  %v2767_v17 = vpop.f32.mrb[41].mxu1 }
 0x8c0   : > { %v2689_v18 = vmax.f32 %v2670_v16, 0.0  ;;  %v2786_v19 = vmax.f32 %v2767_v17, 0.0 }
 0x8c1   : > { %v3010_v20 = vsel %vm168_vm0, %v2787_v15, 0.0  ;;  %v2994_v21 = vsel %vm168_vm0, %v2690_v14, 0.0 }
 0x8c2   : > { %3002 = vst.msk [vmem:[#allocation2] sm:$0xff] %vm168_vm0, %v2689_v18  ;;  %3018 = vst.msk [vmem:[#allocation2 + $0x28] sm:$0xff] %vm168_vm0, %v2786_v19  ;;  %3011 = vadd.xlane.f32.xlu1 %v3010_v20  ;;  %2995 = vadd.xlane.f32.xlu0 %v2994_v21 }
 0x8c3   : > { %v4451_v22 = vpop.f32.mrb[42].mxu0  ;;  %v4467_v23 = vpop.f32.mrb[42].mxu1 }
 0x8c4   : > { %v2692_v24 = vmax.f32 %v4451_v22, 0.0  ;;  %v2789_v25 = vmax.f32 %v4467_v23, 0.0  ;;  %v2680_v26 = vpop.f32.mrb[43].mxu0  ;;  %v2777_v27 = vpop.f32.mrb[43].mxu1 }
 0x8c5   : > { %v2691_v28 = vmax.f32 %v2680_v26, 0.0  ;;  %v2788_v29 = vmax.f32 %v2777_v27, 0.0 }
 0x8c6   : > { %v2985_v30 = vadd.f32 %v2789_v25, %v2692_v24 }
 0x8c7   : > { %v2984_v31 = vadd.f32 %v2788_v29, %v2691_v28 }
 0x8c9   : > { %v4480_v32 = vpop.f32.mrb[44].mxu0  ;;  %v4496_v33 = vpop.f32.mrb[44].mxu1  ;;  %v3059_v15 = vld [vmem:[#allocation2] sm:$0xff]  ;;  %v3168_v17 = vld [vmem:[#allocation2 + $0x28] sm:$0xff] }
 0x8ca   : > { %v2864_v34 = vpop.f32.mrb[45].mxu0  ;;  %v2961_v35 = vpop.f32.mrb[45].mxu1  ;;  %v2884_v58 = vmax.f32 %v4480_v32, 0.0  ;;  %v2981_v0 = vmax.f32 %v4496_v33, 0.0 }
 0x8cb   : > { %v2883_v36 = vmax.f32 %v2864_v34, 0.0  ;;  %v2980_v37 = vmax.f32 %v2961_v35, 0.0 }
 0x8cc   : > { %v3042_v4 = vsel %vm168_vm0, %v2981_v0, 0.0  ;;  %v3026_v5 = vsel %vm168_vm0, %v2884_v58, 0.0  ;;  %v4898_v58 = vmov 0  }
 0x8cd   : > { %3034 = vst.msk [vmem:[#allocation2 + $0x50] sm:$0xff] %vm168_vm0, %v2883_v36  ;;  %3050 = vst.msk [vmem:[#allocation2 + $0x78] sm:$0xff] %vm168_vm0, %v2980_v37  ;;  %v4483_v38 = vpop.f32.mrb[46].mxu0  ;;  %v4499_v39 = vpop.f32.mrb[46].mxu1  ;;  %4831 = vset.pattern.permute.xlu1 %v4898_v58  ;;  %4830 = vset.pattern.permute.xlu0 %v4898_v58  ;;  %v3529_v58 = vld [vmem:[%s5526_s2] sm:$0xff] }
 0x8ce   : > { %v2886_v40 = vmax.f32 %v4483_v38, 0.0  ;;  %v2874_v41 = vpop.f32.mrb[47].mxu0  ;;  %v2983_v42 = vmax.f32 %v4499_v39, 0.0  ;;  %v2971_v43 = vpop.f32.mrb[47].mxu1  ;;  %v3063_v39 = vld [vmem:[#allocation2 + $0x20] sm:$0x1f] }
 0x8cf   : > { %v2885_v44 = vmax.f32 %v2874_v41, 0.0  ;;  %v2982_v45 = vmax.f32 %v2971_v43, 0.0  ;;  %v3837_v43 = vld [vmem:[%s5525_s1 + $0xc8] sm:$0xff] }
 0x8d0   : > { %v2987_v46 = vadd.f32 %v2985_v30, %v2886_v40 }
 0x8d1   : > { %v2986_v47 = vadd.f32 %v2984_v31, %v2885_v44 }
 0x8d2   : > { %v2989_v48 = vadd.f32 %v2987_v46, %v2983_v42 }
 0x8d3   : > { %v2988_v49 = vadd.f32 %v2986_v47, %v2982_v45 }
 0x8d4   : > { %v3039_v50 = vsub.f32 %v2989_v48, %v2983_v42  ;;  %v3007_v51 = vsub.f32 %v2989_v48, %v2789_v25  ;;  %v2991_v52 = vsub.f32 %v2989_v48, %v2692_v24  ;;  %v3023_v53 = vsub.f32 %v2989_v48, %v2886_v40  ;;  %v3172_v40 = vld [vmem:[#allocation2 + $0x48] sm:$0x1f] }
 0x8d5   : > { %v2990_v54 = vsub.f32 %v2988_v49, %v2691_v28  ;;  %v3006_v55 = vsub.f32 %v2988_v49, %v2788_v29  ;;  %v3022_v56 = vsub.f32 %v2988_v49, %v2885_v44  ;;  %v3038_v57 = vsub.f32 %v2988_v49, %v2982_v45  ;;  %v3265_v44 = vld [vmem:[#allocation2 + $0x50] sm:$0xff]  ;;  %v3362_v45 = vld [vmem:[#allocation2 + $0x78] sm:$0xff] }
 0x8d6   : > { %v3009_v59 = vmul.f32 0.33333334, %v3007_v51  ;;  %v2993_v60 = vmul.f32 0.33333334, %v2991_v52  ;;  %v3041_v6 = vmul.f32 0.33333334, %v3039_v50 }
 0x8d7   : > { %v2992_v61 = vmul.f32 0.33333334, %v2990_v54  ;;  %v3008_v62 = vmul.f32 0.33333334, %v3006_v55  ;;  %v3024_v63 = vmul.f32 0.33333334, %v3022_v56 }
 0x8d8   : > { %v3040_v1 = vmul.f32 0.33333334, %v3038_v57  ;;  %v3014_v2 = vsel %vm168_vm0, %v3009_v59, 0.0  ;;  %v2998_v3 = vsel %vm168_vm0, %v2993_v60, 0.0  ;;  %v3025_v7 = vmul.f32 0.33333334, %v3023_v53 }
 0x8d9   : > { %3004 = vst.msk [vmem:[#allocation2 + $0x10] sm:$0xff] %vm168_vm0, %v2992_v61  ;;  %3020 = vst.msk [vmem:[#allocation2 + $0x38] sm:$0xff] %vm168_vm0, %v3008_v62  ;;  %3015 = vadd.xlane.f32.xlu1 %v3014_v2  ;;  %2999 = vadd.xlane.f32.xlu0 %v2998_v3  ;;  %v3046_v8 = vsel %vm168_vm0, %v3041_v6, 0.0  ;;  %v3838_v54 = vld [vmem:[%s5525_s1 + $0xd0] sm:$0xff]  ;;  %v3839_v55 = vld [vmem:[%s5525_s1 + $0xd8] sm:$0xff] }
 0x8da   : > { %3036 = vst.msk [vmem:[#allocation2 + $0x60] sm:$0xff] %vm168_vm0, %v3024_v63  ;;  %3052 = vst.msk [vmem:[#allocation2 + $0x88] sm:$0xff] %vm168_vm0, %v3040_v1  ;;  %v3030_v9 = vsel %vm168_vm0, %v3025_v7, 0.0  ;;  %v3269_v56 = vld [vmem:[#allocation2 + $0x70] sm:$0x1f] }
 0x8db   : > { %v3366_v57 = vld [vmem:[#allocation2 + $0x98] sm:$0x1f] }
 0x8dd   : > { %3043 = vadd.xlane.f32.xlu1 %v3042_v4  ;;  %3027 = vadd.xlane.f32.xlu0 %v3026_v5 }
 0x8e0   : > { %v3061_v33 = vld [vmem:[#allocation2 + $0x10] sm:$0xff]  ;;  %v3170_v35 = vld [vmem:[#allocation2 + $0x38] sm:$0xff] }
 0x8e1   : > { %3047 = vadd.xlane.f32.xlu1 %v3046_v8  ;;  %3031 = vadd.xlane.f32.xlu0 %v3030_v9  ;;  %v3267_v46 = vld [vmem:[#allocation2 + $0x60] sm:$0xff]  ;;  %v3364_v50 = vld [vmem:[#allocation2 + $0x88] sm:$0xff] }
 0x94f   : > { %v3012_v11 = vpop.xlane.xlu1 %3011  ;;  %v2996_v12 = vpop.xlane.xlu0 %2995 }
 0x950   : > { %v3013_v13 = vmul.f32 0.0625, %v3012_v11  ;;  %v2997_v14 = vmul.f32 0.0625, %v2996_v12 }
 0x952   : > { %3019 = vst.msk [vmem:[#allocation2 + $0x30] sm:$0xff] %vm168_vm0, %v3013_v13  ;;  %3003 = vst.msk [vmem:[#allocation2 + $0x8] sm:$0xff] %vm168_vm0, %v2997_v14 }
 0x959   : > { %v3060_v16 = vld [vmem:[#allocation2 + $0x8] sm:$0xff]  ;;  %v3169_v18 = vld [vmem:[#allocation2 + $0x30] sm:$0xff] }
 0x95a   : > { %v4756_v19 = vpack.c.bf16 %v3060_v16, %v3059_v15  ;;  %v4764_v20 = vpack.c.bf16 %v3169_v18, %v3168_v17 }
 0x95c   : > { %4757 = vmatprep.subr.bf16.mxu0 %v4756_v19  ;;  %4765 = vmatprep.subr.bf16.mxu1 %v4764_v20 }
 0x95d   : > { %4759 = vmatpush3.bf16.msra.mxu0 %v4756_v19  ;;  %4767 = vmatpush3.bf16.msra.mxu1 %v4764_v20 }
 0x966   : > { %v3016_v21 = vpop.xlane.xlu1 %3015  ;;  %v3000_v22 = vpop.xlane.xlu0 %2999 }
 0x967   : > { %v3017_v23 = vmul.f32 0.0625, %v3016_v21  ;;  %v3001_v24 = vmul.f32 0.0625, %v3000_v22 }
 0x969   : > { %3021 = vst.msk [vmem:[#allocation2 + $0x40] sm:$0xff] %vm168_vm0, %v3017_v23  ;;  %3005 = vst.msk [vmem:[#allocation2 + $0x18] sm:$0xff] %vm168_vm0, %v3001_v24 }
 0x96a   : > { %v3044_v25 = vpop.xlane.xlu1 %3043  ;;  %v3028_v26 = vpop.xlane.xlu0 %3027 }
 0x96b   : > { %v3045_v27 = vmul.f32 0.0625, %v3044_v25  ;;  %v3029_v28 = vmul.f32 0.0625, %v3028_v26 }
 0x96d   : > { %3051 = vst.msk [vmem:[#allocation2 + $0x80] sm:$0xff] %vm168_vm0, %v3045_v27  ;;  %3035 = vst.msk [vmem:[#allocation2 + $0x58] sm:$0xff] %vm168_vm0, %v3029_v28 }
 0x96e   : > { %v3048_v29 = vpop.xlane.xlu1 %3047  ;;  %v3032_v30 = vpop.xlane.xlu0 %3031 }
 0x96f   : > { %v3049_v31 = vmul.f32 0.0625, %v3048_v29  ;;  %v3033_v32 = vmul.f32 0.0625, %v3032_v30 }
 0x970   : > { %v3062_v34 = vld [vmem:[#allocation2 + $0x18] sm:$0xff]  ;;  %v3171_v36 = vld [vmem:[#allocation2 + $0x40] sm:$0xff] }
 0x971   : > { %3053 = vst.msk [vmem:[#allocation2 + $0x90] sm:$0xff] %vm168_vm0, %v3049_v31  ;;  %3037 = vst.msk [vmem:[#allocation2 + $0x68] sm:$0xff] %vm168_vm0, %v3033_v32  ;;  %v4760_v37 = vpack.c.bf16 %v3062_v34, %v3061_v33  ;;  %v4768_v38 = vpack.c.bf16 %v3171_v36, %v3170_v35 }
 0x973   : > { %4761 = vmatprep.subr.bf16.mxu0 %v4760_v37  ;;  %4769 = vmatprep.subr.bf16.mxu1 %v4768_v38 }
 0x974   : > { %4763 = vmatpush3.bf16.msra.mxu0 %v4760_v37  ;;  %4771 = vmatpush3.bf16.msra.mxu1 %v4768_v38  ;;  %v3266_v41 = vld [vmem:[#allocation2 + $0x58] sm:$0xff]  ;;  %v3363_v42 = vld [vmem:[#allocation2 + $0x80] sm:$0xff] }
 0x975   : > { %4508 = vmatprep.subr.msk.mxu0 %vm224_vm4, %v3063_v39  ;;  %4524 = vmatprep.subr.msk.mxu1 %vm224_vm4, %v3172_v40  ;;  %v4772_v47 = vpack.c.bf16 %v3266_v41, %v3265_v44  ;;  %v4780_v48 = vpack.c.bf16 %v3363_v42, %v3362_v45 }
 0x978   : > { %4509 = vmatpush3.msk.msra.mxu0 %vm224_vm4, %v3063_v39  ;;  %4525 = vmatpush3.msk.msra.mxu1 %vm224_vm4, %v3172_v40  ;;  %v3268_v49 = vld [vmem:[#allocation2 + $0x68] sm:$0xff]  ;;  %v3365_v51 = vld [vmem:[#allocation2 + $0x90] sm:$0xff] }
 0x979   : > { %4511 = vmatmul.mubr.msk.f32.vlgmr.msra.gmra.mrb[48].mxu0 %vm211_vm2, %v3837_v43  ;;  %4527 = vmatmul.mubr.msk.f32.vlgmr.msra.gmra.mrb[48].mxu1 %vm211_vm2, %v3837_v43  ;;  %v4776_v52 = vpack.c.bf16 %v3268_v49, %v3267_v46  ;;  %v4784_v53 = vpack.c.bf16 %v3365_v51, %v3364_v50 }
 0x97a   : > { %4773 = vmatprep.subr.bf16.mxu0 %v4772_v47  ;;  %4781 = vmatprep.subr.bf16.mxu1 %v4780_v48 }
 0x97b   : > { %4775 = vmatpush3.bf16.msra.mxu0 %v4772_v47  ;;  %4783 = vmatpush3.bf16.msra.mxu1 %v4780_v48 }
 0x97c   : > { %4777 = vmatprep.subr.bf16.mxu0 %v4776_v52  ;;  %4785 = vmatprep.subr.bf16.mxu1 %v4784_v53 }
 0x97d   : > { %4513 = vmatprep.mubr.msk.f32.mxu0 %vm211_vm2, %v3838_v54  ;;  %4529 = vmatprep.mubr.msk.f32.mxu1 %vm211_vm2, %v3838_v54 }
 0x97e   : > { %4514 = vmatmul.mubr.msk.f32.gmra.mrb[50].mxu0 %vm211_vm2, %v3839_v55  ;;  %4530 = vmatmul.mubr.msk.f32.gmra.mrb[50].mxu1 %vm211_vm2, %v3839_v55 }
 0x97f   : > { %4779 = vmatpush3.bf16.msra.mxu0 %v4776_v52  ;;  %4787 = vmatpush3.bf16.msra.mxu1 %v4784_v53 }
 0x980   : > { %4540 = vmatprep.subr.msk.mxu0 %vm224_vm4, %v3269_v56  ;;  %4542 = vmatprep.mubr.msk.f32.mxu0 %vm211_vm2, %v5386_v10 }
 0x981   : > { %4556 = vmatprep.subr.msk.mxu1 %vm224_vm4, %v3366_v57  ;;  %4558 = vmatprep.mubr.msk.f32.mxu1 %vm211_vm2, %v5386_v10 }
 0x983   : > { %4541 = vmatpush3.msk.msra.mxu0 %vm224_vm4, %v3269_v56  ;;  %4557 = vmatpush3.msk.msra.mxu1 %vm224_vm4, %v3366_v57  ;;  %v3531_v56 = vld [vmem:[%s5526_s2 + $0x10] sm:$0xff]  ;;  %v3532_v57 = vld [vmem:[%s5526_s2 + $0x18] sm:$0xff] }
 0x984   : > { %4543 = vmatmul.mubr.msk.f32.vlgmr.msra.gmra.mrb[52].mxu0 %vm211_vm2, %v3837_v43  ;;  %4559 = vmatmul.mubr.msk.f32.vlgmr.msra.gmra.mrb[52].mxu1 %vm211_vm2, %v3837_v43 }
 0x985   : > { %4545 = vmatprep.mubr.msk.f32.mxu0 %vm211_vm2, %v3838_v54  ;;  %4561 = vmatprep.mubr.msk.f32.mxu1 %vm211_vm2, %v3838_v54 }
 0x988   : > { %4546 = vmatmul.mubr.msk.f32.gmra.mrb[54].mxu0 %vm211_vm2, %v3839_v55  ;;  %4562 = vmatmul.mubr.msk.f32.gmra.mrb[54].mxu1 %vm211_vm2, %v3839_v55  ;;  %v3530_v55 = vld [vmem:[%s5526_s2 + $0x8] sm:$0xff] }
 0xa4c   : > { %v4512_v59 = vpop.f32.mrb[48].mxu0  ;;  %v4528_v60 = vpop.f32.mrb[48].mxu1 }
 0xa4d   : > { %v3165_v61 = vmax.f32 %v4512_v59, 0.0  ;;  %v3262_v62 = vmax.f32 %v4528_v60, 0.0  ;;  %v3145_v63 = vpop.f32.mrb[49].mxu0  ;;  %v3242_v0 = vpop.f32.mrb[49].mxu1 }
 0xa4e   : > { %v3164_v1 = vmax.f32 %v3145_v63, 0.0  ;;  %v3261_v2 = vmax.f32 %v3242_v0, 0.0 }
 0xa4f   : > { %v3485_v3 = vsel %vm168_vm0, %v3262_v62, 0.0  ;;  %v3469_v4 = vsel %vm168_vm0, %v3165_v61, 0.0  ;;  %v3533_v61 = vld [vmem:[%s5526_s2 + $0x20] sm:$0x1f] }
 0xa50   : > { %3477 = vst.msk [vmem:[#allocation2] sm:$0xff] %vm168_vm0, %v3164_v1  ;;  %3493 = vst.msk [vmem:[#allocation2 + $0x28] sm:$0xff] %vm168_vm0, %v3261_v2  ;;  %3486 = vadd.xlane.f32.xlu1 %v3485_v3  ;;  %3470 = vadd.xlane.f32.xlu0 %v3469_v4 }
 0xa51   : > { %v4515_v5 = vpop.f32.mrb[50].mxu0  ;;  %v4531_v6 = vpop.f32.mrb[50].mxu1 }
 0xa52   : > { %v3167_v7 = vmax.f32 %v4515_v5, 0.0  ;;  %v3264_v8 = vmax.f32 %v4531_v6, 0.0  ;;  %v3155_v9 = vpop.f32.mrb[51].mxu0  ;;  %v3252_v10 = vpop.f32.mrb[51].mxu1 }
 0xa53   : > { %v3166_v11 = vmax.f32 %v3155_v9, 0.0  ;;  %v3263_v12 = vmax.f32 %v3252_v10, 0.0 }
 0xa54   : > { %v3460_v13 = vadd.f32 %v3264_v8, %v3167_v7 }
 0xa55   : > { %v3459_v14 = vadd.f32 %v3263_v12, %v3166_v11 }
 0xa57   : > { %v4544_v15 = vpop.f32.mrb[52].mxu0  ;;  %v4560_v16 = vpop.f32.mrb[52].mxu1 }
 0xa58   : > { %v3359_v17 = vmax.f32 %v4544_v15, 0.0  ;;  %v3339_v18 = vpop.f32.mrb[53].mxu0  ;;  %v3456_v19 = vmax.f32 %v4560_v16, 0.0  ;;  %v3436_v20 = vpop.f32.mrb[53].mxu1 }
 0xa59   : > { %v3358_v21 = vmax.f32 %v3339_v18, 0.0  ;;  %v3455_v22 = vmax.f32 %v3436_v20, 0.0 }
 0xa5a   : > { %v3501_v23 = vsel %vm168_vm0, %v3359_v17, 0.0  ;;  %v3517_v24 = vsel %vm168_vm0, %v3456_v19, 0.0  ;;  %v3539_v17 = vld [vmem:[#allocation2 + $0x28] sm:$0xff] }
 0xa5b   : > { %3509 = vst.msk [vmem:[#allocation2 + $0x50] sm:$0xff] %vm168_vm0, %v3358_v21  ;;  %3525 = vst.msk [vmem:[#allocation2 + $0x78] sm:$0xff] %vm168_vm0, %v3455_v22  ;;  %3502 = vadd.xlane.f32.xlu0 %v3501_v23  ;;  %v4547_v25 = vpop.f32.mrb[54].mxu0  ;;  %3518 = vadd.xlane.f32.xlu1 %v3517_v24  ;;  %v4563_v26 = vpop.f32.mrb[54].mxu1 }
 0xa5c   : > { %v3361_v27 = vmax.f32 %v4547_v25, 0.0  ;;  %v3349_v28 = vpop.f32.mrb[55].mxu0  ;;  %v3458_v29 = vmax.f32 %v4563_v26, 0.0  ;;  %v3446_v30 = vpop.f32.mrb[55].mxu1 }
 0xa5d   : > { %v3360_v31 = vmax.f32 %v3349_v28, 0.0  ;;  %v3457_v32 = vmax.f32 %v3446_v30, 0.0  ;;  %v3543_v30 = vld [vmem:[#allocation2 + $0x48] sm:$0x1f] }
 0xa5e   : > { %v3462_v33 = vadd.f32 %v3460_v13, %v3361_v27  ;;  %v3534_v13 = vld [vmem:[#allocation2] sm:$0xff] }
 0xa5f   : > { %v3461_v34 = vadd.f32 %v3459_v14, %v3360_v31  ;;  %v3544_v21 = vadd.f32 %v3539_v17, %v3534_v13 }
 0xa60   : > { %v3464_v35 = vadd.f32 %v3462_v33, %v3458_v29 }
 0xa61   : > { %v3463_v36 = vadd.f32 %v3461_v34, %v3457_v32 }
 0xa62   : > { %v3514_v37 = vsub.f32 %v3464_v35, %v3458_v29  ;;  %v3482_v38 = vsub.f32 %v3464_v35, %v3264_v8  ;;  %v3466_v39 = vsub.f32 %v3464_v35, %v3167_v7  ;;  %v3498_v40 = vsub.f32 %v3464_v35, %v3361_v27  ;;  %v3549_v19 = vld [vmem:[#allocation2 + $0x50] sm:$0xff]  ;;  %v3559_v26 = vld [vmem:[#allocation2 + $0x78] sm:$0xff]  ;;  %v3538_v29 = vld [vmem:[#allocation2 + $0x20] sm:$0x1f] }
 0xa63   : > { %v3465_v41 = vsub.f32 %v3463_v36, %v3166_v11  ;;  %v3481_v42 = vsub.f32 %v3463_v36, %v3263_v12  ;;  %v3497_v43 = vsub.f32 %v3463_v36, %v3360_v31  ;;  %v3513_v44 = vsub.f32 %v3463_v36, %v3457_v32 }
 0xa64   : > { %v3484_v45 = vmul.f32 0.33333334, %v3482_v38  ;;  %v3468_v46 = vmul.f32 0.33333334, %v3466_v39  ;;  %v3500_v53 = vmul.f32 0.33333334, %v3498_v40  ;;  %v3554_v25 = vadd.f32 %v3549_v19, %v3544_v21 }
 0xa65   : > { %v3467_v47 = vmul.f32 0.33333334, %v3465_v41  ;;  %v3483_v48 = vmul.f32 0.33333334, %v3481_v42  ;;  %v3499_v49 = vmul.f32 0.33333334, %v3497_v43  ;;  %v3548_v34 = vadd.f32 %v3543_v30, %v3538_v29 }
 0xa66   : > { %v3515_v50 = vmul.f32 0.33333334, %v3513_v44  ;;  %v3489_v51 = vsel %vm168_vm0, %v3484_v45, 0.0  ;;  %v3473_v52 = vsel %vm168_vm0, %v3468_v46, 0.0  ;;  %v3505_v54 = vsel %vm168_vm0, %v3500_v53, 0.0 }
 0xa67   : > { %3479 = vst.msk [vmem:[#allocation2 + $0x10] sm:$0xff] %vm168_vm0, %v3467_v47  ;;  %3495 = vst.msk [vmem:[#allocation2 + $0x38] sm:$0xff] %vm168_vm0, %v3483_v48  ;;  %3490 = vadd.xlane.f32.xlu0 %v3489_v51  ;;  %3474 = vadd.xlane.f32.xlu1 %v3473_v52  ;;  %v3516_v59 = vmul.f32 0.33333334, %v3514_v37  ;;  %v3564_v33 = vadd.f32 %v3559_v26, %v3554_v25  ;;  %v3553_v37 = vld [vmem:[#allocation2 + $0x70] sm:$0x1f] }
 0xa68   : > { %3511 = vst.msk [vmem:[#allocation2 + $0x60] sm:$0xff] %vm168_vm0, %v3499_v49  ;;  %3527 = vst.msk [vmem:[#allocation2 + $0x88] sm:$0xff] %vm168_vm0, %v3515_v50  ;;  %v3558_v44 = vadd.f32 %v3553_v37, %v3548_v34  ;;  %v3563_v47 = vld [vmem:[#allocation2 + $0x98] sm:$0x1f] }
 0xa69   : > { %v3521_v60 = vsel %vm168_vm0, %v3516_v59, 0.0  ;;  %v3569_v43 = vmul.f32 0.25, %v3564_v33 }
 0xa6a   : > { %v3568_v53 = vadd.f32 %v3563_v47, %v3558_v44 }
 0xa6b   : > { %3506 = vadd.xlane.f32.xlu0 %v3505_v54 }
 0xa6e   : > { %v3536_v22 = vld [vmem:[#allocation2 + $0x10] sm:$0xff]  ;;  %v3541_v23 = vld [vmem:[#allocation2 + $0x38] sm:$0xff] }
 0xa6f   : > { %v3546_v31 = vadd.f32 %v3541_v23, %v3536_v22  ;;  %v3551_v35 = vld [vmem:[#allocation2 + $0x60] sm:$0xff]  ;;  %v3561_v42 = vld [vmem:[#allocation2 + $0x88] sm:$0xff] }
 0xa71   : > { %v3556_v38 = vadd.f32 %v3551_v35, %v3546_v31 }
 0xa73   : > { %v3566_v48 = vadd.f32 %v3561_v42, %v3556_v38 }
 0xa75   : > { %v3571_v54 = vmul.f32 0.25, %v3566_v48 }
 0xa78   : > { %3581 = vperm.xlu1 %4831, %v3530_v55  }
 0xa7c   : > { %3586 = vperm.xlu1 %4831, %v3531_v56  }
 0xa80   : > { %3591 = vperm.xlu1 %4831, %v3532_v57  }
 0xa81   : > { %3576 = vperm.xlu0 %4830, %v3529_v58  }
 0xaa4   : > { %3522 = vadd.xlane.f32.xlu1 %v3521_v60 }
 0xab5   : > { %3596 = vperm.xlu1 %4831, %v3533_v61   ;;  %v3573_v61 = vmul.f32 0.25, %v3568_v53 }
 0xadd   : > { %v3487_v62 = vpop.xlane.xlu1 %3486  ;;  %v3471_v63 = vpop.xlane.xlu0 %3470 }
 0xade   : > { %v3488_v0 = vmul.f32 0.0625, %v3487_v62  ;;  %v3472_v1 = vmul.f32 0.0625, %v3471_v63 }
 0xae0   : > { %3494 = vst.msk [vmem:[#allocation2 + $0x30] sm:$0xff] %vm168_vm0, %v3488_v0  ;;  %3478 = vst.msk [vmem:[#allocation2 + $0x8] sm:$0xff] %vm168_vm0, %v3472_v1 }
 0xae7   : > { %v3535_v14 = vld [vmem:[#allocation2 + $0x8] sm:$0xff]  ;;  %v3540_v15 = vld [vmem:[#allocation2 + $0x30] sm:$0xff] }
 0xae8   : > { %v3503_v2 = vpop.xlane.xlu0 %3502  ;;  %v3519_v3 = vpop.xlane.xlu1 %3518  ;;  %v3545_v20 = vadd.f32 %v3540_v15, %v3535_v14 }
 0xae9   : > { %v3504_v4 = vmul.f32 0.0625, %v3503_v2  ;;  %v3520_v5 = vmul.f32 0.0625, %v3519_v3 }
 0xaeb   : > { %3510 = vst.msk [vmem:[#allocation2 + $0x58] sm:$0xff] %vm168_vm0, %v3504_v4  ;;  %3526 = vst.msk [vmem:[#allocation2 + $0x80] sm:$0xff] %vm168_vm0, %v3520_v5 }
 0xaf2   : > { %v3550_v18 = vld [vmem:[#allocation2 + $0x58] sm:$0xff]  ;;  %v3560_v27 = vld [vmem:[#allocation2 + $0x80] sm:$0xff] }
 0xaf3   : > { %v3555_v24 = vadd.f32 %v3550_v18, %v3545_v20 }
 0xaf4   : > { %v3491_v6 = vpop.xlane.xlu0 %3490  ;;  %v3475_v7 = vpop.xlane.xlu1 %3474 }
 0xaf5   : > { %v3492_v8 = vmul.f32 0.0625, %v3491_v6  ;;  %v3476_v9 = vmul.f32 0.0625, %v3475_v7  ;;  %v3565_v32 = vadd.f32 %v3560_v27, %v3555_v24 }
 0xaf7   : > { %3496 = vst.msk [vmem:[#allocation2 + $0x40] sm:$0xff] %vm168_vm0, %v3492_v8  ;;  %3480 = vst.msk [vmem:[#allocation2 + $0x18] sm:$0xff] %vm168_vm0, %v3476_v9  ;;  %v3570_v41 = vmul.f32 0.25, %v3565_v32 }
 0xaf8   : > { %v3507_v10 = vpop.xlane.xlu0 %3506  ;;  %v3582_v12 = vpop.permute.xlu1 %3581 }
 0xaf9   : > { %v3508_v11 = vmul.f32 0.0625, %v3507_v10  ;;  %v3600_v51 = vmul.f32 %v3582_v12, %v3570_v41 }
 0xafb   : > { %3512 = vst.msk [vmem:[#allocation2 + $0x68] sm:$0xff] %vm168_vm0, %v3508_v11  ;;  %v3605_v58 = vsel %vm168_vm0, %v3600_v51, 0.0 }
 0xafc   : > { %v3587_v16 = vpop.permute.xlu1 %3586 }
 0xafd   : > { %v3601_v59 = vmul.f32 %v3587_v16, %v3571_v54 }
 0xafe   : > { %v3537_v45 = vld [vmem:[#allocation2 + $0x18] sm:$0xff]  ;;  %v3542_v46 = vld [vmem:[#allocation2 + $0x40] sm:$0xff] }
 0xaff   : > { %v3547_v52 = vadd.f32 %v3542_v46, %v3537_v45  ;;  %v3607_v1 = vsel %vm168_vm0, %v3601_v59, 0.0 }
 0xb00   : > { %v3592_v28 = vpop.permute.xlu1 %3591  ;;  %v3577_v40 = vpop.permute.xlu0 %3576 }
 0xb01   : > { %v3599_v49 = vmul.f32 %v3577_v40, %v3569_v43 }
 0xb02   : > { %v3552_v50 = vld [vmem:[#allocation2 + $0x68] sm:$0xff] }
 0xb03   : > { %v3604_v55 = vsel %vm168_vm0, %v3599_v49, 0.0  ;;  %v3557_v56 = vadd.f32 %v3552_v50, %v3547_v52 }
 0xb04   : > { %v3606_v62 = vadd.f32 %v3605_v58, %v3604_v55 }
 0xb06   : > { %v3608_v4 = vadd.f32 %v3607_v1, %v3606_v62 }
 0xb31   : > { %v3523_v36 = vpop.xlane.xlu1 %3522 }
 0xb32   : > { %v3524_v39 = vmul.f32 0.0625, %v3523_v36 }
 0xb34   : > { %3528 = vst.msk [vmem:[#allocation2 + $0x90] sm:$0xff] %vm168_vm0, %v3524_v39 }
 0xb35   : > { %v3597_v63 = vpop.permute.xlu1 %3596 }
 0xb36   : > { %v3603_v3 = vmul.f32 %v3597_v63, %v3573_v61 }
 0xb38   : > { %v3612_v7 = vsel %vm3611_vm5, %v3603_v3, 0.0 }
 0xb3b   : > { %v3562_v57 = vld [vmem:[#allocation2 + $0x90] sm:$0xff] }
 0xb3c   : > { %v3567_v60 = vadd.f32 %v3562_v57, %v3557_v56 }
 0xb3e   : > { %v3572_v0 = vmul.f32 0.25, %v3567_v60 }
 0xb40   : > { %v3602_v2 = vmul.f32 %v3592_v28, %v3572_v0 }
 0xb42   : > { %v3609_v5 = vsel %vm168_vm0, %v3602_v2, 0.0 }
 0xb43   : > { %v3610_v6 = vadd.f32 %v3609_v5, %v3608_v4 }
 0xb45   : > { %v3613_v8 = vadd.f32 %v3612_v7, %v3610_v6 }
 0xb47   : > { %v3614_v9 = vrot.slane %v3613_v8, 4 }
 0xb49   : > { %v3615_v10 = vadd.f32 %v3614_v9, %v3613_v8 }
 0xb4b   : > { %v3616_v11 = vrot.slane %v3615_v10, 2 }
 0xb4d   : > { %v3617_v12 = vadd.f32 %v3616_v11, %v3615_v10 }
 0xb4f   : > { %v3618_v13 = vrot.slane %v3617_v12, 1 }
 0xb51   : > { %v3619_v14 = vadd.f32 %v3618_v13, %v3617_v12 }
 0xb53   : > { %v3620_v15 = vmul.f32 3.1415927, %v3619_v14 }
 0xb55   : > { %3621 = vst.msk [vmem:[%s162_s25] sm:$0x1] %vm176_vm1, %v3620_v15 }
 0xb56   : > { %4845 = shalt.err (!%p4842_p3)
}
 0xb57   : > { %s4846_s7 = scalar_lea.hbm %s5481_s29, 16  ;;  %s4850_s10 = scalar_lea.hbm %s5527_s3, 32 }
 0xb58   : > { %p4847_p4 = scmp.ne.s32.totalorder %s5481_s29, %s4846_s7  ;;  %p4851_p9 = scmp.lt.u32.totalorder %s5481_s29, %s5527_s3 }
 0xb59   : > { %p4852_p10 = scmp.lt.u32.totalorder %s4850_s10, %s4846_s7  ;;  %p4854_p12 = scmp.lt.u32.totalorder %s4846_s7, %s5481_s29 }
 0xb5a   : > { %p4848_p7 = pnand %p4847_p4, %p4958_p5 }
 0xb5b   : > { %p4853_p11 = por %p4852_p10, %p4851_p9 }
 0xb5c   : > { %p4849_p8 = pneg %p4848_p7 }
 0xb5d   : > { %p4855_p13 = por %p4854_p12, %p4853_p11 }
 0xb5f   : > { %p4856_p0 = pnand %p4855_p13, %p4849_p8 }
 0xb61   : > { %4859 = shalt.err (!%p4856_p0)
}
 0xb62   : > { %4788 = dma.vmem_to_hbm [thread:$0]  (%p4958_p5), %s5483_s26, 16, %s5481_s29, %s3623_s30  }
 0xb63 PF: > { %p4794_p1 = scmp.ge.s32.totalorder %s4894_s15, 2  ;;  %s3647_s19 = sand.u32 1, %s4882_s12  }
 0xb64   : > { %s3648_s20 = scalar_lea.sflag [#allocation4], %s3647_s19 }
 0xb65   : > { %p4791_p2 = pnand %p4794_p1, %p4962_p6 }
 0xb67   : > { %4877 = dma.done.wait (!%p4791_p2), %s3648_s20, 16  }
 0xb68   : > { %4879 = vsyncadd (!%p4791_p2), %s3648_s20, 4294967280  ;;  %p13_p3 = scmp.ge.s32.totalorder %s4945_s18, 4   ;;  %s5530_s12 = smov %s4886_s13 }
 0xb69   : > { %s5531_s13 = smov %s4890_s14  ;;  %s5532_s14 = smov %s4956_s21 }
 0xb6a   : > { %s5533_s15 = smov %s4945_s18  ;;  %15 = sbr.rel (!%p13_p3) target bundleno = 3 (0x3), region = 76 }
 0xb71   :  { %3652 = vsyncpa [#allocation4], 1 }
 0xb72   :  { %3654 = vsyncpa [#allocation4 + $0x1], 1 }

</bundles_post_ra>
